<compile_context>
chip_gen: v5e
topology: v5e:2x2
jax: 0.10.0
libtpu: 0.0.40
codegen_flags: <defaults>
</compile_context>

<pallas_src>
import functools

import jax
import jax.numpy as jnp
from jax.experimental import pallas as pl
from jax.experimental.pallas import tpu as pltpu


def value_net_kernel(x_ref, w1_ref, b1_ref, w2_ref, b2_ref, w3_ref, b3_ref,
                     out_ref, *, elem_bf16):
    ew = jnp.bfloat16 if elem_bf16 else jnp.float32

    # fc1 + relu  (bf16 MXU inputs, f32 accumulation).
    x = x_ref[...].astype(jnp.bfloat16)                               # [tb, D]
    h1 = jnp.dot(x, w1_ref[...], preferred_element_type=jnp.float32)
    h1 = jnp.maximum(h1.astype(ew) + b1_ref[...], 0.0)                # [tb, H]

    # fc2 + relu.
    h1_mx = h1 if elem_bf16 else h1.astype(jnp.bfloat16)
    h2 = jnp.dot(h1_mx, w2_ref[...], preferred_element_type=jnp.float32)
    h2 = jnp.maximum(h2.astype(ew) + b2_ref[...], 0.0)                # [tb, H]

    # fc_value on the (otherwise idle) MXU -> [tb, 1] f32 column.
    h2_mx = h2 if elem_bf16 else h2.astype(jnp.bfloat16)
    v = jnp.dot(h2_mx, w3_ref[...], preferred_element_type=jnp.float32)

    # Relayout the column to a lane-dense [1, tb] row so the bias add, tanh
    # (EUP) and the store run at full lane occupancy instead of 1/128.
    tb = v.shape[0]
    v = v.reshape(1, tb)
    v = jnp.tanh(v + b3_ref[0, 0])                                    # b3: SMEM scalar
    out_ref[...] = v.reshape(out_ref.shape).astype(out_ref.dtype)


def _device_traits():
    """Generation-dependent knobs (bf16 VPU availability, #TensorCores, VMEM)."""
    kind = ""
    try:
        kind = jax.devices()[0].device_kind.lower()
    except Exception:
        pass
    pre_v6 = any(t in kind for t in ("v2", "v3", "v4", "v5"))
    two_cores = ("v7" in kind) or ("7x" in kind)
    return dict(
        elem_bf16=not pre_v6,                       # bf16 VALU only on v6e/v7x
        two_cores=two_cores,                        # v7x: 2 TCs per chip
        vmem_limit=(48 << 20) if two_cores else (64 << 20),
    )


def _per_row_vmem_bytes(D, H):
    b = 2 * D * 4 + D * 2            # double-buffered f32 x tile + bf16 copy
    b += 2 * (H * 4 + H * 2)         # h1/h2 f32 accumulators + bf16 copies
    b += 4 + 2 * 4                   # value column + double-buffered out row
    return int(b * 1.25) + 16        # slack for compiler temporaries / padding


def _choose_tile_b(B, D, H, *, two_cores):
    """Largest batch tile that fits a ~24 MiB VMEM working set.

    On 1-TC chips small problems run as a single grid step (no per-step
    overhead); on v7x the grid keeps >= 4 steps so both TensorCores are fed.
    """
    budget = 24 << 20
    cap = max(512, budget // _per_row_vmem_bytes(D, H))
    cap -= cap % 512
    min_steps = 4 if two_cores else 1
    want = pl.cdiv(B, min_steps)
    if cap >= want:
        tile = -(-want // 8) * 8     # whole per-core chunk fits: round up to x8
    else:
        tile = cap                   # VMEM-limited tile (multiple of 512)
    return max(8, tile)


def value_network_forward(x, params, *, tile_b=None):
    """x: [B, D] float32 (or bfloat16). params: w1,b1,w2,b2,w3,b3. Returns [B,1] f32."""
    w1, b1, w2, b2, w3, b3 = (params["w1"], params["b1"], params["w2"],
                              params["b2"], params["w3"], params["b3"])
    B, D = x.shape
    H = w1.shape[1]

    traits = _device_traits()
    elem_bf16 = traits["elem_bf16"]
    if tile_b is None:
        tile_b = _choose_tile_b(B, D, H, two_cores=traits["two_cores"])
    assert tile_b > 0 and tile_b % 8 == 0, "tile_b must be a positive multiple of 8"

    # Pad ragged batches up to a whole number of tiles; extra rows are sliced off.
    b_pad = pl.cdiv(B, tile_b) * tile_b
    if b_pad != B:
        x = jnp.pad(x, ((0, b_pad - B), (0, 0)))
    grid = (b_pad // tile_b,)

    ew = jnp.bfloat16 if elem_bf16 else jnp.float32
    w1_mx = w1.astype(jnp.bfloat16)                 # MXU operands in bf16 (tiny)
    w2_mx = w2.astype(jnp.bfloat16)
    w3_mx = w3.reshape(H, 1).astype(jnp.bfloat16)
    b1_row = b1.reshape(1, H).astype(ew)
    b2_row = b2.reshape(1, H).astype(ew)
    b3_sc = b3.reshape(1, 1).astype(jnp.float32)    # SMEM scalar

    kernel = functools.partial(value_net_kernel, elem_bf16=elem_bf16)

    out = pl.pallas_call(
        kernel,
        out_shape=jax.ShapeDtypeStruct((grid[0], 1, tile_b), jnp.float32),
        grid_spec=pltpu.PrefetchScalarGridSpec(
            num_scalar_prefetch=0,
            grid=grid,
            in_specs=[
                pl.BlockSpec((tile_b, D), lambda i: (i, 0)),   # x tile (streamed)
                pl.BlockSpec((D, H), lambda i: (0, 0)),        # w1 bf16 (resident)
                pl.BlockSpec((1, H), lambda i: (0, 0)),        # b1
                pl.BlockSpec((H, H), lambda i: (0, 0)),        # w2 bf16 (resident)
                pl.BlockSpec((1, H), lambda i: (0, 0)),        # b2
                pl.BlockSpec((H, 1), lambda i: (0, 0)),        # w3 column bf16
                pl.BlockSpec(memory_space=pltpu.MemorySpace.SMEM),  # b3 scalar
            ],
            out_specs=pl.BlockSpec((1, 1, tile_b), lambda i: (i, 0, 0)),
        ),
        compiler_params=pltpu.CompilerParams(
            dimension_semantics=("parallel",),
            vmem_limit_bytes=traits["vmem_limit"],
        ),
    )(x, w1_mx, b1_row, w2_mx, b2_row, w3_mx, b3_sc)

    # (G, 1, tile_b) flattens in batch order; drop padding and restore (B, 1).
    return out.reshape(b_pad)[:B].reshape(B, 1)


def init_params(key, input_dim, hidden_dim=64, dtype=jnp.float32):
    """Deterministic init mimicking nn.Linear's U(-1/sqrt(fan_in), 1/sqrt(fan_in))."""
    ks = jax.random.split(key, 6)

    def uniform(k, shape, fan_in):
        bound = 1.0 / jnp.sqrt(jnp.asarray(fan_in, dtype))
        return jax.random.uniform(k, shape, dtype, -bound, bound)

    return {
        "w1": uniform(ks[0], (input_dim, hidden_dim), input_dim),
        "b1": uniform(ks[1], (hidden_dim,), input_dim),
        "w2": uniform(ks[2], (hidden_dim, hidden_dim), hidden_dim),
        "b2": uniform(ks[3], (hidden_dim,), hidden_dim),
        "w3": uniform(ks[4], (hidden_dim, 1), hidden_dim),
        "b3": uniform(ks[5], (1,), hidden_dim),
    }


def reference_forward(x, p, *, elem_bf16=True):
    """Pure-JAX reference with the same dtype recipe as the kernel."""
    ew = jnp.bfloat16 if elem_bf16 else jnp.float32
    h1 = jnp.dot(x.astype(jnp.bfloat16), p["w1"].astype(jnp.bfloat16),
                 preferred_element_type=jnp.float32)
    h1 = jnp.maximum(h1.astype(ew) + p["b1"].astype(ew), 0.0)
    h2 = jnp.dot(h1.astype(jnp.bfloat16), p["w2"].astype(jnp.bfloat16),
                 preferred_element_type=jnp.float32)
    h2 = jnp.maximum(h2.astype(ew) + p["b2"].astype(ew), 0.0)
    v = jnp.dot(h2.astype(jnp.bfloat16), p["w3"].astype(jnp.bfloat16),
                preferred_element_type=jnp.float32)
    return jnp.tanh(v + p["b3"].reshape(1, 1).astype(jnp.float32))


if __name__ == "__main__":
    key = jax.random.PRNGKey(0)
    k_x, k_p = jax.random.split(key)

    # Ragged B exercises the pad-to-tile path flagged in the review.
    B, INPUT_DIM, HIDDEN = 500, 32, 64
    x = jax.random.normal(k_x, (B, INPUT_DIM), dtype=jnp.float32)
    params = init_params(k_p, INPUT_DIM, HIDDEN)

    out = jax.block_until_ready(value_network_forward(x, params))

    traits = _device_traits()
    ref = reference_forward(x, params, elem_bf16=traits["elem_bf16"])
    assert out.shape == (B, 1)
    max_err = float(jnp.max(jnp.abs(out - ref)))
    assert jnp.allclose(out, ref, atol=1e-2, rtol=1e-2), max_err

    print("KERNEL_OK")
</pallas_src>

<mosaic_0001>
module attributes {stable_mosaic.version = 11 : i64} {
  func.func @value_net_kernel(%arg0: i32, %arg1: memref<504x32xf32, #tpu.memory_space<vmem>>, %arg2: memref<32x64xbf16, #tpu.memory_space<vmem>>, %arg3: memref<1x64xbf16, #tpu.memory_space<vmem>>, %arg4: memref<64x64xbf16, #tpu.memory_space<vmem>>, %arg5: memref<1x64xbf16, #tpu.memory_space<vmem>>, %arg6: memref<64x1xbf16, #tpu.memory_space<vmem>>, %arg7: memref<1x1xf32, #tpu.memory_space<smem>>, %arg8: memref<1x1x504xf32, #tpu.memory_space<vmem>>) attributes {dimension_semantics = [#tpu.dimension_semantics<parallel>], iteration_bounds = array<i64: 1>, scalar_prefetch = 0 : i64, scratch_operands = 0 : i64, tpu.core_type = #tpu.core_type<tc>, window_params = [{transform_indices = @transform_0, window_bounds = array<i64: 504, 32>}, {pipeline_mode = #tpu.pipeline_mode<synchronous>, transform_indices = @transform_1, window_bounds = array<i64: 32, 64>}, {pipeline_mode = #tpu.pipeline_mode<synchronous>, transform_indices = @transform_2, window_bounds = array<i64: 1, 64>}, {pipeline_mode = #tpu.pipeline_mode<synchronous>, transform_indices = @transform_3, window_bounds = array<i64: 64, 64>}, {pipeline_mode = #tpu.pipeline_mode<synchronous>, transform_indices = @transform_4, window_bounds = array<i64: 1, 64>}, {pipeline_mode = #tpu.pipeline_mode<synchronous>, transform_indices = @transform_5, window_bounds = array<i64: 64, 1>}, {transform_indices = @transform_6, window_bounds = array<i64: 1, 1>}, {transform_indices = @transform_7, window_bounds = array<i64: 1, 1, 504>}]} {
    %c0 = arith.constant 0 : index
    %c0_0 = arith.constant 0 : index
    %0 = vector.load %arg1[%c0, %c0_0] : memref<504x32xf32, #tpu.memory_space<vmem>>, vector<504x32xf32>
    %1 = arith.truncf %0 : vector<504x32xf32> to vector<504x32xbf16>
    %c0_1 = arith.constant 0 : index
    %c0_2 = arith.constant 0 : index
    %2 = vector.load %arg2[%c0_1, %c0_2] : memref<32x64xbf16, #tpu.memory_space<vmem>>, vector<32x64xbf16>
    %cst = arith.constant dense<0.000000e+00> : vector<504x64xf32>
    %3 = tpu.matmul %1, %2, %cst {dimension_numbers = #tpu.dot_dimension_numbers<[1], [0], [0], [1], [0, 0, 1, 1], [], []>} : vector<504x32xbf16>, vector<32x64xbf16>, vector<504x64xf32> -> vector<504x64xf32>
    %4 = arith.truncf %3 : vector<504x64xf32> to vector<504x64xbf16>
    %c0_3 = arith.constant 0 : index
    %c0_4 = arith.constant 0 : index
    %5 = vector.load %arg3[%c0_3, %c0_4] : memref<1x64xbf16, #tpu.memory_space<vmem>>, vector<1x64xbf16>
    %6 = vector.broadcast %5 : vector<1x64xbf16> to vector<504x64xbf16>
    %7 = arith.addf %4, %6 : vector<504x64xbf16>
    %cst_5 = arith.constant 0.000000e+00 : bf16
    %8 = vector.broadcast %cst_5 : bf16 to vector<504x64xbf16>
    %9 = arith.maximumf %7, %8 : vector<504x64xbf16>
    %c0_6 = arith.constant 0 : index
    %c0_7 = arith.constant 0 : index
    %10 = vector.load %arg4[%c0_6, %c0_7] : memref<64x64xbf16, #tpu.memory_space<vmem>>, vector<64x64xbf16>
    %cst_8 = arith.constant dense<0.000000e+00> : vector<504x64xf32>
    %11 = tpu.matmul %9, %10, %cst_8 {dimension_numbers = #tpu.dot_dimension_numbers<[1], [0], [0], [1], [0, 0, 1, 1], [], []>} : vector<504x64xbf16>, vector<64x64xbf16>, vector<504x64xf32> -> vector<504x64xf32>
    %12 = arith.truncf %11 : vector<504x64xf32> to vector<504x64xbf16>
    %c0_9 = arith.constant 0 : index
    %c0_10 = arith.constant 0 : index
    %13 = vector.load %arg5[%c0_9, %c0_10] : memref<1x64xbf16, #tpu.memory_space<vmem>>, vector<1x64xbf16>
    %14 = vector.broadcast %13 : vector<1x64xbf16> to vector<504x64xbf16>
    %15 = arith.addf %12, %14 : vector<504x64xbf16>
    %cst_11 = arith.constant 0.000000e+00 : bf16
    %16 = vector.broadcast %cst_11 : bf16 to vector<504x64xbf16>
    %17 = arith.maximumf %15, %16 : vector<504x64xbf16>
    %c0_12 = arith.constant 0 : index
    %c0_13 = arith.constant 0 : index
    %18 = vector.load %arg6[%c0_12, %c0_13] : memref<64x1xbf16, #tpu.memory_space<vmem>>, vector<64x1xbf16>
    %cst_14 = arith.constant dense<0.000000e+00> : vector<504x1xf32>
    %19 = tpu.matmul %17, %18, %cst_14 {dimension_numbers = #tpu.dot_dimension_numbers<[1], [0], [0], [1], [0, 0, 1, 1], [], []>} : vector<504x64xbf16>, vector<64x1xbf16>, vector<504x1xf32> -> vector<504x1xf32>
    %20 = vector.shape_cast %19 : vector<504x1xf32> to vector<1x504xf32>
    %c0_15 = arith.constant 0 : index
    %c0_16 = arith.constant 0 : index
    %21 = memref.load %arg7[%c0_15, %c0_16] : memref<1x1xf32, #tpu.memory_space<smem>>
    %22 = vector.broadcast %21 : f32 to vector<1x504xf32>
    %23 = arith.addf %20, %22 : vector<1x504xf32>
    %24 = math.tanh %23 : vector<1x504xf32>
    %25 = vector.shape_cast %24 : vector<1x504xf32> to vector<1x1x504xf32>
    %c0_17 = arith.constant 0 : index
    %c0_18 = arith.constant 0 : index
    %c0_19 = arith.constant 0 : index
    %26 = vector.load %arg8[%c0_17, %c0_18, %c0_19] : memref<1x1x504xf32, #tpu.memory_space<vmem>>, vector<1x1x504xf32>
    tpu.vector_store %arg8[%c0_17, %c0_18, %c0_19], %25 {strides = array<i32>} : memref<1x1x504xf32, #tpu.memory_space<vmem>>, vector<1x1x504xf32>,
    return
  }
  func.func @transform_0(%arg0: i32) -> (i32, i32) {
    %c0_i32 = arith.constant 0 : i32
    %c0_i32_0 = arith.constant 0 : i32
    return %arg0, %c0_i32 : i32, i32
  }
  func.func @transform_1(%arg0: i32) -> (i32, i32) {
    %c0_i32 = arith.constant 0 : i32
    %c0_i32_0 = arith.constant 0 : i32
    %c0_i32_1 = arith.constant 0 : i32
    return %c0_i32, %c0_i32_0 : i32, i32
  }
  func.func @transform_2(%arg0: i32) -> (i32, i32) {
    %c0_i32 = arith.constant 0 : i32
    %c0_i32_0 = arith.constant 0 : i32
    %c0_i32_1 = arith.constant 0 : i32
    return %c0_i32, %c0_i32_0 : i32, i32
  }
  func.func @transform_3(%arg0: i32) -> (i32, i32) {
    %c0_i32 = arith.constant 0 : i32
    %c0_i32_0 = arith.constant 0 : i32
    %c0_i32_1 = arith.constant 0 : i32
    return %c0_i32, %c0_i32_0 : i32, i32
  }
  func.func @transform_4(%arg0: i32) -> (i32, i32) {
    %c0_i32 = arith.constant 0 : i32
    %c0_i32_0 = arith.constant 0 : i32
    %c0_i32_1 = arith.constant 0 : i32
    return %c0_i32, %c0_i32_0 : i32, i32
  }
  func.func @transform_5(%arg0: i32) -> (i32, i32) {
    %c0_i32 = arith.constant 0 : i32
    %c0_i32_0 = arith.constant 0 : i32
    %c0_i32_1 = arith.constant 0 : i32
    return %c0_i32, %c0_i32_0 : i32, i32
  }
  func.func @transform_6(%arg0: i32) -> (i32, i32) {
    %c0_i32 = arith.constant 0 : i32
    %c0_i32_0 = arith.constant 0 : i32
    %c0_i32_1 = arith.constant 0 : i32
    return %c0_i32, %c0_i32_0 : i32, i32
  }
  func.func @transform_7(%arg0: i32) -> (i32, i32, i32) {
    %c0_i32 = arith.constant 0 : i32
    %c0_i32_0 = arith.constant 0 : i32
    %c0_i32_1 = arith.constant 0 : i32
    return %arg0, %c0_i32, %c0_i32_0 : i32, i32, i32
  }
}

</mosaic_0001>

<bundles_post_ra>
// kernel: tpu_custom_call.1
= control target key start
LH: loop header
LB: loop body
LE: loop exit
PB: predicated region body
PF: predicated region fallthrough
CT: control target
= control target key end

     0   :  { %s4495_s0 = inlined_call_operand.vmem [shape: f32[504,32], index: 0, kind: input, shape index: {}]   ;;  %s4496_s1 = inlined_call_operand.vmem [shape: bf16[32,64], index: 1, kind: input, shape index: {}]   ;;  %s4497_s2 = inlined_call_operand.vmem [shape: bf16[1,64], index: 2, kind: input, shape index: {}]   ;;  %s4498_s3 = inlined_call_operand.vmem [shape: bf16[64,64], index: 3, kind: input, shape index: {}]   ;;  %s4499_s4 = inlined_call_operand.vmem [shape: bf16[1,64], index: 4, kind: input, shape index: {}]   ;;  %s4500_s5 = inlined_call_operand.vmem [shape: bf16[64,1], index: 5, kind: input, shape index: {}]   ;;  %s4501_s6 = inlined_call_operand.<no memory space> [shape: f32[1,1], index: 6, kind: input, shape index: {}]   ;;  %s4502_s7 = inlined_call_operand.hbm [shape: f32[1,1,504], index: 7, kind: output, shape index: {}]  }
   0x1   :  { %v3547_v0 = vld [vmem:[%s4496_s1 + $0x8] sm:$0xff]  ;;  %v3546_v1 = vld [vmem:[%s4496_s1] sm:$0xff] }
   0x2   :  { %243 = vmatpush.bf16.msra.mxu0 %v3547_v0  ;;  %v29_v2 = vld [vmem:[%s4495_s0] sm:$0xff]  ;;  %v30_v3 = vld [vmem:[%s4495_s0 + $0x8] sm:$0xff]  ;;  %3556 = vmatpush.bf16.msra.mxu3 %v3547_v0 }
   0x3   :  { %13 = vsyncpa [#allocation4], 0  ;;  %v92_v4 = vpack.c.bf16 %v30_v3, %v29_v2  ;;  %vm140_vm0 = vcmask 261120   ;;  %v31_v5 = vld [vmem:[%s4495_s0 + $0x10] sm:$0xff]  ;;  %v32_v6 = vld [vmem:[%s4495_s0 + $0x18] sm:$0xff]  ;;  %vm853_vm1 = vcmask 523264  }
   0x4   :  { %v93_v7 = vpack.c.bf16 %v32_v6, %v31_v5  ;;  %v33_v8 = vld [vmem:[%s4495_s0 + $0x20] sm:$0xff]  ;;  %v34_v9 = vld [vmem:[%s4495_s0 + $0x28] sm:$0xff]  ;;  %v35_v11 = vld [vmem:[%s4495_s0 + $0x30] sm:$0xff]  ;;  %vm3230_vm2 = vcmask 130112   ;;  %vm3234_vm3 = vcmask 195712   ;;  %vm3238_vm4 = vcmask 261312  }
   0x5   :  { %v94_v10 = vpack.c.bf16 %v34_v9, %v33_v8  ;;  %v36_v12 = vld [vmem:[%s4495_s0 + $0x38] sm:$0xff]  ;;  %v37_v14 = vld [vmem:[%s4495_s0 + $0x40] sm:$0xff]  ;;  %v38_v15 = vld [vmem:[%s4495_s0 + $0x48] sm:$0xff]  ;;  %vm3242_vm5 = vcmask 326912   ;;  %vm3246_vm6 = vcmask 392512   ;;  %vm3250_vm7 = vcmask 458112  }
   0x6   :  { %244 = vmatpush.bf16.msra.mxu0 %v3546_v1  ;;  %3557 = vmatpush.bf16.msra.mxu3 %v3546_v1  ;;  %v95_v13 = vpack.c.bf16 %v36_v12, %v35_v11  ;;  %v96_v16 = vpack.c.bf16 %v38_v15, %v37_v14  ;;  %v39_v17 = vld [vmem:[%s4495_s0 + $0x50] sm:$0xff]  ;;  %v40_v18 = vld [vmem:[%s4495_s0 + $0x58] sm:$0xff]  ;;  %v41_v20 = vld [vmem:[%s4495_s0 + $0x60] sm:$0xff]  ;;  %vm3254_vm8 = vcmask 523712   ;;  %vm3258_vm9 = vcmask 589312   ;;  %s3401_s20 = sshll.u32 %s4502_s7, 4  ;;  %s3402_s20 = int_to_ptr.hbm [resolvable:$true] %s3401_s20 }
   0x7   :  { %v97_v19 = vpack.c.bf16 %v40_v18, %v39_v17  ;;  %v42_v21 = vld [vmem:[%s4495_s0 + $0x68] sm:$0xff]  ;;  %v3551_v23 = vld [vmem:[%s4498_s3 + $0x18] sm:$0xff]  ;;  %v3550_v24 = vld [vmem:[%s4498_s3 + $0x10] sm:$0xff]  ;;  %vm3262_vm10 = vcmask 654912   ;;  %vm3266_vm11 = vcmask 720512   ;;  %vm3270_vm12 = vcmask 786112  }
   0x8   :  { %v98_v22 = vpack.c.bf16 %v42_v21, %v41_v20  ;;  %954 = vmatpush.bf16.msra.mxu1 %v3551_v23  ;;  %v3549_v25 = vld [vmem:[%s4498_s3 + $0x8] sm:$0xff]  ;;  %v43_v26 = vld [vmem:[%s4495_s0 + $0x70] sm:$0xff]  ;;  %v44_v27 = vld [vmem:[%s4495_s0 + $0x78] sm:$0xff]  ;;  %vm3274_vm13 = vcmask 851712   ;;  %vm3278_vm14 = vcmask 917312   ;;  %vm3282_vm15 = vcmask 982912  }
   0x9   :  { %3418 = vmatmul.msk.bf16.vlgmr.msra.gmra.mxu0 %vm140_vm0, %v92_v4  ;;  %v3548_v28 = vld [vmem:[%s4498_s3] sm:$0xff]  ;;  %v99_v29 = vpack.c.bf16 %v44_v27, %v43_v26  ;;  %v46_v32 = vld [vmem:[%s4495_s0 + $0x88] sm:$0xff]  ;;  %v47_v44 = vld [vmem:[%s4495_s0 + $0x90] sm:$0xff] }
   0xa   :  { %3558 = vmatpush.bf16.msrb.mxu3 %v3551_v23  ;;  %v468_v30 = vld [vmem:[%s4497_s2] sm:$0x1]  ;;  %v48_v45 = vld [vmem:[%s4495_s0 + $0x98] sm:$0xff]  ;;  %v50_v59 = vld [vmem:[%s4495_s0 + $0xa8] sm:$0xff] }
   0xb   :  { %v45_v31 = vld [vmem:[%s4495_s0 + $0x80] sm:$0xff]  ;;  %v470_v33 = vpack.i.b16 %v468_v30, %v468_v30  ;;  %v101_v49 = vpack.c.bf16 %v48_v45, %v47_v44  ;;  %v51_v8 = vld [vmem:[%s4495_s0 + $0xb0] sm:$0xff]  ;;  %v52_v9 = vld [vmem:[%s4495_s0 + $0xb8] sm:$0xff] }
   0xc   :  { %955 = vmatpush.bf16.msra.mxu1 %v3550_v24  ;;  %v100_v34 = vpack.c.bf16 %v46_v32, %v45_v31  ;;  %v49_v58 = vld [vmem:[%s4495_s0 + $0xa0] sm:$0xff]  ;;  %v54_v23 = vld [vmem:[%s4495_s0 + $0xc8] sm:$0xff] }
   0xd   :  { %v472_v37 = vperm.slane %v470_v33, 0  ;;  %v102_v63 = vpack.c.bf16 %v50_v59, %v49_v58 }
   0xe   :  { %3559 = vmatpush.bf16.msrb.mxu3 %v3550_v24 }
   0xf   :  { %v3849_v39 = vunpack.c.l.bf16 %v472_v37  ;;  %v56_v37 = vld [vmem:[%s4495_s0 + $0xd8] sm:$0xff] }
  0x10   :  { %956 = vmatpush.bf16.msra.mxu1 %v3549_v25 }
  0x12   :  { %3560 = vmatpush.bf16.msrb.mxu3 %v3549_v25 }
  0x14   :  { %957 = vmatpush.bf16.msra.mxu1 %v3548_v28 }
  0x16   :  { %3561 = vmatpush.bf16.msrb.mxu3 %v3548_v28 }
  0x19   :  { %3419 = vmatmul.msk.bf16.gmra.mxu0 %vm140_vm0, %v93_v7 }
  0x29   :  { %3420 = vmatmul.msk.bf16.gmra.mxu0 %vm140_vm0, %v94_v10 }
  0x39   :  { %3421 = vmatmul.msk.bf16.gmra.mxu0 %vm140_vm0, %v95_v13  ;;  %v103_v13 = vpack.c.bf16 %v52_v9, %v51_v8  ;;  %v3922_v9 = vld [vmem:[%s4500_s5 + $0x18] sm:$0xff] }
  0x3a   :  { %1666 = vmatpush.bf16.msra.mxu2 %v3922_v9 }
  0x49   :  { %3422 = vmatmul.msk.bf16.gmra.mxu0 %vm140_vm0, %v96_v16 }
  0x59   :  { %3423 = vmatmul.msk.bf16.gmra.mxu0 %vm140_vm0, %v97_v19 }
  0x69   :  { %3424 = vmatmul.msk.bf16.gmra.mxu0 %vm140_vm0, %v98_v22  ;;  %v53_v22 = vld [vmem:[%s4495_s0 + $0xc0] sm:$0xff] }
  0x6a   :  { %v104_v27 = vpack.c.bf16 %v54_v23, %v53_v22 }
  0x79   :  { %3425 = vmatmul.msk.bf16.gmra.mxu0 %vm140_vm0, %v99_v29 }
  0x86   :  { %v246_v35 = vpop.f32.mrf.mxu0 }
  0x87   :  { %v405_v36 = vpack.c.bf16 %v246_v35, %v246_v35 }
  0x89   :  { %3426 = vmatmul.msk.bf16.gmra.mxu0 %vm140_vm0, %v100_v34  ;;  %v473_v38 = vunpack.c.l.bf16 %v405_v36  ;;  %v55_v36 = vld [vmem:[%s4495_s0 + $0xd0] sm:$0xff] }
  0x8b   :  { %v537_v42 = vadd.f32 %v3849_v39, %v473_v38 }
  0x8d   :  { %v726_v47 = vmax.f32 %v537_v42, 0.0  ;;  %v105_v42 = vpack.c.bf16 %v56_v37, %v55_v36 }
  0x8e   :  { %v248_v40 = vpop.f32.mrf.mxu0 }
  0x8f   :  { %v406_v41 = vpack.c.bf16 %v248_v40, %v248_v40 }
  0x91   :  { %v474_v43 = vunpack.c.l.bf16 %v406_v41 }
  0x93   :  { %v538_v46 = vadd.f32 %v3849_v39, %v474_v43 }
  0x95   :  { %v727_v48 = vmax.f32 %v538_v46, 0.0 }
  0x96   :  { %v251_v50 = vpop.f32.mrf.mxu0 }
  0x97   :  { %v789_v51 = vpack.c.bf16 %v727_v48, %v726_v47  ;;  %v407_v52 = vpack.c.bf16 %v251_v50, %v251_v50 }
  0x99   :  { %3427 = vmatmul.msk.bf16.gmra.mxu0 %vm140_vm0, %v101_v49  ;;  %3466 = vmatmul.msk.bf16.vlgmr.msra.gmra.mxu1 %vm853_vm1, %v789_v51  ;;  %v475_v53 = vunpack.c.l.bf16 %v407_v52  ;;  %v57_v51 = vld [vmem:[%s4495_s0 + $0xe0] sm:$0xff]  ;;  %v58_v52 = vld [vmem:[%s4495_s0 + $0xe8] sm:$0xff] }
  0x9b   :  { %v539_v56 = vadd.f32 %v3849_v39, %v475_v53 }
  0x9d   :  { %v728_v61 = vmax.f32 %v539_v56, 0.0  ;;  %v106_v56 = vpack.c.bf16 %v58_v52, %v57_v51 }
  0x9e   :  { %v253_v54 = vpop.f32.mrf.mxu0 }
  0x9f   :  { %v408_v55 = vpack.c.bf16 %v253_v54, %v253_v54 }
  0xa1   :  { %v476_v57 = vunpack.c.l.bf16 %v408_v55 }
  0xa3   :  { %v540_v60 = vadd.f32 %v3849_v39, %v476_v57 }
  0xa5   :  { %v729_v62 = vmax.f32 %v540_v60, 0.0 }
  0xa6   :  { %v256_v0 = vpop.f32.mrf.mxu0 }
  0xa7   :  { %v790_v1 = vpack.c.bf16 %v729_v62, %v728_v61  ;;  %v409_v2 = vpack.c.bf16 %v256_v0, %v256_v0 }
  0xa9   :  { %3428 = vmatmul.msk.bf16.gmra.mxu0 %vm140_vm0, %v102_v63  ;;  %3467 = vmatmul.msk.bf16.gmra.mxu1 %vm853_vm1, %v790_v1  ;;  %v477_v3 = vunpack.c.l.bf16 %v409_v2  ;;  %v59_v1 = vld [vmem:[%s4495_s0 + $0xf0] sm:$0xff]  ;;  %v60_v2 = vld [vmem:[%s4495_s0 + $0xf8] sm:$0xff] }
  0xab   :  { %v541_v6 = vadd.f32 %v3849_v39, %v477_v3 }
  0xad   :  { %v730_v11 = vmax.f32 %v541_v6, 0.0  ;;  %v107_v6 = vpack.c.bf16 %v60_v2, %v59_v1 }
  0xae   :  { %v258_v4 = vpop.f32.mrf.mxu0 }
  0xaf   :  { %v410_v5 = vpack.c.bf16 %v258_v4, %v258_v4 }
  0xb1   :  { %v478_v7 = vunpack.c.l.bf16 %v410_v5 }
  0xb3   :  { %v542_v10 = vadd.f32 %v3849_v39, %v478_v7 }
  0xb5   :  { %v731_v12 = vmax.f32 %v542_v10, 0.0 }
  0xb6   :  { %v261_v14 = vpop.f32.mrf.mxu0 }
  0xb7   :  { %v791_v15 = vpack.c.bf16 %v731_v12, %v730_v11  ;;  %v411_v16 = vpack.c.bf16 %v261_v14, %v261_v14  ;;  %v3930_v11 = vld [vmem:[%s4500_s5 + $0x10] sm:$0xff] }
  0xb8   :  { %1667 = vmatpush.bf16.msra.mxu2 %v3930_v11 }
  0xb9   :  { %3429 = vmatmul.msk.bf16.gmra.mxu0 %vm140_vm0, %v103_v13  ;;  %3468 = vmatmul.msk.bf16.gmra.mxu1 %vm853_vm1, %v791_v15  ;;  %v479_v17 = vunpack.c.l.bf16 %v411_v16  ;;  %v3936_v15 = vld [vmem:[%s4500_s5 + $0x8] sm:$0xff] }
  0xbb   :  { %v543_v20 = vadd.f32 %v3849_v39, %v479_v17 }
  0xbc   :  { %1668 = vmatpush.bf16.msra.mxu2 %v3936_v15 }
  0xbd   :  { %v732_v25 = vmax.f32 %v543_v20, 0.0 }
  0xbe   :  { %v263_v18 = vpop.f32.mrf.mxu0 }
  0xbf   :  { %v412_v19 = vpack.c.bf16 %v263_v18, %v263_v18  ;;  %v61_v18 = vld [vmem:[%s4495_s0 + $0x100] sm:$0xff] }
  0xc1   :  { %v480_v21 = vunpack.c.l.bf16 %v412_v19  ;;  %v62_v19 = vld [vmem:[%s4495_s0 + $0x108] sm:$0xff] }
  0xc3   :  { %v544_v24 = vadd.f32 %v3849_v39, %v480_v21  ;;  %v3950_v21 = vld [vmem:[%s4500_s5] sm:$0xff] }
  0xc4   :  { %1669 = vmatpush.bf16.msra.mxu2 %v3950_v21 }
  0xc5   :  { %v733_v26 = vmax.f32 %v544_v24, 0.0  ;;  %v108_v24 = vpack.c.bf16 %v62_v19, %v61_v18 }
  0xc6   :  { %v266_v28 = vpop.f32.mrf.mxu0 }
  0xc7   :  { %v792_v29 = vpack.c.bf16 %v733_v26, %v732_v25  ;;  %v413_v30 = vpack.c.bf16 %v266_v28, %v266_v28 }
  0xc9   :  { %3430 = vmatmul.msk.bf16.gmra.mxu0 %vm140_vm0, %v104_v27  ;;  %3469 = vmatmul.msk.bf16.gmra.mxu1 %vm853_vm1, %v792_v29  ;;  %v481_v31 = vunpack.c.l.bf16 %v413_v30 }
  0xcb   :  { %v545_v34 = vadd.f32 %v3849_v39, %v481_v31 }
  0xcd   :  { %v734_v40 = vmax.f32 %v545_v34, 0.0  ;;  %v63_v34 = vld [vmem:[%s4495_s0 + $0x110] sm:$0xff] }
  0xce   :  { %v268_v32 = vpop.f32.mrf.mxu0 }
  0xcf   :  { %v414_v33 = vpack.c.bf16 %v268_v32, %v268_v32 }
  0xd1   :  { %v482_v35 = vunpack.c.l.bf16 %v414_v33  ;;  %v1181_v33 = vld [vmem:[%s4499_s4] sm:$0x1] }
  0xd3   :  { %v546_v38 = vadd.f32 %v3849_v39, %v482_v35  ;;  %v64_v35 = vld [vmem:[%s4495_s0 + $0x118] sm:$0xff] }
  0xd5   :  { %v735_v41 = vmax.f32 %v546_v38, 0.0 }
  0xd6   :  { %v271_v43 = vpop.f32.mrf.mxu0 }
  0xd7   :  { %v793_v44 = vpack.c.bf16 %v735_v41, %v734_v40  ;;  %v415_v45 = vpack.c.bf16 %v271_v43, %v271_v43  ;;  %v1183_v40 = vpack.i.b16 %v1181_v33, %v1181_v33  ;;  %v109_v41 = vpack.c.bf16 %v64_v35, %v63_v34 }
  0xd9   :  { %3431 = vmatmul.msk.bf16.gmra.mxu0 %vm140_vm0, %v105_v42  ;;  %3470 = vmatmul.msk.bf16.gmra.mxu1 %vm853_vm1, %v793_v44  ;;  %v483_v46 = vunpack.c.l.bf16 %v415_v45 }
  0xdb   :  { %v547_v49 = vadd.f32 %v3849_v39, %v483_v46 }
  0xdd   :  { %v736_v54 = vmax.f32 %v547_v49, 0.0 }
  0xde   :  { %v273_v47 = vpop.f32.mrf.mxu0 }
  0xdf   :  { %v416_v48 = vpack.c.bf16 %v273_v47, %v273_v47  ;;  %v1185_v47 = vperm.slane %v1183_v40, 0 }
  0xe1   :  { %v484_v50 = vunpack.c.l.bf16 %v416_v48 }
  0xe3   :  { %v548_v53 = vadd.f32 %v3849_v39, %v484_v50  ;;  %v3968_v50 = vunpack.c.l.bf16 %v1185_v47 }
  0xe5   :  { %v737_v55 = vmax.f32 %v548_v53, 0.0 }
  0xe6   :  { %v276_v57 = vpop.f32.mrf.mxu0 }
  0xe7   :  { %v794_v58 = vpack.c.bf16 %v737_v55, %v736_v54  ;;  %v417_v59 = vpack.c.bf16 %v276_v57, %v276_v57 }
  0xe9   :  { %3432 = vmatmul.msk.bf16.gmra.mxu0 %vm140_vm0, %v106_v56  ;;  %3471 = vmatmul.msk.bf16.gmra.mxu1 %vm853_vm1, %v794_v58  ;;  %v485_v60 = vunpack.c.l.bf16 %v417_v59  ;;  %v65_v59 = vld [vmem:[%s4495_s0 + $0x120] sm:$0xff] }
  0xeb   :  { %v549_v63 = vadd.f32 %v3849_v39, %v485_v60  ;;  %v66_v60 = vld [vmem:[%s4495_s0 + $0x128] sm:$0xff] }
  0xed   :  { %v738_v4 = vmax.f32 %v549_v63, 0.0  ;;  %v110_v63 = vpack.c.bf16 %v66_v60, %v65_v59 }
  0xee   :  { %v278_v61 = vpop.f32.mrf.mxu0 }
  0xef   :  { %v418_v62 = vpack.c.bf16 %v278_v61, %v278_v61 }
  0xf1   :  { %v486_v0 = vunpack.c.l.bf16 %v418_v62 }
  0xf3   :  { %v550_v3 = vadd.f32 %v3849_v39, %v486_v0 }
  0xf5   :  { %v739_v5 = vmax.f32 %v550_v3, 0.0 }
  0xf6   :  { %v281_v7 = vpop.f32.mrf.mxu0 }
  0xf7   :  { %v795_v8 = vpack.c.bf16 %v739_v5, %v738_v4  ;;  %v419_v10 = vpack.c.bf16 %v281_v7, %v281_v7 }
  0xf9   :  { %3433 = vmatmul.msk.bf16.gmra.mxu0 %vm140_vm0, %v107_v6  ;;  %3472 = vmatmul.msk.bf16.gmra.mxu1 %vm853_vm1, %v795_v8  ;;  %v487_v12 = vunpack.c.l.bf16 %v419_v10 }
  0xfb   :  { %v551_v16 = vadd.f32 %v3849_v39, %v487_v12 }
  0xfd   :  { %v740_v22 = vmax.f32 %v551_v16, 0.0 }
  0xfe   :  { %v283_v13 = vpop.f32.mrf.mxu0 }
  0xff   :  { %v420_v14 = vpack.c.bf16 %v283_v13, %v283_v13 }
 0x101   :  { %v488_v17 = vunpack.c.l.bf16 %v420_v14 }
 0x103   :  { %v552_v20 = vadd.f32 %v3849_v39, %v488_v17 }
 0x105   :  { %v741_v23 = vmax.f32 %v552_v20, 0.0 }
 0x106   :  { %v286_v25 = vpop.f32.mrf.mxu0 }
 0x107   :  { %v796_v26 = vpack.c.bf16 %v741_v23, %v740_v22  ;;  %v421_v27 = vpack.c.bf16 %v286_v25, %v286_v25  ;;  %v68_v25 = vld [vmem:[%s4495_s0 + $0x138] sm:$0xff] }
 0x109   :  { %3434 = vmatmul.msk.bf16.gmra.mxu0 %vm140_vm0, %v108_v24  ;;  %3473 = vmatmul.msk.bf16.gmra.mxu1 %vm853_vm1, %v796_v26  ;;  %v489_v28 = vunpack.c.l.bf16 %v421_v27  ;;  %v67_v24 = vld [vmem:[%s4495_s0 + $0x130] sm:$0xff] }
 0x10b   :  { %v553_v31 = vadd.f32 %v3849_v39, %v489_v28  ;;  %v111_v28 = vpack.c.bf16 %v68_v25, %v67_v24 }
 0x10d   :  { %v742_v37 = vmax.f32 %v553_v31, 0.0 }
 0x10e   :  { %v288_v29 = vpop.f32.mrf.mxu0 }
 0x10f   :  { %v422_v30 = vpack.c.bf16 %v288_v29, %v288_v29 }
 0x111   :  { %v490_v32 = vunpack.c.l.bf16 %v422_v30 }
 0x113   :  { %v554_v36 = vadd.f32 %v3849_v39, %v490_v32 }
 0x115   :  { %v743_v38 = vmax.f32 %v554_v36, 0.0 }
 0x116   :  { %v291_v42 = vpop.f32.mrf.mxu0  ;;  %v959_v43 = vpop.f32.mrf.mxu1 }
 0x117   :  { %v797_v44 = vpack.c.bf16 %v743_v38, %v742_v37  ;;  %v423_v45 = vpack.c.bf16 %v291_v42, %v291_v42  ;;  %v1118_v46 = vpack.c.bf16 %v959_v43, %v959_v43 }
 0x119   :  { %3435 = vmatmul.msk.bf16.gmra.mxu0 %vm140_vm0, %v109_v41  ;;  %3474 = vmatmul.msk.bf16.gmra.mxu1 %vm853_vm1, %v797_v44  ;;  %v491_v48 = vunpack.c.l.bf16 %v423_v45  ;;  %v1186_v49 = vunpack.c.l.bf16 %v1118_v46 }
 0x11b   :  { %v555_v55 = vadd.f32 %v3849_v39, %v491_v48  ;;  %v1250_v56 = vadd.f32 %v3968_v50, %v1186_v49 }
 0x11d   :  { %v744_v0 = vmax.f32 %v555_v55, 0.0  ;;  %v1439_v1 = vmax.f32 %v1250_v56, 0.0 }
 0x11e   :  { %v293_v51 = vpop.f32.mrf.mxu0  ;;  %v961_v52 = vpop.f32.mrf.mxu1 }
 0x11f   :  { %v424_v53 = vpack.c.bf16 %v293_v51, %v293_v51  ;;  %v1119_v54 = vpack.c.bf16 %v961_v52, %v961_v52  ;;  %v69_v51 = vld [vmem:[%s4495_s0 + $0x140] sm:$0xff]  ;;  %v70_v52 = vld [vmem:[%s4495_s0 + $0x148] sm:$0xff] }
 0x120   :  { %v112_v55 = vpack.c.bf16 %v70_v52, %v69_v51 }
 0x121   :  { %v492_v57 = vunpack.c.l.bf16 %v424_v53  ;;  %v1187_v58 = vunpack.c.l.bf16 %v1119_v54 }
 0x123   :  { %v556_v61 = vadd.f32 %v3849_v39, %v492_v57  ;;  %v1251_v62 = vadd.f32 %v3968_v50, %v1187_v58 }
 0x125   :  { %v745_v2 = vmax.f32 %v556_v61, 0.0  ;;  %v1440_v3 = vmax.f32 %v1251_v62, 0.0 }
 0x126   :  { %v296_v4 = vpop.f32.mrf.mxu0  ;;  %v964_v5 = vpop.f32.mrf.mxu1 }
 0x127   :  { %v798_v6 = vpack.c.bf16 %v745_v2, %v744_v0  ;;  %v1502_v7 = vpack.c.bf16 %v1440_v3, %v1439_v1  ;;  %v425_v8 = vpack.c.bf16 %v296_v4, %v296_v4  ;;  %v1120_v10 = vpack.c.bf16 %v964_v5, %v964_v5 }
 0x129   :  { %3436 = vmatmul.msk.bf16.gmra.mxu0 %vm140_vm0, %v110_v63  ;;  %3475 = vmatmul.msk.bf16.gmra.mxu1 %vm853_vm1, %v798_v6  ;;  %v493_v12 = vunpack.c.l.bf16 %v425_v8  ;;  %v1188_v13 = vunpack.c.l.bf16 %v1120_v10 }
 0x12a   :  { %3514 = vmatmul.msk.bf16.vlgmr.msra.gmra.mxu2 %vm853_vm1, %v1502_v7 }
 0x12b   :  { %v557_v19 = vadd.f32 %v3849_v39, %v493_v12  ;;  %v1252_v20 = vadd.f32 %v3968_v50, %v1188_v13 }
 0x12d   :  { %v746_v29 = vmax.f32 %v557_v19, 0.0  ;;  %v1441_v30 = vmax.f32 %v1252_v20, 0.0 }
 0x12e   :  { %v298_v14 = vpop.f32.mrf.mxu0  ;;  %v966_v16 = vpop.f32.mrf.mxu1 }
 0x12f   :  { %v426_v17 = vpack.c.bf16 %v298_v14, %v298_v14  ;;  %v1121_v18 = vpack.c.bf16 %v966_v16, %v966_v16  ;;  %v71_v14 = vld [vmem:[%s4495_s0 + $0x150] sm:$0xff]  ;;  %v72_v16 = vld [vmem:[%s4495_s0 + $0x158] sm:$0xff] }
 0x130   :  { %v113_v19 = vpack.c.bf16 %v72_v16, %v71_v14 }
 0x131   :  { %v494_v22 = vunpack.c.l.bf16 %v426_v17  ;;  %v1189_v23 = vunpack.c.l.bf16 %v1121_v18 }
 0x133   :  { %v558_v26 = vadd.f32 %v3849_v39, %v494_v22  ;;  %v1253_v27 = vadd.f32 %v3968_v50, %v1189_v23 }
 0x135   :  { %v747_v31 = vmax.f32 %v558_v26, 0.0  ;;  %v1442_v32 = vmax.f32 %v1253_v27, 0.0 }
 0x136   :  { %v301_v33 = vpop.f32.mrf.mxu0  ;;  %v969_v34 = vpop.f32.mrf.mxu1 }
 0x137   :  { %v799_v35 = vpack.c.bf16 %v747_v31, %v746_v29  ;;  %v1503_v36 = vpack.c.bf16 %v1442_v32, %v1441_v30  ;;  %v427_v37 = vpack.c.bf16 %v301_v33, %v301_v33  ;;  %v1122_v38 = vpack.c.bf16 %v969_v34, %v969_v34 }
 0x139   :  { %3437 = vmatmul.msk.bf16.gmra.mxu0 %vm140_vm0, %v111_v28  ;;  %3476 = vmatmul.msk.bf16.gmra.mxu1 %vm853_vm1, %v799_v35  ;;  %v495_v40 = vunpack.c.l.bf16 %v427_v37  ;;  %v1190_v41 = vunpack.c.l.bf16 %v1122_v38 }
 0x13a   :  { %3515 = vmatmul.msk.bf16.gmra.mxu2 %vm853_vm1, %v1503_v36 }
 0x13b   :  { %v559_v46 = vadd.f32 %v3849_v39, %v495_v40  ;;  %v1254_v47 = vadd.f32 %v3968_v50, %v1190_v41 }
 0x13d   :  { %v748_v56 = vmax.f32 %v559_v46, 0.0  ;;  %v1443_v57 = vmax.f32 %v1254_v47, 0.0 }
 0x13e   :  { %v303_v42 = vpop.f32.mrf.mxu0  ;;  %v971_v43 = vpop.f32.mrf.mxu1 }
 0x13f   :  { %v428_v44 = vpack.c.bf16 %v303_v42, %v303_v42  ;;  %v1123_v45 = vpack.c.bf16 %v971_v43, %v971_v43  ;;  %v73_v42 = vld [vmem:[%s4495_s0 + $0x160] sm:$0xff]  ;;  %v74_v43 = vld [vmem:[%s4495_s0 + $0x168] sm:$0xff] }
 0x140   :  { %v114_v46 = vpack.c.bf16 %v74_v43, %v73_v42 }
 0x141   :  { %v496_v48 = vunpack.c.l.bf16 %v428_v44  ;;  %v1191_v49 = vunpack.c.l.bf16 %v1123_v45 }
 0x143   :  { %v560_v53 = vadd.f32 %v3849_v39, %v496_v48  ;;  %v1255_v54 = vadd.f32 %v3968_v50, %v1191_v49 }
 0x145   :  { %v749_v58 = vmax.f32 %v560_v53, 0.0  ;;  %v1444_v59 = vmax.f32 %v1255_v54, 0.0 }
 0x146   :  { %v306_v60 = vpop.f32.mrf.mxu0  ;;  %v974_v61 = vpop.f32.mrf.mxu1 }
 0x147   :  { %v800_v62 = vpack.c.bf16 %v749_v58, %v748_v56  ;;  %v1504_v63 = vpack.c.bf16 %v1444_v59, %v1443_v57  ;;  %v429_v0 = vpack.c.bf16 %v306_v60, %v306_v60  ;;  %v1124_v1 = vpack.c.bf16 %v974_v61, %v974_v61  ;;  %v79_v58 = vld [vmem:[%s4495_s0 + $0x190] sm:$0xff]  ;;  %v80_v59 = vld [vmem:[%s4495_s0 + $0x198] sm:$0xff] }
 0x148   :  { %v117_v60 = vpack.c.bf16 %v80_v59, %v79_v58 }
 0x149   :  { %3438 = vmatmul.msk.bf16.gmra.mxu0 %vm140_vm0, %v112_v55  ;;  %3477 = vmatmul.msk.bf16.gmra.mxu1 %vm853_vm1, %v800_v62  ;;  %v497_v2 = vunpack.c.l.bf16 %v429_v0  ;;  %v1192_v3 = vunpack.c.l.bf16 %v1124_v1 }
 0x14a   :  { %3516 = vmatmul.msk.bf16.gmra.mxu2 %vm853_vm1, %v1504_v63  ;;  %3443 = vmatmul.msk.bf16.vlgmr.msra.gmra.mxu3 %vm140_vm0, %v117_v60 }
 0x14b   :  { %v561_v8 = vadd.f32 %v3849_v39, %v497_v2  ;;  %v1256_v10 = vadd.f32 %v3968_v50, %v1192_v3  ;;  %3562 = vmatpush.bf16.msra.mxu3 %v3922_v9 }
 0x14d   :  { %v750_v20 = vmax.f32 %v561_v8, 0.0  ;;  %v1445_v22 = vmax.f32 %v1256_v10, 0.0  ;;  %v76_v8 = vld [vmem:[%s4495_s0 + $0x178] sm:$0xff] }
 0x14e   :  { %v308_v4 = vpop.f32.mrf.mxu0  ;;  %v976_v5 = vpop.f32.mrf.mxu1 }
 0x14f   :  { %v430_v6 = vpack.c.bf16 %v308_v4, %v308_v4  ;;  %v1125_v7 = vpack.c.bf16 %v976_v5, %v976_v5  ;;  %3563 = vmatpush.bf16.msra.mxu3 %v3930_v11  ;;  %v81_v11 = vld [vmem:[%s4495_s0 + $0x1a0] sm:$0xff] }
 0x151   :  { %v498_v12 = vunpack.c.l.bf16 %v430_v6  ;;  %v1193_v13 = vunpack.c.l.bf16 %v1125_v7  ;;  %v75_v7 = vld [vmem:[%s4495_s0 + $0x170] sm:$0xff] }
 0x153   :  { %v562_v17 = vadd.f32 %v3849_v39, %v498_v12  ;;  %v1257_v18 = vadd.f32 %v3968_v50, %v1193_v13  ;;  %v115_v12 = vpack.c.bf16 %v76_v8, %v75_v7  ;;  %3564 = vmatpush.bf16.msra.mxu3 %v3936_v15 }
 0x155   :  { %v751_v23 = vmax.f32 %v562_v17, 0.0  ;;  %v1446_v24 = vmax.f32 %v1257_v18, 0.0 }
 0x156   :  { %v311_v25 = vpop.f32.mrf.mxu0  ;;  %v979_v26 = vpop.f32.mrf.mxu1 }
 0x157   :  { %v801_v27 = vpack.c.bf16 %v751_v23, %v750_v20  ;;  %v1505_v28 = vpack.c.bf16 %v1446_v24, %v1445_v22  ;;  %v431_v29 = vpack.c.bf16 %v311_v25, %v311_v25  ;;  %v1126_v30 = vpack.c.bf16 %v979_v26, %v979_v26  ;;  %v82_v25 = vld [vmem:[%s4495_s0 + $0x1a8] sm:$0xff]  ;;  %3565 = vmatpush.bf16.msra.mxu3 %v3950_v21 }
 0x158   :  { %v118_v15 = vpack.c.bf16 %v82_v25, %v81_v11  ;;  %v78_v21 = vld [vmem:[%s4495_s0 + $0x188] sm:$0xff] }
 0x159   :  { %3439 = vmatmul.msk.bf16.gmra.mxu0 %vm140_vm0, %v113_v19  ;;  %3478 = vmatmul.msk.bf16.gmra.mxu1 %vm853_vm1, %v801_v27  ;;  %v499_v31 = vunpack.c.l.bf16 %v431_v29  ;;  %v1194_v32 = vunpack.c.l.bf16 %v1126_v30 }
 0x15a   :  { %3517 = vmatmul.msk.bf16.gmra.mxu2 %vm853_vm1, %v1505_v28  ;;  %3444 = vmatmul.msk.bf16.gmra.mxu3 %vm140_vm0, %v118_v15 }
 0x15b   :  { %v563_v37 = vadd.f32 %v3849_v39, %v499_v31  ;;  %v1258_v38 = vadd.f32 %v3968_v50, %v1194_v32 }
 0x15d   :  { %v752_v47 = vmax.f32 %v563_v37, 0.0  ;;  %v1447_v48 = vmax.f32 %v1258_v38, 0.0 }
 0x15e   :  { %v313_v33 = vpop.f32.mrf.mxu0  ;;  %v981_v34 = vpop.f32.mrf.mxu1 }
 0x15f   :  { %v432_v35 = vpack.c.bf16 %v313_v33, %v313_v33  ;;  %v1127_v36 = vpack.c.bf16 %v981_v34, %v981_v34 }
 0x161   :  { %v500_v40 = vunpack.c.l.bf16 %v432_v35  ;;  %v1195_v41 = vunpack.c.l.bf16 %v1127_v36  ;;  %v77_v36 = vld [vmem:[%s4495_s0 + $0x180] sm:$0xff] }
 0x163   :  { %v564_v44 = vadd.f32 %v3849_v39, %v500_v40  ;;  %v1259_v45 = vadd.f32 %v3968_v50, %v1195_v41  ;;  %v116_v40 = vpack.c.bf16 %v78_v21, %v77_v36 }
 0x165   :  { %v753_v49 = vmax.f32 %v564_v44, 0.0  ;;  %v1448_v51 = vmax.f32 %v1259_v45, 0.0 }
 0x166   :  { %v316_v52 = vpop.f32.mrf.mxu0  ;;  %v984_v53 = vpop.f32.mrf.mxu1 }
 0x167   :  { %v802_v54 = vpack.c.bf16 %v753_v49, %v752_v47  ;;  %v1506_v55 = vpack.c.bf16 %v1448_v51, %v1447_v48  ;;  %v433_v56 = vpack.c.bf16 %v316_v52, %v316_v52  ;;  %v1128_v57 = vpack.c.bf16 %v984_v53, %v984_v53  ;;  %v83_v52 = vld [vmem:[%s4495_s0 + $0x1b0] sm:$0xff]  ;;  %v84_v53 = vld [vmem:[%s4495_s0 + $0x1b8] sm:$0xff] }
 0x169   :  { %3440 = vmatmul.msk.bf16.gmra.mxu0 %vm140_vm0, %v114_v46  ;;  %3479 = vmatmul.msk.bf16.gmra.mxu1 %vm853_vm1, %v802_v54  ;;  %v501_v61 = vunpack.c.l.bf16 %v433_v56  ;;  %v1196_v62 = vunpack.c.l.bf16 %v1128_v57  ;;  %v119_v54 = vpack.c.bf16 %v84_v53, %v83_v52 }
 0x16a   :  { %3518 = vmatmul.msk.bf16.gmra.mxu2 %vm853_vm1, %v1506_v55 }
 0x16b   :  { %v565_v3 = vadd.f32 %v3849_v39, %v501_v61  ;;  %v1260_v4 = vadd.f32 %v3968_v50, %v1196_v62  ;;  %3445 = vmatmul.msk.bf16.gmra.mxu3 %vm140_vm0, %v119_v54 }
 0x16d   :  { %v754_v13 = vmax.f32 %v565_v3, 0.0  ;;  %v1449_v14 = vmax.f32 %v1260_v4, 0.0 }
 0x16e   :  { %v318_v63 = vpop.f32.mrf.mxu0  ;;  %v986_v0 = vpop.f32.mrf.mxu1 }
 0x16f   :  { %v434_v1 = vpack.c.bf16 %v318_v63, %v318_v63  ;;  %v1129_v2 = vpack.c.bf16 %v986_v0, %v986_v0 }
 0x171   :  { %v502_v5 = vunpack.c.l.bf16 %v434_v1  ;;  %v1197_v6 = vunpack.c.l.bf16 %v1129_v2 }
 0x173   :  { %v566_v9 = vadd.f32 %v3849_v39, %v502_v5  ;;  %v1261_v10 = vadd.f32 %v3968_v50, %v1197_v6 }
 0x175   :  { %v755_v16 = vmax.f32 %v566_v9, 0.0  ;;  %v1450_v17 = vmax.f32 %v1261_v10, 0.0 }
 0x176   :  { %v321_v18 = vpop.f32.mrf.mxu0  ;;  %v989_v19 = vpop.f32.mrf.mxu1 }
 0x177   :  { %v803_v20 = vpack.c.bf16 %v755_v16, %v754_v13  ;;  %v1507_v22 = vpack.c.bf16 %v1450_v17, %v1449_v14  ;;  %v435_v23 = vpack.c.bf16 %v321_v18, %v321_v18  ;;  %v1130_v24 = vpack.c.bf16 %v989_v19, %v989_v19 }
 0x179   :  { %3441 = vmatmul.msk.bf16.gmra.mxu0 %vm140_vm0, %v115_v12  ;;  %3480 = vmatmul.msk.bf16.gmra.mxu1 %vm853_vm1, %v803_v20  ;;  %v503_v26 = vunpack.c.l.bf16 %v435_v23  ;;  %v1198_v27 = vunpack.c.l.bf16 %v1130_v24 }
 0x17a   :  { %3519 = vmatmul.msk.bf16.gmra.mxu2 %vm853_vm1, %v1507_v22 }
 0x17b   :  { %v567_v32 = vadd.f32 %v3849_v39, %v503_v26  ;;  %v1262_v33 = vadd.f32 %v3968_v50, %v1198_v27 }
 0x17d   :  { %v756_v41 = vmax.f32 %v567_v32, 0.0  ;;  %v1451_v42 = vmax.f32 %v1262_v33, 0.0  ;;  %v85_v32 = vld [vmem:[%s4495_s0 + $0x1c0] sm:$0xff]  ;;  %v86_v33 = vld [vmem:[%s4495_s0 + $0x1c8] sm:$0xff] }
 0x17e   :  { %v323_v28 = vpop.f32.mrf.mxu0  ;;  %v991_v29 = vpop.f32.mrf.mxu1  ;;  %v120_v36 = vpack.c.bf16 %v86_v33, %v85_v32 }
 0x17f   :  { %v436_v30 = vpack.c.bf16 %v323_v28, %v323_v28  ;;  %v1131_v31 = vpack.c.bf16 %v991_v29, %v991_v29 }
 0x180   :  { %3446 = vmatmul.msk.bf16.gmra.mxu3 %vm140_vm0, %v120_v36 }
 0x181   :  { %v504_v34 = vunpack.c.l.bf16 %v436_v30  ;;  %v1199_v35 = vunpack.c.l.bf16 %v1131_v31 }
 0x183   :  { %v568_v37 = vadd.f32 %v3849_v39, %v504_v34  ;;  %v1263_v38 = vadd.f32 %v3968_v50, %v1199_v35 }
 0x185   :  { %v757_v43 = vmax.f32 %v568_v37, 0.0  ;;  %v1452_v44 = vmax.f32 %v1263_v38, 0.0  ;;  %v4108_v38 = vstv %s4501_s6 }
 0x186   :  { %v326_v45 = vpop.f32.mrf.mxu0  ;;  %v994_v46 = vpop.f32.mrf.mxu1 }
 0x187   :  { %v804_v47 = vpack.c.bf16 %v757_v43, %v756_v41  ;;  %v1508_v48 = vpack.c.bf16 %v1452_v44, %v1451_v42  ;;  %v437_v49 = vpack.c.bf16 %v326_v45, %v326_v45  ;;  %v1132_v51 = vpack.c.bf16 %v994_v46, %v994_v46 }
 0x189   :  { %3442 = vmatmul.msk.bf16.gmra.mxu0 %vm140_vm0, %v116_v40  ;;  %3481 = vmatmul.msk.bf16.gmra.mxu1 %vm853_vm1, %v804_v47  ;;  %v505_v55 = vunpack.c.l.bf16 %v437_v49  ;;  %v1200_v56 = vunpack.c.l.bf16 %v1132_v51 }
 0x18a   :  { %3520 = vmatmul.msk.bf16.gmra.mxu2 %vm853_vm1, %v1508_v48 }
 0x18b   :  { %v569_v61 = vadd.f32 %v3849_v39, %v505_v55  ;;  %v1264_v62 = vadd.f32 %v3968_v50, %v1200_v56  ;;  %v3723_v55 = vmov 0  }
 0x18c   :  { %3568 = vset.pattern.permute.xlu0 %v3723_v55  ;;  %3569 = vset.pattern.permute.xlu1 %v3723_v55 }
 0x18d   :  { %v758_v3 = vmax.f32 %v569_v61, 0.0  ;;  %v1453_v4 = vmax.f32 %v1264_v62, 0.0  ;;  %3570 = vset.pattern.permute.xlu2 %v3723_v55 }
 0x18e   :  { %v328_v57 = vpop.f32.mrf.mxu0  ;;  %v996_v58 = vpop.f32.mrf.mxu1 }
 0x18f   :  { %v438_v59 = vpack.c.bf16 %v328_v57, %v328_v57  ;;  %v1133_v60 = vpack.c.bf16 %v996_v58, %v996_v58 }
 0x191   :  { %v506_v63 = vunpack.c.l.bf16 %v438_v59  ;;  %v1201_v0 = vunpack.c.l.bf16 %v1133_v60 }
 0x193   :  { %v570_v1 = vadd.f32 %v3849_v39, %v506_v63  ;;  %v1265_v2 = vadd.f32 %v3968_v50, %v1201_v0 }
 0x195   :  { %v759_v5 = vmax.f32 %v570_v1, 0.0  ;;  %v1454_v6 = vmax.f32 %v1265_v2, 0.0 }
 0x196   :  { %v331_v7 = vpop.f32.mrf.mxu0  ;;  %v999_v8 = vpop.f32.mrf.mxu1 }
 0x197   :  { %v805_v9 = vpack.c.bf16 %v759_v5, %v758_v3  ;;  %v1509_v10 = vpack.c.bf16 %v1454_v6, %v1453_v4  ;;  %v439_v12 = vpack.c.bf16 %v331_v7, %v331_v7  ;;  %v1134_v13 = vpack.c.bf16 %v999_v8, %v999_v8 }
 0x199   :  { %3482 = vmatmul.msk.bf16.gmra.mxu1 %vm853_vm1, %v805_v9  ;;  %v507_v14 = vunpack.c.l.bf16 %v439_v12  ;;  %v1202_v16 = vunpack.c.l.bf16 %v1134_v13 }
 0x19a   :  { %3521 = vmatmul.msk.bf16.gmra.mxu2 %vm853_vm1, %v1509_v10 }
 0x19b   :  { %v571_v22 = vadd.f32 %v3849_v39, %v507_v14  ;;  %v1266_v23 = vadd.f32 %v3968_v50, %v1202_v16 }
 0x19d   :  { %v760_v26 = vmax.f32 %v571_v22, 0.0  ;;  %v1455_v27 = vmax.f32 %v1266_v23, 0.0 }
 0x19e   :  { %v333_v17 = vpop.f32.mrf.mxu0  ;;  %v1001_v18 = vpop.f32.mrf.mxu1 }
 0x19f   :  { %v440_v19 = vpack.c.bf16 %v333_v17, %v333_v17  ;;  %v1135_v20 = vpack.c.bf16 %v1001_v18, %v1001_v18 }
 0x1a1   :  { %v508_v24 = vunpack.c.l.bf16 %v440_v19  ;;  %v1203_v11 = vunpack.c.l.bf16 %v1135_v20 }
 0x1a3   :  { %v572_v25 = vadd.f32 %v3849_v39, %v508_v24  ;;  %v1267_v15 = vadd.f32 %v3968_v50, %v1203_v11 }
 0x1a5   :  { %v761_v28 = vmax.f32 %v572_v25, 0.0  ;;  %v1456_v29 = vmax.f32 %v1267_v15, 0.0 }
 0x1a6   :  { %v336_v30 = vpop.f32.mrf.mxu0  ;;  %v1004_v31 = vpop.f32.mrf.mxu1 }
 0x1a7   :  { %v806_v34 = vpack.c.bf16 %v761_v28, %v760_v26  ;;  %v1510_v35 = vpack.c.bf16 %v1456_v29, %v1455_v27  ;;  %v441_v21 = vpack.c.bf16 %v336_v30, %v336_v30  ;;  %v1136_v37 = vpack.c.bf16 %v1004_v31, %v1004_v31  ;;  %v87_v28 = vld [vmem:[%s4495_s0 + $0x1d0] sm:$0xff]  ;;  %v88_v29 = vld [vmem:[%s4495_s0 + $0x1d8] sm:$0xff] }
 0x1a8   :  { %v121_v31 = vpack.c.bf16 %v88_v29, %v87_v28 }
 0x1a9   :  { %3483 = vmatmul.msk.bf16.gmra.mxu1 %vm853_vm1, %v806_v34  ;;  %v509_v41 = vunpack.c.l.bf16 %v441_v21  ;;  %v1204_v42 = vunpack.c.l.bf16 %v1136_v37 }
 0x1aa   :  { %3522 = vmatmul.msk.bf16.gmra.mxu2 %vm853_vm1, %v1510_v35  ;;  %3447 = vmatmul.msk.bf16.gmra.mxu3 %vm140_vm0, %v121_v31 }
 0x1ab   :  { %v573_v51 = vadd.f32 %v3849_v39, %v509_v41  ;;  %v1268_v52 = vadd.f32 %v3968_v50, %v1204_v42 }
 0x1ad   :  { %v1671_v40 = vpop.f32.mrf.mxu2  ;;  %v762_v60 = vmax.f32 %v573_v51, 0.0  ;;  %v1457_v61 = vmax.f32 %v1268_v52, 0.0 }
 0x1ae   :  { %v1832_v43 = vadd.f32 %v4108_v38, %v1671_v40  ;;  %v338_v44 = vpop.f32.mrf.mxu0  ;;  %v1006_v45 = vpop.f32.mrf.mxu1 }
 0x1af   :  { %v442_v46 = vpack.c.bf16 %v338_v44, %v338_v44  ;;  %v1137_v47 = vpack.c.bf16 %v1006_v45, %v1006_v45 }
 0x1b0   :  { %3571 = vtanh.f32 %v1832_v43 }
 0x1b1   :  { %v510_v48 = vunpack.c.l.bf16 %v442_v46  ;;  %v1205_v49 = vunpack.c.l.bf16 %v1137_v47 }
 0x1b3   :  { %v574_v53 = vadd.f32 %v3849_v39, %v510_v48  ;;  %v1269_v54 = vadd.f32 %v3968_v50, %v1205_v49 }
 0x1b5   :  { %v763_v56 = vmax.f32 %v574_v53, 0.0  ;;  %v1458_v57 = vmax.f32 %v1269_v54, 0.0  ;;  %v1673_v58 = vpop.f32.mrf.mxu2 }
 0x1b6   :  { %v3572_v59 = vpop.eup %3571  ;;  %v341_v62 = vpop.f32.mrf.mxu0  ;;  %v1833_v3 = vadd.f32 %v4108_v38, %v1673_v58 }
 0x1b7   :  { %v1009_v63 = vpop.f32.mrf.mxu1  ;;  %v2021_v0 = vrot.slane %v3572_v59, 1  ;;  %v2022_v1 = vrot.slane %v3572_v59, 2  ;;  %v2023_v2 = vrot.slane %v3572_v59, 3  ;;  %2462 = vst [vmem:[#allocation1] ss:$9 sm:$0xff] %v3572_v59  ;;  %v2024_v4 = vrot.slane %v3572_v59, 4 }
 0x1b8   :  { %v807_v5 = vpack.c.bf16 %v763_v56, %v762_v60  ;;  %v2025_v6 = vrot.slane %v3572_v59, 5  ;;  %v1511_v7 = vpack.c.bf16 %v1458_v57, %v1457_v61  ;;  %v2026_v8 = vrot.slane %v3572_v59, 6 }
 0x1b9   :  { %2464 = vst [vmem:[#allocation1 + $0x1] ss:$9 sm:$0xff] %v2021_v0  ;;  %v2027_v9 = vrot.slane %v3572_v59, 7  ;;  %3573 = vtanh.f32 %v1833_v3  ;;  %v443_v10 = vpack.c.bf16 %v341_v62, %v341_v62  ;;  %v1138_v12 = vpack.c.bf16 %v1009_v63, %v1009_v63 }
 0x1ba   :  { %2466 = vst [vmem:[#allocation1 + $0x2] ss:$9 sm:$0xff] %v2022_v1  ;;  %3484 = vmatmul.msk.bf16.gmra.mxu1 %vm853_vm1, %v807_v5  ;;  %3523 = vmatmul.msk.bf16.gmra.mxu2 %vm853_vm1, %v1511_v7 }
 0x1bb   :  { %2468 = vst [vmem:[#allocation1 + $0x3] ss:$9 sm:$0xff] %v2023_v2  ;;  %v511_v16 = vunpack.c.l.bf16 %v443_v10  ;;  %v1206_v19 = vunpack.c.l.bf16 %v1138_v12 }
 0x1bc   :  { %2470 = vst [vmem:[#allocation1 + $0x4] ss:$9 sm:$0xff] %v2024_v4 }
 0x1bd   :  { %2472 = vst [vmem:[#allocation1 + $0x5] ss:$9 sm:$0xff] %v2025_v6  ;;  %v575_v24 = vadd.f32 %v3849_v39, %v511_v16  ;;  %v1676_v11 = vpop.f32.mrf.mxu2  ;;  %v1270_v15 = vadd.f32 %v3968_v50, %v1206_v19 }
 0x1be   :  { %2474 = vst [vmem:[#allocation1 + $0x6] ss:$9 sm:$0xff] %v2026_v8  ;;  %v343_v13 = vpop.f32.mrf.mxu0  ;;  %v1834_v34 = vadd.f32 %v4108_v38, %v1676_v11 }
 0x1bf   :  { %v1011_v14 = vpop.f32.mrf.mxu1  ;;  %2476 = vst [vmem:[#allocation1 + $0x7] ss:$9 sm:$0xff] %v2027_v9  ;;  %v444_v17 = vpack.c.bf16 %v343_v13, %v343_v13  ;;  %v3574_v20 = vpop.eup %3573  ;;  %v764_v37 = vmax.f32 %v575_v24, 0.0  ;;  %v1459_v43 = vmax.f32 %v1270_v15, 0.0 }
 0x1c0   :  { %v1139_v18 = vpack.c.bf16 %v1011_v14, %v1011_v14  ;;  %v2028_v25 = vrot.slane %v3574_v20, 1  ;;  %v2029_v30 = vrot.slane %v3574_v20, 2  ;;  %v2030_v33 = vrot.slane %v3574_v20, 3 }
 0x1c1   :  { %v512_v22 = vunpack.c.l.bf16 %v444_v17  ;;  %v2031_v21 = vrot.slane %v3574_v20, 4  ;;  %v2032_v42 = vrot.slane %v3574_v20, 5  ;;  %v2033_v44 = vrot.slane %v3574_v20, 6 }
 0x1c2   :  { %v1207_v23 = vunpack.c.l.bf16 %v1139_v18  ;;  %v2034_v46 = vrot.slane %v3574_v20, 7  ;;  %3575 = vtanh.f32 %v1834_v34 }
 0x1c3   :  { %v576_v26 = vadd.f32 %v3849_v39, %v512_v22  ;;  %v89_v22 = vld [vmem:[%s4495_s0 + $0x1e0] sm:$0xff] }
 0x1c4   :  { %v1271_v27 = vadd.f32 %v3968_v50, %v1207_v23  ;;  %v90_v23 = vld [vmem:[%s4495_s0 + $0x1e8] sm:$0xff] }
 0x1c5   :  { %v765_v35 = vmax.f32 %v576_v26, 0.0  ;;  %v1678_v54 = vpop.f32.mrf.mxu2  ;;  %v122_v26 = vpack.c.bf16 %v90_v23, %v89_v22 }
 0x1c6   :  { %v2477_v32 = vld [vmem:[#allocation1] sm:$0xff]  ;;  %v1460_v36 = vmax.f32 %v1271_v27, 0.0  ;;  %v346_v40 = vpop.f32.mrf.mxu0  ;;  %v1835_v0 = vadd.f32 %v4108_v38, %v1678_v54 }
 0x1c7   :  { %2478 = vst [vmem:[#allocation1] ss:$9 sm:$0xff] %v3574_v20  ;;  %3037 = vperm.xlu0 %3568, %v2477_v32   ;;  %v1014_v41 = vpop.f32.mrf.mxu1  ;;  %v808_v45 = vpack.c.bf16 %v765_v35, %v764_v37  ;;  %v445_v48 = vpack.c.bf16 %v346_v40, %v346_v40  ;;  %3448 = vmatmul.msk.bf16.gmra.mxu3 %vm140_vm0, %v122_v26 }
 0x1c8   :  { %2479 = vst [vmem:[#allocation1 + $0x1] ss:$9 sm:$0xff] %v2028_v25  ;;  %v1512_v47 = vpack.c.bf16 %v1460_v36, %v1459_v43  ;;  %v3576_v49 = vpop.eup %3575  ;;  %v1140_v57 = vpack.c.bf16 %v1014_v41, %v1014_v41  ;;  %3577 = vtanh.f32 %v1835_v0 }
 0x1c9   :  { %2480 = vst [vmem:[#allocation1 + $0x2] ss:$9 sm:$0xff] %v2029_v30  ;;  %v513_v51 = vunpack.c.l.bf16 %v445_v48  ;;  %v2035_v56 = vrot.slane %v3576_v49, 1  ;;  %v2036_v59 = vrot.slane %v3576_v49, 2  ;;  %v2037_v63 = vrot.slane %v3576_v49, 3 }
 0x1ca   :  { %2481 = vst [vmem:[#allocation1 + $0x3] ss:$9 sm:$0xff] %v2030_v33  ;;  %3485 = vmatmul.msk.bf16.gmra.mxu1 %vm853_vm1, %v808_v45  ;;  %3524 = vmatmul.msk.bf16.gmra.mxu2 %vm853_vm1, %v1512_v47  ;;  %v2038_v2 = vrot.slane %v3576_v49, 4  ;;  %v2039_v4 = vrot.slane %v3576_v49, 5  ;;  %v1208_v5 = vunpack.c.l.bf16 %v1140_v57  ;;  %v2040_v6 = vrot.slane %v3576_v49, 6 }
 0x1cb   :  { %2482 = vst [vmem:[#allocation1 + $0x4] ss:$9 sm:$0xff] %v2031_v21  ;;  %v577_v60 = vadd.f32 %v3849_v39, %v513_v51  ;;  %v2041_v9 = vrot.slane %v3576_v49, 7 }
 0x1cc   :  { %2483 = vst [vmem:[#allocation1 + $0x5] ss:$9 sm:$0xff] %v2032_v42  ;;  %v1272_v13 = vadd.f32 %v3968_v50, %v1208_v5 }
 0x1cd   :  { %2484 = vst [vmem:[#allocation1 + $0x6] ss:$9 sm:$0xff] %v2033_v44  ;;  %v766_v7 = vmax.f32 %v577_v60, 0.0  ;;  %v1681_v18 = vpop.f32.mrf.mxu2 }
 0x1ce   :  { %2485 = vst [vmem:[#allocation1 + $0x7] ss:$9 sm:$0xff] %v2034_v46  ;;  %v348_v52 = vpop.f32.mrf.mxu0  ;;  %v3578_v16 = vpop.eup %3577  ;;  %v1461_v17 = vmax.f32 %v1272_v13, 0.0  ;;  %v1836_v15 = vadd.f32 %v4108_v38, %v1681_v18 }
 0x1cf   :  { %v1016_v53 = vpop.f32.mrf.mxu1  ;;  %v446_v55 = vpack.c.bf16 %v348_v52, %v348_v52  ;;  %v2042_v20 = vrot.slane %v3578_v16, 1  ;;  %v2043_v24 = vrot.slane %v3578_v16, 2  ;;  %v2044_v25 = vrot.slane %v3578_v16, 3 }
 0x1d0   :  { %v1141_v58 = vpack.c.bf16 %v1016_v53, %v1016_v53  ;;  %v2045_v27 = vrot.slane %v3578_v16, 4  ;;  %v2046_v30 = vrot.slane %v3578_v16, 5  ;;  %v2047_v31 = vrot.slane %v3578_v16, 6 }
 0x1d1   :  { %v514_v61 = vunpack.c.l.bf16 %v446_v55  ;;  %v2048_v32 = vrot.slane %v3578_v16, 7  ;;  %3579 = vtanh.f32 %v1836_v15 }
 0x1d2   :  { %v1209_v1 = vunpack.c.l.bf16 %v1141_v58 }
 0x1d3   :  { %v578_v3 = vadd.f32 %v3849_v39, %v514_v61 }
 0x1d4   :  { %v1273_v10 = vadd.f32 %v3968_v50, %v1209_v1 }
 0x1d5   :  { %v2486_v62 = vld [vmem:[#allocation1] sm:$0xff]  ;;  %v767_v8 = vmax.f32 %v578_v3, 0.0  ;;  %v1683_v40 = vpop.f32.mrf.mxu2 }
 0x1d6   :  { %2487 = vst [vmem:[#allocation1] ss:$9 sm:$0xff] %v3576_v49  ;;  %3040 = vperm.xlu0 %3568, %v2486_v62   ;;  %v1462_v14 = vmax.f32 %v1273_v10, 0.0  ;;  %v351_v28 = vpop.f32.mrf.mxu0  ;;  %v1837_v48 = vadd.f32 %v4108_v38, %v1683_v40 }
 0x1d7   :  { %2488 = vst [vmem:[#allocation1 + $0x1] ss:$9 sm:$0xff] %v2035_v56  ;;  %v809_v12 = vpack.c.bf16 %v767_v8, %v766_v7  ;;  %v1019_v29 = vpop.f32.mrf.mxu1  ;;  %v447_v33 = vpack.c.bf16 %v351_v28, %v351_v28  ;;  %v3580_v35 = vpop.eup %3579 }
 0x1d8   :  { %2489 = vst [vmem:[#allocation1 + $0x2] ss:$9 sm:$0xff] %v2036_v59  ;;  %v1513_v19 = vpack.c.bf16 %v1462_v14, %v1461_v17  ;;  %v1142_v34 = vpack.c.bf16 %v1019_v29, %v1019_v29  ;;  %v2049_v42 = vrot.slane %v3580_v35, 1  ;;  %v2050_v44 = vrot.slane %v3580_v35, 2 }
 0x1d9   :  { %2490 = vst [vmem:[#allocation1 + $0x3] ss:$9 sm:$0xff] %v2037_v63  ;;  %v515_v36 = vunpack.c.l.bf16 %v447_v33  ;;  %v2051_v47 = vrot.slane %v3580_v35, 3  ;;  %v2052_v52 = vrot.slane %v3580_v35, 4  ;;  %v2053_v55 = vrot.slane %v3580_v35, 5 }
 0x1da   :  { %2491 = vst [vmem:[#allocation1 + $0x4] ss:$9 sm:$0xff] %v2038_v2  ;;  %3486 = vmatmul.msk.bf16.gmra.mxu1 %vm853_vm1, %v809_v12  ;;  %3525 = vmatmul.msk.bf16.gmra.mxu2 %vm853_vm1, %v1513_v19  ;;  %v1210_v41 = vunpack.c.l.bf16 %v1142_v34  ;;  %v2054_v57 = vrot.slane %v3580_v35, 6  ;;  %v2055_v59 = vrot.slane %v3580_v35, 7  ;;  %3581 = vtanh.f32 %v1837_v48 }
 0x1db   :  { %2492 = vst [vmem:[#allocation1 + $0x5] ss:$9 sm:$0xff] %v2039_v4  ;;  %v579_v49 = vadd.f32 %v3849_v39, %v515_v36 }
 0x1dc   :  { %2493 = vst [vmem:[#allocation1 + $0x6] ss:$9 sm:$0xff] %v2040_v6  ;;  %v1274_v53 = vadd.f32 %v3968_v50, %v1210_v41 }
 0x1dd   :  { %2494 = vst [vmem:[#allocation1 + $0x7] ss:$9 sm:$0xff] %v2041_v9  ;;  %v768_v60 = vmax.f32 %v579_v49, 0.0  ;;  %v1686_v3 = vpop.f32.mrf.mxu2 }
 0x1de   :  { %v353_v21 = vpop.f32.mrf.mxu0  ;;  %v1463_v62 = vmax.f32 %v1274_v53, 0.0  ;;  %v1838_v8 = vadd.f32 %v4108_v38, %v1686_v3 }
 0x1df   :  { %v1021_v37 = vpop.f32.mrf.mxu1  ;;  %v448_v43 = vpack.c.bf16 %v353_v21, %v353_v21 }
 0x1e0   :  { %v1143_v45 = vpack.c.bf16 %v1021_v37, %v1021_v37  ;;  %v3582_v2 = vpop.eup %3581  ;;  %3583 = vtanh.f32 %v1838_v8 }
 0x1e1   :  { %v516_v51 = vunpack.c.l.bf16 %v448_v43  ;;  %v2056_v4 = vrot.slane %v3582_v2, 1  ;;  %v2057_v5 = vrot.slane %v3582_v2, 2  ;;  %v2058_v7 = vrot.slane %v3582_v2, 3 }
 0x1e2   :  { %v1211_v54 = vunpack.c.l.bf16 %v1143_v45  ;;  %v2059_v9 = vrot.slane %v3582_v2, 4  ;;  %v2060_v13 = vrot.slane %v3582_v2, 5  ;;  %v2061_v14 = vrot.slane %v3582_v2, 6 }
 0x1e3   :  { %v580_v56 = vadd.f32 %v3849_v39, %v516_v51 }
 0x1e4   :  { %v2495_v11 = vld [vmem:[#allocation1] sm:$0xff]  ;;  %v1275_v58 = vadd.f32 %v3968_v50, %v1211_v54 }
 0x1e5   :  { %2496 = vst [vmem:[#allocation1] ss:$9 sm:$0xff] %v3578_v16  ;;  %3043 = vperm.xlu1 %3569, %v2495_v11   ;;  %v769_v61 = vmax.f32 %v580_v56, 0.0  ;;  %v2062_v16 = vrot.slane %v3582_v2, 7 }
 0x1e6   :  { %2497 = vst [vmem:[#allocation1 + $0x1] ss:$9 sm:$0xff] %v2042_v20  ;;  %v1464_v63 = vmax.f32 %v1275_v58, 0.0  ;;  %v356_v10 = vpop.f32.mrf.mxu0  ;;  %v3584_v19 = vpop.eup %3583 }
 0x1e7   :  { %2498 = vst [vmem:[#allocation1 + $0x2] ss:$9 sm:$0xff] %v2043_v24  ;;  %v810_v0 = vpack.c.bf16 %v769_v61, %v768_v60  ;;  %v1024_v12 = vpop.f32.mrf.mxu1  ;;  %v449_v17 = vpack.c.bf16 %v356_v10, %v356_v10  ;;  %v1688_v24 = vpop.f32.mrf.mxu2  ;;  %v2064_v26 = vrot.slane %v3584_v19, 2  ;;  %v2065_v29 = vrot.slane %v3584_v19, 3 }
 0x1e8   :  { %2499 = vst [vmem:[#allocation1 + $0x3] ss:$9 sm:$0xff] %v2044_v25  ;;  %v1514_v1 = vpack.c.bf16 %v1464_v63, %v1463_v62  ;;  %v1144_v18 = vpack.c.bf16 %v1024_v12, %v1024_v12  ;;  %v2063_v25 = vrot.slane %v3584_v19, 1  ;;  %v2066_v33 = vrot.slane %v3584_v19, 4 }
 0x1e9   :  { %2500 = vst [vmem:[#allocation1 + $0x4] ss:$9 sm:$0xff] %v2045_v27  ;;  %v517_v20 = vunpack.c.l.bf16 %v449_v17  ;;  %v2067_v36 = vrot.slane %v3584_v19, 5  ;;  %v2068_v37 = vrot.slane %v3584_v19, 6  ;;  %v2069_v41 = vrot.slane %v3584_v19, 7 }
 0x1ea   :  { %2501 = vst [vmem:[#allocation1 + $0x5] ss:$9 sm:$0xff] %v2046_v30  ;;  %3487 = vmatmul.msk.bf16.gmra.mxu1 %vm853_vm1, %v810_v0  ;;  %3526 = vmatmul.msk.bf16.gmra.mxu2 %vm853_vm1, %v1514_v1  ;;  %v1212_v11 = vunpack.c.l.bf16 %v1144_v18  ;;  %v1839_v30 = vadd.f32 %v4108_v38, %v1688_v24 }
 0x1eb   :  { %2502 = vst [vmem:[#allocation1 + $0x6] ss:$9 sm:$0xff] %v2047_v31  ;;  %v581_v31 = vadd.f32 %v3849_v39, %v517_v20 }
 0x1ec   :  { %2503 = vst [vmem:[#allocation1 + $0x7] ss:$9 sm:$0xff] %v2048_v32  ;;  %v1276_v34 = vadd.f32 %v3968_v50, %v1212_v11  ;;  %3585 = vtanh.f32 %v1839_v30 }
 0x1ee   :  { %v358_v22 = vpop.f32.mrf.mxu0 }
 0x1ef   :  { %v1026_v23 = vpop.f32.mrf.mxu1  ;;  %v450_v15 = vpack.c.bf16 %v358_v22, %v358_v22  ;;  %v1691_v49 = vpop.f32.mrf.mxu2 }
 0x1f0   :  { %v1145_v27 = vpack.c.bf16 %v1026_v23, %v1026_v23 }
 0x1f1   :  { %v518_v32 = vunpack.c.l.bf16 %v450_v15 }
 0x1f2   :  { %v3586_v48 = vpop.eup %3585 }
 0x1f3   :  { %v2504_v46 = vld [vmem:[#allocation1] sm:$0xff]  ;;  %v582_v21 = vadd.f32 %v3849_v39, %v518_v32  ;;  %v2070_v51 = vrot.slane %v3586_v48, 1  ;;  %v2072_v54 = vrot.slane %v3586_v48, 3  ;;  %v2073_v56 = vrot.slane %v3586_v48, 4 }
 0x1f4   :  { %2505 = vst [vmem:[#allocation1] ss:$9 sm:$0xff] %v3580_v35  ;;  %3046 = vperm.xlu1 %3569, %v2504_v46   ;;  %v1213_v35 = vunpack.c.l.bf16 %v1145_v27  ;;  %v2075_v60 = vrot.slane %v3586_v48, 6  ;;  %v2076_v61 = vrot.slane %v3586_v48, 7 }
 0x1f5   :  { %2506 = vst [vmem:[#allocation1 + $0x1] ss:$9 sm:$0xff] %v2049_v42  ;;  %v770_v42 = vmax.f32 %v581_v31, 0.0  ;;  %v771_v43 = vmax.f32 %v582_v21, 0.0 }
 0x1f6   :  { %2507 = vst [vmem:[#allocation1 + $0x2] ss:$9 sm:$0xff] %v2050_v44  ;;  %v1277_v40 = vadd.f32 %v3968_v50, %v1213_v35  ;;  %v1465_v44 = vmax.f32 %v1276_v34, 0.0 }
 0x1f7   :  { %2508 = vst [vmem:[#allocation1 + $0x3] ss:$9 sm:$0xff] %v2051_v47  ;;  %v811_v46 = vpack.c.bf16 %v771_v43, %v770_v42  ;;  %v1029_v58 = vpop.f32.mrf.mxu1 }
 0x1f8   :  { %2509 = vst [vmem:[#allocation1 + $0x4] ss:$9 sm:$0xff] %v2052_v52  ;;  %v1466_v45 = vmax.f32 %v1277_v40, 0.0  ;;  %v2071_v52 = vrot.slane %v3586_v48, 2  ;;  %v1146_v63 = vpack.c.bf16 %v1029_v58, %v1029_v58 }
 0x1f9   :  { %2510 = vst [vmem:[#allocation1 + $0x5] ss:$9 sm:$0xff] %v2053_v55  ;;  %v1840_v55 = vadd.f32 %v4108_v38, %v1691_v49 }
 0x1fa   :  { %2511 = vst [vmem:[#allocation1 + $0x6] ss:$9 sm:$0xff] %v2054_v57  ;;  %v1515_v47 = vpack.c.bf16 %v1466_v45, %v1465_v44  ;;  %3488 = vmatmul.msk.bf16.gmra.mxu1 %vm853_vm1, %v811_v46  ;;  %v361_v57 = vpop.f32.mrf.mxu0 }
 0x1fb   :  { %2512 = vst [vmem:[#allocation1 + $0x7] ss:$9 sm:$0xff] %v2055_v59  ;;  %v2074_v59 = vrot.slane %v3586_v48, 5  ;;  %3587 = vtanh.f32 %v1840_v55  ;;  %v451_v62 = vpack.c.bf16 %v361_v57, %v361_v57 }
 0x1fc   :  { %3527 = vmatmul.msk.bf16.gmra.mxu2 %vm853_vm1, %v1515_v47 }
 0x1fd   :  { %v519_v1 = vunpack.c.l.bf16 %v451_v62 }
 0x1ff   :  { %v1031_v3 = vpop.f32.mrf.mxu1  ;;  %v583_v17 = vadd.f32 %v3849_v39, %v519_v1 }
 0x200   :  { %v1147_v10 = vpack.c.bf16 %v1031_v3, %v1031_v3 }
 0x201   :  { %v3588_v0 = vpop.eup %3587 }
 0x202   :  { %v2513_v6 = vld [vmem:[#allocation1] sm:$0xff]  ;;  %v1215_v22 = vunpack.c.l.bf16 %v1147_v10  ;;  %v2081_v23 = vrot.slane %v3588_v0, 5  ;;  %v2082_v11 = vrot.slane %v3588_v0, 6  ;;  %v2083_v15 = vrot.slane %v3588_v0, 7 }
 0x203   :  { %2514 = vst [vmem:[#allocation1] ss:$9 sm:$0xff] %v3582_v2  ;;  %3049 = vperm.xlu2 %3570, %v2513_v6   ;;  %v363_v2 = vpop.f32.mrf.mxu0  ;;  %v1214_v6 = vunpack.c.l.bf16 %v1146_v63 }
 0x204   :  { %2515 = vst [vmem:[#allocation1 + $0x1] ss:$9 sm:$0xff] %v2056_v4  ;;  %v91_v4 = vld [vmem:[%s4495_s0 + $0x1f0] sm:$0xff]  ;;  %v452_v8 = vpack.c.bf16 %v363_v2, %v363_v2  ;;  %s3724_s0 = smov [#allocation3]  }
 0x205   :  { %2516 = vst [vmem:[#allocation1 + $0x2] ss:$9 sm:$0xff] %v2057_v5  ;;  %v1693_v5 = vpop.f32.mrf.mxu2  ;;  %v123_v12 = vpack.c.bf16 %v91_v4, %v91_v4  ;;  %v1278_v20 = vadd.f32 %v3968_v50, %v1214_v6  ;;  %s3399_s18 = sshll.u32 %s3724_s0, 4  ;;  %s3400_s18 = int_to_ptr.vmem [resolvable:$true] %s3399_s18 }
 0x206   :  { %2517 = vst [vmem:[#allocation1 + $0x3] ss:$9 sm:$0xff] %v2058_v7  ;;  %v2077_v7 = vrot.slane %v3588_v0, 1  ;;  %v520_v18 = vunpack.c.l.bf16 %v452_v8 }
 0x207   :  { %2518 = vst [vmem:[#allocation1 + $0x4] ss:$9 sm:$0xff] %v2059_v9  ;;  %v2078_v9 = vrot.slane %v3588_v0, 2  ;;  %3449 = vmatmul.msk.bf16.gmra.mxu3 %vm140_vm0, %v123_v12  ;;  %v1034_v43 = vpop.f32.mrf.mxu1  ;;  %v371_v12 = vpop.f32.mrf.mxu3  ;;  %vm3286_vm0 = vcmask 1048512  }
 0x208   :  { %2519 = vst [vmem:[#allocation1 + $0x5] ss:$9 sm:$0xff] %v2060_v13  ;;  %v584_v24 = vadd.f32 %v3849_v39, %v520_v18  ;;  %v1148_v47 = vpack.c.bf16 %v1034_v43, %v1034_v43 }
 0x209   :  { %2520 = vst [vmem:[#allocation1 + $0x6] ss:$9 sm:$0xff] %v2061_v14  ;;  %v2079_v14 = vrot.slane %v3588_v0, 3 }
 0x20a   :  { %2521 = vst [vmem:[#allocation1 + $0x7] ss:$9 sm:$0xff] %v2062_v16  ;;  %v1841_v16 = vadd.f32 %v4108_v38, %v1693_v5  ;;  %v773_v27 = vmax.f32 %v584_v24, 0.0 }
 0x20c   :  { %3589 = vtanh.f32 %v1841_v16 }
 0x211   :  { %v2522_v28 = vld [vmem:[#allocation1] sm:$0xff] }
 0x212   :  { %2523 = vst [vmem:[#allocation1] ss:$9 sm:$0xff] %v3584_v19  ;;  %3052 = vperm.xlu2 %3570, %v2522_v28   ;;  %v2080_v19 = vrot.slane %v3588_v0, 4  ;;  %v1467_v28 = vmax.f32 %v1278_v20, 0.0  ;;  %v3590_v32 = vpop.eup %3589 }
 0x213   :  { %2524 = vst [vmem:[#allocation1 + $0x1] ss:$9 sm:$0xff] %v2063_v25  ;;  %v1279_v25 = vadd.f32 %v3968_v50, %v1215_v22  ;;  %v2084_v34 = vrot.slane %v3590_v32, 1  ;;  %v2085_v35 = vrot.slane %v3590_v32, 2  ;;  %v2086_v21 = vrot.slane %v3590_v32, 3 }
 0x214   :  { %2525 = vst [vmem:[#allocation1 + $0x2] ss:$9 sm:$0xff] %v2064_v26  ;;  %v772_v26 = vmax.f32 %v583_v17, 0.0  ;;  %v2087_v40 = vrot.slane %v3590_v32, 4  ;;  %v2088_v42 = vrot.slane %v3590_v32, 5  ;;  %v2089_v44 = vrot.slane %v3590_v32, 6 }
 0x215   :  { %2526 = vst [vmem:[#allocation1 + $0x3] ss:$9 sm:$0xff] %v2065_v29  ;;  %v1468_v29 = vmax.f32 %v1279_v25, 0.0  ;;  %v2090_v45 = vrot.slane %v3590_v32, 7 }
 0x216   :  { %2527 = vst [vmem:[#allocation1 + $0x4] ss:$9 sm:$0xff] %v2066_v33  ;;  %v812_v30 = vpack.c.bf16 %v773_v27, %v772_v26  ;;  %v1696_v33 = vpop.f32.mrf.mxu2 }
 0x217   :  { %2528 = vst [vmem:[#allocation1 + $0x5] ss:$9 sm:$0xff] %v2067_v36  ;;  %v1516_v31 = vpack.c.bf16 %v1468_v29, %v1467_v28  ;;  %v455_v28 = vpack.c.bf16 %v371_v12, %v371_v12 }
 0x218   :  { %2529 = vst [vmem:[#allocation1 + $0x6] ss:$9 sm:$0xff] %v2068_v37  ;;  %3489 = vmatmul.msk.bf16.gmra.mxu1 %vm853_vm1, %v812_v30  ;;  %v1842_v37 = vadd.f32 %v4108_v38, %v1696_v33 }
 0x219   :  { %2530 = vst [vmem:[#allocation1 + $0x7] ss:$9 sm:$0xff] %v2069_v41  ;;  %3528 = vmatmul.msk.bf16.gmra.mxu2 %vm853_vm1, %v1516_v31  ;;  %v366_v41 = vpop.f32.mrf.mxu0  ;;  %v523_v31 = vunpack.c.l.bf16 %v455_v28 }
 0x21a   :  { %3591 = vtanh.f32 %v1842_v37  ;;  %v453_v46 = vpack.c.bf16 %v366_v41, %v366_v41 }
 0x21c   :  { %v521_v49 = vunpack.c.l.bf16 %v453_v46 }
 0x21e   :  { %v585_v62 = vadd.f32 %v3849_v39, %v521_v49 }
 0x220   :  { %v2531_v53 = vld [vmem:[#allocation1] sm:$0xff]  ;;  %v774_v8 = vmax.f32 %v585_v62, 0.0 }
 0x221   :  { %2532 = vst [vmem:[#allocation1] ss:$9 sm:$0xff] %v3586_v48  ;;  %3055 = vperm.xlu0 %3568, %v2531_v53   ;;  %v3592_v48 = vpop.eup %3591  ;;  %v1216_v53 = vunpack.c.l.bf16 %v1148_v47 }
 0x222   :  { %2533 = vst [vmem:[#allocation1 + $0x1] ss:$9 sm:$0xff] %v2070_v51  ;;  %v368_v51 = vpop.f32.mrf.mxu0  ;;  %v2091_v55 = vrot.slane %v3592_v48, 1  ;;  %v2092_v57 = vrot.slane %v3592_v48, 2  ;;  %v2095_v3 = vrot.slane %v3592_v48, 5  ;;  %v2096_v5 = vrot.slane %v3592_v48, 6 }
 0x223   :  { %2534 = vst [vmem:[#allocation1 + $0x2] ss:$9 sm:$0xff] %v2071_v52  ;;  %v1698_v52 = vpop.f32.mrf.mxu2  ;;  %v1280_v1 = vadd.f32 %v3968_v50, %v1216_v53 }
 0x224   :  { %2535 = vst [vmem:[#allocation1 + $0x3] ss:$9 sm:$0xff] %v2072_v54  ;;  %v1036_v54 = vpop.f32.mrf.mxu1 }
 0x225   :  { %2536 = vst [vmem:[#allocation1 + $0x4] ss:$9 sm:$0xff] %v2073_v56  ;;  %v454_v56 = vpack.c.bf16 %v368_v51, %v368_v51  ;;  %v1149_v58 = vpack.c.bf16 %v1036_v54, %v1036_v54  ;;  %v1469_v10 = vmax.f32 %v1280_v1, 0.0 }
 0x226   :  { %2537 = vst [vmem:[#allocation1 + $0x5] ss:$9 sm:$0xff] %v2074_v59 }
 0x227   :  { %2538 = vst [vmem:[#allocation1 + $0x6] ss:$9 sm:$0xff] %v2075_v60  ;;  %v2093_v60 = vrot.slane %v3592_v48, 3  ;;  %v522_v63 = vunpack.c.l.bf16 %v454_v56  ;;  %v1217_v2 = vunpack.c.l.bf16 %v1149_v58 }
 0x228   :  { %2539 = vst [vmem:[#allocation1 + $0x7] ss:$9 sm:$0xff] %v2076_v61  ;;  %v1843_v61 = vadd.f32 %v4108_v38, %v1698_v52 }
 0x229   :  { %v586_v4 = vadd.f32 %v3849_v39, %v522_v63  ;;  %v1281_v6 = vadd.f32 %v3968_v50, %v1217_v2 }
 0x22a   :  { %3593 = vtanh.f32 %v1843_v61 }
 0x22b   :  { %v1701_v18 = vpop.f32.mrf.mxu2 }
 0x22c   :  { %v1844_v24 = vadd.f32 %v4108_v38, %v1701_v18 }
 0x22e   :  { %3595 = vtanh.f32 %v1844_v24 }
 0x22f   :  { %v2540_v13 = vld [vmem:[#allocation1] sm:$0xff] }
 0x230   :  { %2541 = vst [vmem:[#allocation1] ss:$9 sm:$0xff] %v3588_v0  ;;  %3058 = vperm.xlu1 %3569, %v2540_v13   ;;  %v2094_v0 = vrot.slane %v3592_v48, 4  ;;  %v1470_v13 = vmax.f32 %v1281_v6, 0.0  ;;  %v3594_v17 = vpop.eup %3593 }
 0x231   :  { %2542 = vst [vmem:[#allocation1 + $0x1] ss:$9 sm:$0xff] %v2077_v7  ;;  %v2097_v7 = vrot.slane %v3592_v48, 7  ;;  %v2099_v20 = vrot.slane %v3594_v17, 2  ;;  %v2101_v25 = vrot.slane %v3594_v17, 4  ;;  %v2102_v26 = vrot.slane %v3594_v17, 5 }
 0x232   :  { %2543 = vst [vmem:[#allocation1 + $0x2] ss:$9 sm:$0xff] %v2078_v9  ;;  %v775_v9 = vmax.f32 %v586_v4, 0.0  ;;  %v1517_v16 = vpack.c.bf16 %v1470_v13, %v1469_v10  ;;  %v2103_v27 = vrot.slane %v3594_v17, 6  ;;  %v2104_v30 = vrot.slane %v3594_v17, 7 }
 0x233   :  { %2544 = vst [vmem:[#allocation1 + $0x3] ss:$9 sm:$0xff] %v2079_v14 }
 0x234   :  { %2545 = vst [vmem:[#allocation1 + $0x4] ss:$9 sm:$0xff] %v2080_v19  ;;  %v813_v14 = vpack.c.bf16 %v775_v9, %v774_v8  ;;  %3529 = vmatmul.msk.bf16.gmra.mxu2 %vm853_vm1, %v1517_v16  ;;  %v2098_v19 = vrot.slane %v3594_v17, 1 }
 0x235   :  { %2546 = vst [vmem:[#allocation1 + $0x5] ss:$9 sm:$0xff] %v2081_v23  ;;  %v2100_v23 = vrot.slane %v3594_v17, 3 }
 0x236   :  { %2547 = vst [vmem:[#allocation1 + $0x6] ss:$9 sm:$0xff] %v2082_v11  ;;  %3490 = vmatmul.msk.bf16.vlgmr.msrb.gmra.mxu3 %vm853_vm1, %v813_v14  ;;  %v373_v11 = vpop.f32.mrf.mxu3 }
 0x237   :  { %2548 = vst [vmem:[#allocation1 + $0x7] ss:$9 sm:$0xff] %v2083_v15  ;;  %v1039_v15 = vpop.f32.mrf.mxu1  ;;  %v456_v29 = vpack.c.bf16 %v373_v11, %v373_v11 }
 0x238   :  { %v1150_v33 = vpack.c.bf16 %v1039_v15, %v1039_v15 }
 0x23a   :  { %v1218_v37 = vunpack.c.l.bf16 %v1150_v33 }
 0x23c   :  { %v1282_v49 = vadd.f32 %v3968_v50, %v1218_v37 }
 0x23e   :  { %v2549_v36 = vld [vmem:[#allocation1] sm:$0xff] }
 0x23f   :  { %2550 = vst [vmem:[#allocation1] ss:$9 sm:$0xff] %v3590_v32  ;;  %3061 = vperm.xlu2 %3570, %v2549_v36   ;;  %v524_v32 = vunpack.c.l.bf16 %v456_v29  ;;  %v1703_v36 = vpop.f32.mrf.mxu2 }
 0x240   :  { %2551 = vst [vmem:[#allocation1 + $0x1] ss:$9 sm:$0xff] %v2084_v34  ;;  %v3596_v34 = vpop.eup %3595 }
 0x241   :  { %2552 = vst [vmem:[#allocation1 + $0x2] ss:$9 sm:$0xff] %v2085_v35  ;;  %v587_v35 = vadd.f32 %v3849_v39, %v523_v31  ;;  %v2105_v41 = vrot.slane %v3596_v34, 1  ;;  %v2106_v43 = vrot.slane %v3596_v34, 2  ;;  %v2108_v52 = vrot.slane %v3596_v34, 4 }
 0x242   :  { %2553 = vst [vmem:[#allocation1 + $0x3] ss:$9 sm:$0xff] %v2086_v21  ;;  %v588_v21 = vadd.f32 %v3849_v39, %v524_v32  ;;  %v2109_v53 = vrot.slane %v3596_v34, 5  ;;  %v2111_v56 = vrot.slane %v3596_v34, 7 }
 0x243   :  { %2554 = vst [vmem:[#allocation1 + $0x4] ss:$9 sm:$0xff] %v2087_v40  ;;  %v1041_v40 = vpop.f32.mrf.mxu1  ;;  %v776_v47 = vmax.f32 %v587_v35, 0.0 }
 0x244   :  { %2555 = vst [vmem:[#allocation1 + $0x5] ss:$9 sm:$0xff] %v2088_v42  ;;  %v1151_v42 = vpack.c.bf16 %v1041_v40, %v1041_v40 }
 0x245   :  { %2556 = vst [vmem:[#allocation1 + $0x6] ss:$9 sm:$0xff] %v2089_v44  ;;  %v2107_v44 = vrot.slane %v3596_v34, 3 }
 0x246   :  { %2557 = vst [vmem:[#allocation1 + $0x7] ss:$9 sm:$0xff] %v2090_v45  ;;  %v1845_v45 = vadd.f32 %v4108_v38, %v1703_v36  ;;  %v1219_v51 = vunpack.c.l.bf16 %v1151_v42 }
 0x247   :  { %v1706_v63 = vpop.f32.mrf.mxu2 }
 0x248   :  { %v1283_v54 = vadd.f32 %v3968_v50, %v1219_v51  ;;  %3597 = vtanh.f32 %v1845_v45  ;;  %v1846_v4 = vadd.f32 %v4108_v38, %v1706_v63 }
 0x24a   :  { %v1472_v58 = vmax.f32 %v1283_v54, 0.0  ;;  %3599 = vtanh.f32 %v1846_v4 }
 0x24d   :  { %v2558_v59 = vld [vmem:[#allocation1] sm:$0xff] }
 0x24e   :  { %2559 = vst [vmem:[#allocation1] ss:$9 sm:$0xff] %v3592_v48  ;;  %3064 = vperm.xlu0 %3568, %v2558_v59   ;;  %v777_v48 = vmax.f32 %v588_v21, 0.0  ;;  %v3598_v62 = vpop.eup %3597 }
 0x24f   :  { %2560 = vst [vmem:[#allocation1 + $0x1] ss:$9 sm:$0xff] %v2091_v55  ;;  %v2110_v55 = vrot.slane %v3596_v34, 6  ;;  %v2113_v1 = vrot.slane %v3598_v62, 2  ;;  %v2115_v6 = vrot.slane %v3598_v62, 4  ;;  %v2116_v8 = vrot.slane %v3598_v62, 5 }
 0x250   :  { %2561 = vst [vmem:[#allocation1 + $0x2] ss:$9 sm:$0xff] %v2092_v57  ;;  %v1471_v57 = vmax.f32 %v1282_v49, 0.0  ;;  %v814_v59 = vpack.c.bf16 %v777_v48, %v776_v47  ;;  %v2117_v9 = vrot.slane %v3598_v62, 6  ;;  %v2118_v13 = vrot.slane %v3598_v62, 7  ;;  %v3600_v18 = vpop.eup %3599 }
 0x251   :  { %2562 = vst [vmem:[#allocation1 + $0x3] ss:$9 sm:$0xff] %v2093_v60  ;;  %v376_v60 = vpop.f32.mrf.mxu3  ;;  %v2119_v11 = vrot.slane %v3600_v18, 1  ;;  %v2120_v15 = vrot.slane %v3600_v18, 2  ;;  %v2122_v33 = vrot.slane %v3600_v18, 4  ;;  %v2124_v36 = vrot.slane %v3600_v18, 6 }
 0x252   :  { %2563 = vst [vmem:[#allocation1 + $0x4] ss:$9 sm:$0xff] %v2094_v0  ;;  %v1518_v61 = vpack.c.bf16 %v1472_v58, %v1471_v57  ;;  %3491 = vmatmul.msk.bf16.gmra.mxu3 %vm853_vm1, %v814_v59  ;;  %v2112_v0 = vrot.slane %v3598_v62, 1  ;;  %v457_v10 = vpack.c.bf16 %v376_v60, %v376_v60  ;;  %v2125_v21 = vrot.slane %v3600_v18, 7 }
 0x253   :  { %2564 = vst [vmem:[#allocation1 + $0x5] ss:$9 sm:$0xff] %v2095_v3  ;;  %v2114_v3 = vrot.slane %v3598_v62, 3  ;;  %v3225_v59 = vlaneseq }
 0x254   :  { %2565 = vst [vmem:[#allocation1 + $0x6] ss:$9 sm:$0xff] %v2096_v5  ;;  %3530 = vmatmul.msk.bf16.gmra.mxu2 %vm853_vm1, %v1518_v61  ;;  %v525_v14 = vunpack.c.l.bf16 %v457_v10 }
 0x255   :  { %2566 = vst [vmem:[#allocation1 + $0x7] ss:$9 sm:$0xff] %v2097_v7  ;;  %v1044_v7 = vpop.f32.mrf.mxu1  ;;  %v4200_v63 = vand.u32 127, %v3225_v59 }
 0x259   :  { %v378_v5 = vpop.f32.mrf.mxu3 }
 0x25a   :  { %v458_v12 = vpack.c.bf16 %v378_v5, %v378_v5 }
 0x25c   :  { %v2567_v22 = vld [vmem:[#allocation1] sm:$0xff]  ;;  %v526_v16 = vunpack.c.l.bf16 %v458_v12 }
 0x25d   :  { %2568 = vst [vmem:[#allocation1] ss:$9 sm:$0xff] %v3594_v17  ;;  %3067 = vperm.xlu1 %3569, %v2567_v22   ;;  %v1152_v17 = vpack.c.bf16 %v1044_v7, %v1044_v7  ;;  %v1046_v24 = vpop.f32.mrf.mxu1 }
 0x25e   :  { %2569 = vst [vmem:[#allocation1 + $0x1] ss:$9 sm:$0xff] %v2098_v19  ;;  %v589_v19 = vadd.f32 %v3849_v39, %v525_v14  ;;  %v590_v22 = vadd.f32 %v3849_v39, %v526_v16 }
 0x25f   :  { %2570 = vst [vmem:[#allocation1 + $0x2] ss:$9 sm:$0xff] %v2099_v20  ;;  %v1708_v20 = vpop.f32.mrf.mxu2 }
 0x260   :  { %2571 = vst [vmem:[#allocation1 + $0x3] ss:$9 sm:$0xff] %v2100_v23  ;;  %v1220_v23 = vunpack.c.l.bf16 %v1152_v17  ;;  %v778_v29 = vmax.f32 %v589_v19, 0.0  ;;  %v4211_v19 = vadd.s32 4294967280, %v4200_v63 }
 0x261   :  { %2572 = vst [vmem:[#allocation1 + $0x4] ss:$9 sm:$0xff] %v2101_v25  ;;  %v1153_v25 = vpack.c.bf16 %v1046_v24, %v1046_v24  ;;  %v381_v42 = vpop.f32.mrf.mxu3 }
 0x262   :  { %2573 = vst [vmem:[#allocation1 + $0x5] ss:$9 sm:$0xff] %v2102_v26  ;;  %v2121_v26 = vrot.slane %v3600_v18, 3  ;;  %v1284_v31 = vadd.f32 %v3968_v50, %v1220_v23  ;;  %v459_v58 = vpack.c.bf16 %v381_v42, %v381_v42  ;;  %v4221_v42 = vadd.s32 4294967264, %v4200_v63 }
 0x263   :  { %2574 = vst [vmem:[#allocation1 + $0x6] ss:$9 sm:$0xff] %v2103_v27  ;;  %v1847_v27 = vadd.f32 %v4108_v38, %v1708_v20  ;;  %v1221_v32 = vunpack.c.l.bf16 %v1153_v25  ;;  %v3044_v25 = vpop.permute.xlu1 %3043 }
 0x264   :  { %2575 = vst [vmem:[#allocation1 + $0x7] ss:$9 sm:$0xff] %v2104_v30  ;;  %v779_v30 = vmax.f32 %v590_v22, 0.0  ;;  %v1473_v37 = vmax.f32 %v1284_v31, 0.0 }
 0x265   :  { %v1285_v35 = vadd.f32 %v3968_v50, %v1221_v32  ;;  %3601 = vtanh.f32 %v1847_v27 }
 0x267   :  { %v1474_v40 = vmax.f32 %v1285_v35, 0.0  ;;  %v1711_v45 = vpop.f32.mrf.mxu2 }
 0x268   :  { %v1848_v48 = vadd.f32 %v4108_v38, %v1711_v45  ;;  %v4224_v45 = vadd.s32 4294967272, %v4200_v63 }
 0x26a   :  { %3603 = vtanh.f32 %v1848_v48 }
 0x26b   :  { %v2576_v46 = vld [vmem:[#allocation1] sm:$0xff] }
 0x26c   :  { %2577 = vst [vmem:[#allocation1] ss:$9 sm:$0xff] %v3596_v34  ;;  %3070 = vperm.xlu2 %3570, %v2576_v46   ;;  %v2123_v34 = vrot.slane %v3600_v18, 5 }
 0x26d   :  { %2578 = vst [vmem:[#allocation1 + $0x1] ss:$9 sm:$0xff] %v2105_v41  ;;  %v815_v41 = vpack.c.bf16 %v779_v30, %v778_v29 }
 0x26e   :  { %2579 = vst [vmem:[#allocation1 + $0x2] ss:$9 sm:$0xff] %v2106_v43  ;;  %v1519_v43 = vpack.c.bf16 %v1474_v40, %v1473_v37 }
 0x26f   :  { %2580 = vst [vmem:[#allocation1 + $0x3] ss:$9 sm:$0xff] %v2107_v44  ;;  %3492 = vmatmul.msk.bf16.gmra.mxu3 %vm853_vm1, %v815_v41  ;;  %v3602_v44 = vpop.eup %3601 }
 0x270   :  { %2581 = vst [vmem:[#allocation1 + $0x4] ss:$9 sm:$0xff] %v2108_v52  ;;  %3531 = vmatmul.msk.bf16.gmra.mxu2 %vm853_vm1, %v1519_v43  ;;  %v2126_v46 = vrot.slane %v3602_v44, 1  ;;  %v2127_v47 = vrot.slane %v3602_v44, 2  ;;  %v2128_v51 = vrot.slane %v3602_v44, 3  ;;  %v3038_v52 = vpop.permute.xlu0 %3037  ;;  %v2129_v54 = vrot.slane %v3602_v44, 4 }
 0x271   :  { %2582 = vst [vmem:[#allocation1 + $0x5] ss:$9 sm:$0xff] %v2109_v53  ;;  %v383_v53 = vpop.f32.mrf.mxu3  ;;  %v2131_v57 = vrot.slane %v3602_v44, 6  ;;  %v2132_v61 = vrot.slane %v3602_v44, 7  ;;  %v3227_v17 = vperm.slane %v3038_v52, %v4200_v63 }
 0x272   :  { %2583 = vst [vmem:[#allocation1 + $0x6] ss:$9 sm:$0xff] %v2110_v55  ;;  %v1049_v55 = vpop.f32.mrf.mxu1  ;;  %v460_v60 = vpack.c.bf16 %v383_v53, %v383_v53 }
 0x273   :  { %2584 = vst [vmem:[#allocation1 + $0x7] ss:$9 sm:$0xff] %v2111_v56  ;;  %v2130_v56 = vrot.slane %v3602_v44, 5 }
 0x278   :  { %v3041_v4 = vpop.permute.xlu0 %3040 }
 0x27a   :  { %v2585_v2 = vld [vmem:[#allocation1] sm:$0xff] }
 0x27b   :  { %2586 = vst [vmem:[#allocation1] ss:$9 sm:$0xff] %v3598_v62  ;;  %3073 = vperm.xlu0 %3568, %v2585_v2   ;;  %v527_v62 = vunpack.c.l.bf16 %v459_v58  ;;  %v3604_v2 = vpop.eup %3603 }
 0x27c   :  { %2587 = vst [vmem:[#allocation1 + $0x1] ss:$9 sm:$0xff] %v2112_v0  ;;  %v528_v0 = vunpack.c.l.bf16 %v460_v60  ;;  %v2133_v10 = vrot.slane %v3604_v2, 1  ;;  %v2134_v12 = vrot.slane %v3604_v2, 2  ;;  %v2137_v27 = vrot.slane %v3604_v2, 5 }
 0x27d   :  { %2588 = vst [vmem:[#allocation1 + $0x2] ss:$9 sm:$0xff] %v2113_v1  ;;  %v1154_v1 = vpack.c.bf16 %v1049_v55, %v1049_v55  ;;  %v591_v5 = vadd.f32 %v3849_v39, %v527_v62  ;;  %v2138_v30 = vrot.slane %v3604_v2, 6  ;;  %v2139_v31 = vrot.slane %v3604_v2, 7 }
 0x27e   :  { %2589 = vst [vmem:[#allocation1 + $0x3] ss:$9 sm:$0xff] %v2114_v3  ;;  %v4203_v3 = vadd.s32 4294967288, %v4200_v63  ;;  %v592_v7 = vadd.f32 %v3849_v39, %v528_v0 }
 0x27f   :  { %2590 = vst [vmem:[#allocation1 + $0x4] ss:$9 sm:$0xff] %v2115_v6  ;;  %v1713_v6 = vpop.f32.mrf.mxu2  ;;  %v780_v22 = vmax.f32 %v591_v5, 0.0 }
 0x280   :  { %2591 = vst [vmem:[#allocation1 + $0x5] ss:$9 sm:$0xff] %v2116_v8  ;;  %v1222_v8 = vunpack.c.l.bf16 %v1154_v1  ;;  %v3229_v14 = vperm.slane %v3041_v4, %v4203_v3  ;;  %v781_v23 = vmax.f32 %v592_v7, 0.0 }
 0x281   :  { %2592 = vst [vmem:[#allocation1 + $0x6] ss:$9 sm:$0xff] %v2117_v9  ;;  %v1051_v9 = vpop.f32.mrf.mxu1 }
 0x282   :  { %2593 = vst [vmem:[#allocation1 + $0x7] ss:$9 sm:$0xff] %v2118_v13  ;;  %v2135_v13 = vrot.slane %v3604_v2, 3  ;;  %v1155_v16 = vpack.c.bf16 %v1051_v9, %v1051_v9  ;;  %v1286_v24 = vadd.f32 %v3968_v50, %v1222_v8  ;;  %v816_v35 = vpack.c.bf16 %v781_v23, %v780_v22 }
 0x284   :  { %3493 = vmatmul.msk.bf16.gmra.mxu3 %vm853_vm1, %v816_v35 }
 0x287   :  { %v1716_v40 = vpop.f32.mrf.mxu2 }
 0x288   :  { %v1850_v48 = vadd.f32 %v4108_v38, %v1716_v40 }
 0x289   :  { %v2594_v28 = vld [vmem:[#allocation1] sm:$0xff]  ;;  %v1054_v53 = vpop.f32.mrf.mxu1 }
 0x28a   :  { %2595 = vst [vmem:[#allocation1] ss:$9 sm:$0xff] %v3600_v18  ;;  %3076 = vperm.xlu1 %3569, %v2594_v28   ;;  %v1849_v18 = vadd.f32 %v4108_v38, %v1713_v6  ;;  %v3231_v28 = vsel %vm3230_vm2, %v3229_v14, %v3227_v17  ;;  %v1156_v4 = vpack.c.bf16 %v1054_v53, %v1054_v53 }
 0x28b   :  { %2596 = vst [vmem:[#allocation1 + $0x1] ss:$9 sm:$0xff] %v2119_v11  ;;  %v1223_v11 = vunpack.c.l.bf16 %v1155_v16 }
 0x28c   :  { %2597 = vst [vmem:[#allocation1 + $0x2] ss:$9 sm:$0xff] %v2120_v15  ;;  %v2136_v15 = vrot.slane %v3604_v2, 4  ;;  %3605 = vtanh.f32 %v1849_v18  ;;  %v1224_v9 = vunpack.c.l.bf16 %v1156_v4 }
 0x28d   :  { %2598 = vst [vmem:[#allocation1 + $0x3] ss:$9 sm:$0xff] %v2121_v26  ;;  %v3233_v26 = vperm.slane %v3044_v25, %v4211_v19  ;;  %v1287_v29 = vadd.f32 %v3968_v50, %v1223_v11  ;;  %3607 = vtanh.f32 %v1850_v48 }
 0x28e   :  { %2599 = vst [vmem:[#allocation1 + $0x4] ss:$9 sm:$0xff] %v2122_v33  ;;  %v1475_v33 = vmax.f32 %v1286_v24, 0.0  ;;  %v1288_v23 = vadd.f32 %v3968_v50, %v1224_v9 }
 0x28f   :  { %2600 = vst [vmem:[#allocation1 + $0x5] ss:$9 sm:$0xff] %v2123_v34  ;;  %v3235_v32 = vsel %vm3234_vm3, %v3233_v26, %v3231_v28  ;;  %v1476_v34 = vmax.f32 %v1287_v29, 0.0  ;;  %v1718_v7 = vpop.f32.mrf.mxu2 }
 0x290   :  { %2601 = vst [vmem:[#allocation1 + $0x6] ss:$9 sm:$0xff] %v2124_v36  ;;  %v386_v36 = vpop.f32.mrf.mxu3  ;;  %v1851_v17 = vadd.f32 %v4108_v38, %v1718_v7  ;;  %v1477_v29 = vmax.f32 %v1288_v23, 0.0 }
 0x291   :  { %2602 = vst [vmem:[#allocation1 + $0x7] ss:$9 sm:$0xff] %v2125_v21  ;;  %v1520_v21 = vpack.c.bf16 %v1476_v34, %v1475_v33  ;;  %v461_v58 = vpack.c.bf16 %v386_v36, %v386_v36 }
 0x292   :  { %v3606_v37 = vpop.eup %3605  ;;  %3609 = vtanh.f32 %v1851_v17 }
 0x293   :  { %3532 = vmatmul.msk.bf16.gmra.mxu2 %vm853_vm1, %v1520_v21  ;;  %v2140_v41 = vrot.slane %v3606_v37, 1  ;;  %v2141_v43 = vrot.slane %v3606_v37, 2  ;;  %v2143_v52 = vrot.slane %v3606_v37, 4  ;;  %v2144_v55 = vrot.slane %v3606_v37, 5  ;;  %v3608_v5 = vpop.eup %3607 }
 0x294   :  { %v2146_v62 = vrot.slane %v3606_v37, 7  ;;  %v529_v1 = vunpack.c.l.bf16 %v461_v58  ;;  %v2148_v14 = vrot.slane %v3608_v5, 2  ;;  %v2149_v16 = vrot.slane %v3608_v5, 3 }
 0x295   :  { %v2150_v11 = vrot.slane %v3608_v5, 4  ;;  %v2153_v28 = vrot.slane %v3608_v5, 7 }
 0x296   :  { %v593_v6 = vadd.f32 %v3849_v39, %v529_v1 }
 0x298   :  { %v2603_v49 = vld [vmem:[#allocation1] sm:$0xff] }
 0x299   :  { %2604 = vst [vmem:[#allocation1] ss:$9 sm:$0xff] %v3602_v44  ;;  %3079 = vperm.xlu2 %3570, %v2603_v49   ;;  %v3050_v44 = vpop.permute.xlu2 %3049  ;;  %v388_v49 = vpop.f32.mrf.mxu3 }
 0x29a   :  { %2605 = vst [vmem:[#allocation1 + $0x1] ss:$9 sm:$0xff] %v2126_v46  ;;  %v462_v60 = vpack.c.bf16 %v388_v49, %v388_v49 }
 0x29b   :  { %2606 = vst [vmem:[#allocation1 + $0x2] ss:$9 sm:$0xff] %v2127_v47  ;;  %v2142_v47 = vrot.slane %v3606_v37, 3 }
 0x29c   :  { %2607 = vst [vmem:[#allocation1 + $0x3] ss:$9 sm:$0xff] %v2128_v51  ;;  %v3047_v51 = vpop.permute.xlu1 %3046 }
 0x29d   :  { %2608 = vst [vmem:[#allocation1 + $0x4] ss:$9 sm:$0xff] %v2129_v54  ;;  %v3237_v54 = vperm.slane %v3047_v51, %v4224_v45 }
 0x29e   :  { %2609 = vst [vmem:[#allocation1 + $0x5] ss:$9 sm:$0xff] %v2130_v56  ;;  %v2145_v56 = vrot.slane %v3606_v37, 6 }
 0x29f   :  { %2610 = vst [vmem:[#allocation1 + $0x6] ss:$9 sm:$0xff] %v2131_v57  ;;  %v3241_v57 = vperm.slane %v3050_v44, %v4221_v42 }
 0x2a0   :  { %2611 = vst [vmem:[#allocation1 + $0x7] ss:$9 sm:$0xff] %v2132_v61  ;;  %v3239_v61 = vsel %vm3238_vm4, %v3237_v54, %v3235_v32  ;;  %v4237_v32 = vadd.s32 4294967256, %v4200_v63 }
 0x2a1   :  { %v3243_v0 = vsel %vm3242_vm5, %v3241_v57, %v3239_v61  ;;  %v391_v25 = vpop.f32.mrf.mxu3  ;;  %v3053_v34 = vpop.permute.xlu2 %3052 }
 0x2a2   :  { %v463_v33 = vpack.c.bf16 %v391_v25, %v391_v25  ;;  %v3245_v36 = vperm.slane %v3053_v34, %v4237_v32 }
 0x2a4   :  { %v531_v21 = vunpack.c.l.bf16 %v463_v33 }
 0x2a7   :  { %v2612_v20 = vld [vmem:[#allocation1] sm:$0xff] }
 0x2a8   :  { %2613 = vst [vmem:[#allocation1] ss:$9 sm:$0xff] %v3604_v2  ;;  %3082 = vperm.xlu0 %3568, %v2612_v20   ;;  %v530_v2 = vunpack.c.l.bf16 %v462_v60  ;;  %v782_v20 = vmax.f32 %v593_v6, 0.0 }
 0x2a9   :  { %2614 = vst [vmem:[#allocation1 + $0x1] ss:$9 sm:$0xff] %v2133_v10  ;;  %v1056_v10 = vpop.f32.mrf.mxu1  ;;  %v393_v40 = vpop.f32.mrf.mxu3 }
 0x2aa   :  { %2615 = vst [vmem:[#allocation1 + $0x2] ss:$9 sm:$0xff] %v2134_v12  ;;  %v594_v8 = vadd.f32 %v3849_v39, %v530_v2  ;;  %v2147_v12 = vrot.slane %v3608_v5, 1 }
 0x2ab   :  { %2616 = vst [vmem:[#allocation1 + $0x3] ss:$9 sm:$0xff] %v2135_v13  ;;  %v1157_v13 = vpack.c.bf16 %v1056_v10, %v1056_v10  ;;  %v4248_v10 = vadd.s32 4294967248, %v4200_v63 }
 0x2ac   :  { %2617 = vst [vmem:[#allocation1 + $0x4] ss:$9 sm:$0xff] %v2136_v15  ;;  %v783_v22 = vmax.f32 %v594_v8, 0.0  ;;  %v2151_v15 = vrot.slane %v3608_v5, 5 }
 0x2ad   :  { %2618 = vst [vmem:[#allocation1 + $0x5] ss:$9 sm:$0xff] %v2137_v27  ;;  %v1225_v24 = vunpack.c.l.bf16 %v1157_v13  ;;  %v2152_v27 = vrot.slane %v3608_v5, 6 }
 0x2ae   :  { %2619 = vst [vmem:[#allocation1 + $0x6] ss:$9 sm:$0xff] %v2138_v30 }
 0x2af   :  { %2620 = vst [vmem:[#allocation1 + $0x7] ss:$9 sm:$0xff] %v2139_v31  ;;  %v1289_v26 = vadd.f32 %v3968_v50, %v1225_v24  ;;  %v817_v31 = vpack.c.bf16 %v783_v22, %v782_v20 }
 0x2b1   :  { %v1478_v30 = vmax.f32 %v1289_v26, 0.0  ;;  %3494 = vmatmul.msk.bf16.gmra.mxu3 %vm853_vm1, %v817_v31  ;;  %v396_v22 = vpop.f32.mrf.mxu3 }
 0x2b3   :  { %v1521_v35 = vpack.c.bf16 %v1478_v30, %v1477_v29  ;;  %v465_v29 = vpack.c.bf16 %v396_v22, %v396_v22 }
 0x2b5   :  { %3533 = vmatmul.msk.bf16.gmra.mxu2 %vm853_vm1, %v1521_v35  ;;  %v533_v31 = vunpack.c.l.bf16 %v465_v29 }
 0x2b6   :  { %v2621_v46 = vld [vmem:[#allocation1] sm:$0xff] }
 0x2b7   :  { %2622 = vst [vmem:[#allocation1] ss:$9 sm:$0xff] %v3606_v37  ;;  %3085 = vperm.xlu1 %3569, %v2621_v46   ;;  %v3610_v37 = vpop.eup %3609  ;;  %v595_v46 = vadd.f32 %v3849_v39, %v531_v21  ;;  %v597_v21 = vadd.f32 %v3849_v39, %v533_v31 }
 0x2b8   :  { %2623 = vst [vmem:[#allocation1 + $0x1] ss:$9 sm:$0xff] %v2140_v41  ;;  %v3247_v41 = vsel %vm3246_vm6, %v3245_v36, %v3243_v0  ;;  %v2154_v44 = vrot.slane %v3610_v37, 1  ;;  %v2155_v48 = vrot.slane %v3610_v37, 2  ;;  %v2156_v51 = vrot.slane %v3610_v37, 3 }
 0x2b9   :  { %2624 = vst [vmem:[#allocation1 + $0x2] ss:$9 sm:$0xff] %v2141_v43  ;;  %v1721_v43 = vpop.f32.mrf.mxu2  ;;  %v2157_v54 = vrot.slane %v3610_v37, 4  ;;  %v784_v57 = vmax.f32 %v595_v46, 0.0  ;;  %v2159_v60 = vrot.slane %v3610_v37, 6  ;;  %v2160_v61 = vrot.slane %v3610_v37, 7  ;;  %v398_v34 = vpop.f32.mrf.mxu3 }
 0x2ba   :  { %2625 = vst [vmem:[#allocation1 + $0x3] ss:$9 sm:$0xff] %v2142_v47  ;;  %v464_v47 = vpack.c.bf16 %v393_v40, %v393_v40 }
 0x2bb   :  { %2626 = vst [vmem:[#allocation1 + $0x4] ss:$9 sm:$0xff] %v2143_v52  ;;  %v1852_v52 = vadd.f32 %v4108_v38, %v1721_v43 }
 0x2bc   :  { %2627 = vst [vmem:[#allocation1 + $0x5] ss:$9 sm:$0xff] %v2144_v55  ;;  %v532_v53 = vunpack.c.l.bf16 %v464_v47  ;;  %v1059_v55 = vpop.f32.mrf.mxu1 }
 0x2bd   :  { %2628 = vst [vmem:[#allocation1 + $0x6] ss:$9 sm:$0xff] %v2145_v56  ;;  %v2158_v56 = vrot.slane %v3610_v37, 5  ;;  %3611 = vtanh.f32 %v1852_v52  ;;  %v1158_v1 = vpack.c.bf16 %v1059_v55, %v1059_v55 }
 0x2be   :  { %2629 = vst [vmem:[#allocation1 + $0x7] ss:$9 sm:$0xff] %v2146_v62  ;;  %v596_v58 = vadd.f32 %v3849_v39, %v532_v53 }
 0x2bf   :  { %v1226_v4 = vunpack.c.l.bf16 %v1158_v1 }
 0x2c0   :  { %v785_v62 = vmax.f32 %v596_v58, 0.0 }
 0x2c1   :  { %v1723_v6 = vpop.f32.mrf.mxu2 }
 0x2c2   :  { %v818_v0 = vpack.c.bf16 %v785_v62, %v784_v57 }
 0x2c3   :  { %v3612_v2 = vpop.eup %3611 }
 0x2c4   :  { %3495 = vmatmul.msk.bf16.gmra.mxu3 %vm853_vm1, %v818_v0  ;;  %v2161_v7 = vrot.slane %v3612_v2, 1  ;;  %v2162_v9 = vrot.slane %v3612_v2, 2  ;;  %v2163_v13 = vrot.slane %v3612_v2, 3  ;;  %v2164_v20 = vrot.slane %v3612_v2, 4 }
 0x2c5   :  { %v2630_v18 = vld [vmem:[#allocation1] sm:$0xff]  ;;  %v2165_v24 = vrot.slane %v3612_v2, 5  ;;  %v2166_v25 = vrot.slane %v3612_v2, 6  ;;  %v2167_v26 = vrot.slane %v3612_v2, 7 }
 0x2c6   :  { %2631 = vst [vmem:[#allocation1] ss:$9 sm:$0xff] %v3608_v5  ;;  %3088 = vperm.xlu2 %3570, %v2630_v18   ;;  %v1061_v5 = vpop.f32.mrf.mxu1  ;;  %v3056_v18 = vpop.permute.xlu0 %3055 }
 0x2c7   :  { %2632 = vst [vmem:[#allocation1 + $0x1] ss:$9 sm:$0xff] %v2147_v12  ;;  %v1159_v8 = vpack.c.bf16 %v1061_v5, %v1061_v5  ;;  %v3249_v23 = vperm.slane %v3056_v18, %v4248_v10 }
 0x2c8   :  { %2633 = vst [vmem:[#allocation1 + $0x2] ss:$9 sm:$0xff] %v2148_v14  ;;  %v1853_v14 = vadd.f32 %v4108_v38, %v1723_v6  ;;  %v3062_v6 = vpop.permute.xlu2 %3061 }
 0x2c9   :  { %2634 = vst [vmem:[#allocation1 + $0x3] ss:$9 sm:$0xff] %v2149_v16  ;;  %v1290_v16 = vadd.f32 %v3968_v50, %v1226_v4  ;;  %v1227_v17 = vunpack.c.l.bf16 %v1159_v8  ;;  %v1726_v35 = vpop.f32.mrf.mxu2  ;;  %v4266_v4 = vadd.s32 4294967232, %v4200_v63 }
 0x2ca   :  { %2635 = vst [vmem:[#allocation1 + $0x4] ss:$9 sm:$0xff] %v2150_v11  ;;  %3613 = vtanh.f32 %v1853_v14  ;;  %v1854_v46 = vadd.f32 %v4108_v38, %v1726_v35 }
 0x2cb   :  { %2636 = vst [vmem:[#allocation1 + $0x5] ss:$9 sm:$0xff] %v2151_v15  ;;  %v1291_v11 = vadd.f32 %v3968_v50, %v1227_v17  ;;  %v3251_v15 = vsel %vm3250_vm7, %v3249_v23, %v3247_v41  ;;  %v4258_v41 = vadd.s32 4294967240, %v4200_v63  ;;  %v3257_v18 = vperm.slane %v3062_v6, %v4266_v4 }
 0x2cc   :  { %2637 = vst [vmem:[#allocation1 + $0x6] ss:$9 sm:$0xff] %v2152_v27  ;;  %v1479_v27 = vmax.f32 %v1290_v16, 0.0  ;;  %3615 = vtanh.f32 %v1854_v46 }
 0x2cd   :  { %2638 = vst [vmem:[#allocation1 + $0x7] ss:$9 sm:$0xff] %v2153_v28  ;;  %v1480_v28 = vmax.f32 %v1291_v11, 0.0 }
 0x2cf   :  { %v1522_v30 = vpack.c.bf16 %v1480_v28, %v1479_v27 }
 0x2d0   :  { %v3614_v33 = vpop.eup %3613 }
 0x2d1   :  { %3534 = vmatmul.msk.bf16.gmra.mxu2 %vm853_vm1, %v1522_v30  ;;  %v2168_v36 = vrot.slane %v3614_v33, 1  ;;  %v2169_v40 = vrot.slane %v3614_v33, 2  ;;  %v2172_v53 = vrot.slane %v3614_v33, 5  ;;  %v2174_v58 = vrot.slane %v3614_v33, 7  ;;  %v1728_v5 = vpop.f32.mrf.mxu2 }
 0x2d2   :  { %v3616_v0 = vpop.eup %3615  ;;  %v1855_v14 = vadd.f32 %v4108_v38, %v1728_v5 }
 0x2d3   :  { %v2179_v22 = vrot.slane %v3616_v0, 5 }
 0x2d4   :  { %v2639_v49 = vld [vmem:[#allocation1] sm:$0xff]  ;;  %3617 = vtanh.f32 %v1855_v14 }
 0x2d5   :  { %2640 = vst [vmem:[#allocation1] ss:$9 sm:$0xff] %v3610_v37  ;;  %3091 = vperm.xlu0 %3568, %v2639_v49   ;;  %v466_v37 = vpack.c.bf16 %v398_v34, %v398_v34  ;;  %v2171_v49 = vrot.slane %v3614_v33, 4 }
 0x2d6   :  { %2641 = vst [vmem:[#allocation1 + $0x1] ss:$9 sm:$0xff] %v2154_v44  ;;  %v2170_v44 = vrot.slane %v3614_v33, 3 }
 0x2d7   :  { %2642 = vst [vmem:[#allocation1 + $0x2] ss:$9 sm:$0xff] %v2155_v48  ;;  %v534_v47 = vunpack.c.l.bf16 %v466_v37  ;;  %v3059_v48 = vpop.permute.xlu1 %3058 }
 0x2d8   :  { %2643 = vst [vmem:[#allocation1 + $0x3] ss:$9 sm:$0xff] %v2156_v51  ;;  %v1064_v51 = vpop.f32.mrf.mxu1  ;;  %v3253_v52 = vperm.slane %v3059_v48, %v4258_v41 }
 0x2d9   :  { %2644 = vst [vmem:[#allocation1 + $0x4] ss:$9 sm:$0xff] %v2157_v54  ;;  %v786_v54 = vmax.f32 %v597_v21, 0.0  ;;  %v598_v55 = vadd.f32 %v3849_v39, %v534_v47  ;;  %v1160_v62 = vpack.c.bf16 %v1064_v51, %v1064_v51  ;;  %v1731_v29 = vpop.f32.mrf.mxu2  ;;  %v3065_v21 = vpop.permute.xlu0 %3064 }
 0x2da   :  { %2645 = vst [vmem:[#allocation1 + $0x5] ss:$9 sm:$0xff] %v2158_v56  ;;  %v2173_v56 = vrot.slane %v3614_v33, 6  ;;  %v3255_v57 = vsel %vm3254_vm8, %v3253_v52, %v3251_v15  ;;  %v3618_v28 = vpop.eup %3617 }
 0x2db   :  { %2646 = vst [vmem:[#allocation1 + $0x6] ss:$9 sm:$0xff] %v2159_v60  ;;  %v787_v60 = vmax.f32 %v598_v55, 0.0  ;;  %v1228_v1 = vunpack.c.l.bf16 %v1160_v62  ;;  %v3259_v11 = vsel %vm3258_vm9, %v3257_v18, %v3255_v57  ;;  %v2182_v30 = vrot.slane %v3618_v28, 1 }
 0x2dc   :  { %2647 = vst [vmem:[#allocation1 + $0x7] ss:$9 sm:$0xff] %v2160_v61  ;;  %v2183_v31 = vrot.slane %v3618_v28, 2  ;;  %v2184_v35 = vrot.slane %v3618_v28, 3  ;;  %v2185_v37 = vrot.slane %v3618_v28, 4  ;;  %v2187_v46 = vrot.slane %v3618_v28, 6 }
 0x2dd   :  { %v819_v61 = vpack.c.bf16 %v787_v60, %v786_v54  ;;  %v1292_v16 = vadd.f32 %v3968_v50, %v1228_v1  ;;  %v2188_v48 = vrot.slane %v3618_v28, 7 }
 0x2df   :  { %3496 = vmatmul.msk.bf16.gmra.mxu3 %vm853_vm1, %v819_v61  ;;  %v1481_v15 = vmax.f32 %v1292_v16, 0.0 }
 0x2e1   :  { %v1733_v54 = vpop.f32.mrf.mxu2 }
 0x2e2   :  { %v1857_v62 = vadd.f32 %v4108_v38, %v1733_v54 }
 0x2e3   :  { %v2648_v12 = vld [vmem:[#allocation1] sm:$0xff] }
 0x2e4   :  { %2649 = vst [vmem:[#allocation1] ss:$9 sm:$0xff] %v3612_v2  ;;  %3094 = vperm.xlu1 %3569, %v2648_v12   ;;  %v1066_v2 = vpop.f32.mrf.mxu1 }
 0x2e5   :  { %2650 = vst [vmem:[#allocation1 + $0x1] ss:$9 sm:$0xff] %v2161_v7  ;;  %v2175_v7 = vrot.slane %v3616_v0, 1  ;;  %v1161_v8 = vpack.c.bf16 %v1066_v2, %v1066_v2  ;;  %v3068_v2 = vpop.permute.xlu1 %3067 }
 0x2e6   :  { %2651 = vst [vmem:[#allocation1 + $0x2] ss:$9 sm:$0xff] %v2162_v9  ;;  %v2176_v9 = vrot.slane %v3616_v0, 2 }
 0x2e7   :  { %2652 = vst [vmem:[#allocation1 + $0x3] ss:$9 sm:$0xff] %v2163_v13  ;;  %v2177_v13 = vrot.slane %v3616_v0, 3  ;;  %v1229_v17 = vunpack.c.l.bf16 %v1161_v8 }
 0x2e8   :  { %2653 = vst [vmem:[#allocation1 + $0x4] ss:$9 sm:$0xff] %v2164_v20  ;;  %v2178_v20 = vrot.slane %v3616_v0, 4 }
 0x2e9   :  { %2654 = vst [vmem:[#allocation1 + $0x5] ss:$9 sm:$0xff] %v2165_v24  ;;  %v1293_v23 = vadd.f32 %v3968_v50, %v1229_v17  ;;  %v2180_v24 = vrot.slane %v3616_v0, 6 }
 0x2ea   :  { %2655 = vst [vmem:[#allocation1 + $0x6] ss:$9 sm:$0xff] %v2166_v25  ;;  %v2181_v25 = vrot.slane %v3616_v0, 7 }
 0x2eb   :  { %2656 = vst [vmem:[#allocation1 + $0x7] ss:$9 sm:$0xff] %v2167_v26  ;;  %v1482_v26 = vmax.f32 %v1293_v23, 0.0 }
 0x2ed   :  { %v1523_v27 = vpack.c.bf16 %v1482_v26, %v1481_v15  ;;  %v4291_v26 = vadd.s32 4294967208, %v4200_v63 }
 0x2ef   :  { %3535 = vmatmul.msk.bf16.gmra.mxu2 %vm853_vm1, %v1523_v27  ;;  %v1736_v27 = vpop.f32.mrf.mxu2 }
 0x2f2   :  { %v2657_v43 = vld [vmem:[#allocation1] sm:$0xff] }
 0x2f3   :  { %2658 = vst [vmem:[#allocation1] ss:$9 sm:$0xff] %v3614_v33  ;;  %3097 = vperm.xlu2 %3570, %v2657_v43   ;;  %v4275_v33 = vadd.s32 4294967224, %v4200_v63 }
 0x2f4   :  { %2659 = vst [vmem:[#allocation1 + $0x1] ss:$9 sm:$0xff] %v2168_v36  ;;  %v1856_v36 = vadd.f32 %v4108_v38, %v1731_v29 }
 0x2f5   :  { %2660 = vst [vmem:[#allocation1 + $0x2] ss:$9 sm:$0xff] %v2169_v40  ;;  %v1069_v40 = vpop.f32.mrf.mxu1  ;;  %v3261_v43 = vperm.slane %v3065_v21, %v4275_v33 }
 0x2f6   :  { %2661 = vst [vmem:[#allocation1 + $0x3] ss:$9 sm:$0xff] %v2170_v44  ;;  %v2186_v44 = vrot.slane %v3618_v28, 5  ;;  %3619 = vtanh.f32 %v1856_v36 }
 0x2f7   :  { %2662 = vst [vmem:[#allocation1 + $0x4] ss:$9 sm:$0xff] %v2171_v49  ;;  %v3263_v47 = vsel %vm3262_vm10, %v3261_v43, %v3259_v11  ;;  %v1162_v49 = vpack.c.bf16 %v1069_v40, %v1069_v40  ;;  %3621 = vtanh.f32 %v1857_v62 }
 0x2f8   :  { %2663 = vst [vmem:[#allocation1 + $0x5] ss:$9 sm:$0xff] %v2172_v53 }
 0x2f9   :  { %2664 = vst [vmem:[#allocation1 + $0x6] ss:$9 sm:$0xff] %v2173_v56  ;;  %v1230_v52 = vunpack.c.l.bf16 %v1162_v49 }
 0x2fa   :  { %2665 = vst [vmem:[#allocation1 + $0x7] ss:$9 sm:$0xff] %v2174_v58  ;;  %v4281_v58 = vadd.s32 4294967216, %v4200_v63 }
 0x2fc   :  { %v3620_v51 = vpop.eup %3619  ;;  %v3265_v6 = vperm.slane %v3068_v2, %v4281_v58 }
 0x2fd   :  { %v1071_v53 = vpop.f32.mrf.mxu1  ;;  %v2189_v55 = vrot.slane %v3620_v51, 1  ;;  %v2190_v57 = vrot.slane %v3620_v51, 2  ;;  %v2191_v61 = vrot.slane %v3620_v51, 3  ;;  %v2192_v5 = vrot.slane %v3620_v51, 4  ;;  %v3622_v11 = vpop.eup %3621 }
 0x2fe   :  { %v1163_v56 = vpack.c.bf16 %v1071_v53, %v1071_v53  ;;  %v2195_v16 = vrot.slane %v3620_v51, 7  ;;  %v2196_v29 = vrot.slane %v3622_v11, 1  ;;  %v2199_v36 = vrot.slane %v3622_v11, 4 }
 0x2ff   :  { %v2201_v40 = vrot.slane %v3622_v11, 6 }
 0x300   :  { %v1231_v1 = vunpack.c.l.bf16 %v1163_v56 }
 0x301   :  { %v2666_v12 = vld [vmem:[#allocation1] sm:$0xff] }
 0x302   :  { %2667 = vst [vmem:[#allocation1] ss:$9 sm:$0xff] %v3616_v0  ;;  %3100 = vperm.xlu0 %3568, %v2666_v12   ;;  %v1294_v0 = vadd.f32 %v3968_v50, %v1230_v52  ;;  %v1295_v8 = vadd.f32 %v3968_v50, %v1231_v1  ;;  %v2194_v12 = vrot.slane %v3620_v51, 6 }
 0x303   :  { %2668 = vst [vmem:[#allocation1 + $0x1] ss:$9 sm:$0xff] %v2175_v7  ;;  %v2193_v7 = vrot.slane %v3620_v51, 5 }
 0x304   :  { %2669 = vst [vmem:[#allocation1 + $0x2] ss:$9 sm:$0xff] %v2176_v9  ;;  %v401_v9 = vpop.f32.mrf.mxu3  ;;  %v1483_v17 = vmax.f32 %v1294_v0, 0.0  ;;  %v1484_v18 = vmax.f32 %v1295_v8, 0.0  ;;  %v3074_v0 = vpop.permute.xlu0 %3073 }
 0x305   :  { %2670 = vst [vmem:[#allocation1 + $0x3] ss:$9 sm:$0xff] %v2177_v13  ;;  %v3267_v13 = vsel %vm3266_vm11, %v3265_v6, %v3263_v47  ;;  %v467_v14 = vpack.c.bf16 %v401_v9, %v401_v9  ;;  %v1074_v21 = vpop.f32.mrf.mxu1 }
 0x306   :  { %2671 = vst [vmem:[#allocation1 + $0x4] ss:$9 sm:$0xff] %v2178_v20 }
 0x307   :  { %2672 = vst [vmem:[#allocation1 + $0x5] ss:$9 sm:$0xff] %v2179_v22  ;;  %v535_v20 = vunpack.c.l.bf16 %v467_v14  ;;  %v1524_v22 = vpack.c.bf16 %v1484_v18, %v1483_v17 }
 0x308   :  { %2673 = vst [vmem:[#allocation1 + $0x6] ss:$9 sm:$0xff] %v2180_v24 }
 0x309   :  { %2674 = vst [vmem:[#allocation1 + $0x7] ss:$9 sm:$0xff] %v2181_v25  ;;  %v599_v23 = vadd.f32 %v3849_v39, %v535_v20  ;;  %3536 = vmatmul.msk.bf16.gmra.mxu2 %vm853_vm1, %v1524_v22  ;;  %v1858_v39 = vadd.f32 %v4108_v38, %v1736_v27  ;;  %v4307_v22 = vadd.s32 4294967192, %v4200_v63 }
 0x30b   :  { %v788_v24 = vmax.f32 %v599_v23, 0.0  ;;  %3623 = vtanh.f32 %v1858_v39 }
 0x30c   :  { %v403_v25 = vpop.f32.mrf.mxu3 }
 0x30d   :  { %v820_v15 = vpack.c.bf16 %v788_v24, %v788_v24  ;;  %v1076_v49 = vpop.f32.mrf.mxu1  ;;  %v3077_v25 = vpop.permute.xlu1 %3076 }
 0x30e   :  { %v1165_v53 = vpack.c.bf16 %v1076_v49, %v1076_v49  ;;  %v3277_v27 = vperm.slane %v3077_v25, %v4307_v22 }
 0x30f   :  { %3497 = vmatmul.msk.bf16.gmra.mxu3 %vm853_vm1, %v820_v15 }
 0x310   :  { %v2675_v34 = vld [vmem:[#allocation1] sm:$0xff]  ;;  %v1233_v62 = vunpack.c.l.bf16 %v1165_v53 }
 0x311   :  { %2676 = vst [vmem:[#allocation1] ss:$9 sm:$0xff] %v3618_v28  ;;  %3103 = vperm.xlu1 %3569, %v2675_v34   ;;  %v3071_v28 = vpop.permute.xlu2 %3070  ;;  %v2198_v34 = vrot.slane %v3622_v11, 3  ;;  %v3624_v47 = vpop.eup %3623 }
 0x312   :  { %2677 = vst [vmem:[#allocation1 + $0x1] ss:$9 sm:$0xff] %v2182_v30  ;;  %v2197_v30 = vrot.slane %v3622_v11, 2  ;;  %v2203_v52 = vrot.slane %v3624_v47, 1  ;;  %v2204_v54 = vrot.slane %v3624_v47, 2  ;;  %v2206_v1 = vrot.slane %v3624_v47, 4 }
 0x313   :  { %2678 = vst [vmem:[#allocation1 + $0x2] ss:$9 sm:$0xff] %v2183_v31  ;;  %v1297_v6 = vadd.f32 %v3968_v50, %v1233_v62  ;;  %v2209_v9 = vrot.slane %v3624_v47, 7 }
 0x314   :  { %2679 = vst [vmem:[#allocation1 + $0x3] ss:$9 sm:$0xff] %v2184_v35  ;;  %v3269_v35 = vperm.slane %v3071_v28, %v4291_v26 }
 0x315   :  { %2680 = vst [vmem:[#allocation1 + $0x4] ss:$9 sm:$0xff] %v2185_v37  ;;  %v2200_v37 = vrot.slane %v3622_v11, 5 }
 0x316   :  { %2681 = vst [vmem:[#allocation1 + $0x5] ss:$9 sm:$0xff] %v2186_v44  ;;  %v3271_v43 = vsel %vm3270_vm12, %v3269_v35, %v3267_v13  ;;  %v2202_v44 = vrot.slane %v3622_v11, 7  ;;  %v1486_v13 = vmax.f32 %v1297_v6, 0.0  ;;  %v4313_v35 = vadd.s32 4294967184, %v4200_v63 }
 0x317   :  { %2682 = vst [vmem:[#allocation1 + $0x6] ss:$9 sm:$0xff] %v2187_v46  ;;  %v1164_v46 = vpack.c.bf16 %v1074_v21, %v1074_v21 }
 0x318   :  { %2683 = vst [vmem:[#allocation1 + $0x7] ss:$9 sm:$0xff] %v2188_v48 }
 0x319   :  { %v1232_v48 = vunpack.c.l.bf16 %v1164_v46 }
 0x31f   :  { %v2684_v60 = vld [vmem:[#allocation1] sm:$0xff] }
 0x320   :  { %2685 = vst [vmem:[#allocation1] ss:$9 sm:$0xff] %v3620_v51  ;;  %3106 = vperm.xlu2 %3570, %v2684_v60   ;;  %v1738_v51 = vpop.f32.mrf.mxu2 }
 0x321   :  { %2686 = vst [vmem:[#allocation1 + $0x1] ss:$9 sm:$0xff] %v2189_v55  ;;  %v4298_v55 = vadd.s32 4294967200, %v4200_v63  ;;  %v1859_v60 = vadd.f32 %v4108_v38, %v1738_v51 }
 0x322   :  { %2687 = vst [vmem:[#allocation1 + $0x2] ss:$9 sm:$0xff] %v2190_v57  ;;  %v2205_v57 = vrot.slane %v3624_v47, 3 }
 0x323   :  { %2688 = vst [vmem:[#allocation1 + $0x3] ss:$9 sm:$0xff] %v2191_v61  ;;  %v1296_v61 = vadd.f32 %v3968_v50, %v1232_v48  ;;  %v3273_v2 = vperm.slane %v3074_v0, %v4298_v55  ;;  %3625 = vtanh.f32 %v1859_v60 }
 0x324   :  { %2689 = vst [vmem:[#allocation1 + $0x4] ss:$9 sm:$0xff] %v2192_v5  ;;  %v2207_v5 = vrot.slane %v3624_v47, 5 }
 0x325   :  { %2690 = vst [vmem:[#allocation1 + $0x5] ss:$9 sm:$0xff] %v2193_v7  ;;  %v2208_v7 = vrot.slane %v3624_v47, 6  ;;  %v3275_v8 = vsel %vm3274_vm13, %v3273_v2, %v3271_v43 }
 0x326   :  { %2691 = vst [vmem:[#allocation1 + $0x6] ss:$9 sm:$0xff] %v2194_v12  ;;  %v1485_v12 = vmax.f32 %v1296_v61, 0.0 }
 0x327   :  { %2692 = vst [vmem:[#allocation1 + $0x7] ss:$9 sm:$0xff] %v2195_v16 }
 0x328   :  { %v1525_v14 = vpack.c.bf16 %v1486_v13, %v1485_v12  ;;  %v1741_v17 = vpop.f32.mrf.mxu2  ;;  %v4322_v12 = vadd.s32 4294967176, %v4200_v63 }
 0x329   :  { %v3626_v16 = vpop.eup %3625 }
 0x32a   :  { %3537 = vmatmul.msk.bf16.gmra.mxu2 %vm853_vm1, %v1525_v14  ;;  %v2210_v18 = vrot.slane %v3626_v16, 1  ;;  %v2211_v20 = vrot.slane %v3626_v16, 2  ;;  %v2212_v24 = vrot.slane %v3626_v16, 3  ;;  %v2213_v15 = vrot.slane %v3626_v16, 4 }
 0x32b   :  { %v2214_v28 = vrot.slane %v3626_v16, 5 }
 0x32e   :  { %v2693_v31 = vld [vmem:[#allocation1] sm:$0xff] }
 0x32f   :  { %2694 = vst [vmem:[#allocation1] ss:$9 sm:$0xff] %v3622_v11  ;;  %3109 = vperm.xlu0 %3568, %v2693_v31   ;;  %v1860_v11 = vadd.f32 %v4108_v38, %v1741_v17  ;;  %v2216_v31 = vrot.slane %v3626_v16, 7  ;;  %v3083_v17 = vpop.permute.xlu0 %3082 }
 0x330   :  { %2695 = vst [vmem:[#allocation1 + $0x1] ss:$9 sm:$0xff] %v2196_v29  ;;  %v2215_v29 = vrot.slane %v3626_v16, 6 }
 0x331   :  { %2696 = vst [vmem:[#allocation1 + $0x2] ss:$9 sm:$0xff] %v2197_v30  ;;  %v3279_v30 = vsel %vm3278_vm14, %v3277_v27, %v3275_v8  ;;  %3627 = vtanh.f32 %v1860_v11 }
 0x332   :  { %2697 = vst [vmem:[#allocation1 + $0x3] ss:$9 sm:$0xff] %v2198_v34  ;;  %v1079_v34 = vpop.f32.mrf.mxu3 }
 0x333   :  { %2698 = vst [vmem:[#allocation1 + $0x4] ss:$9 sm:$0xff] %v2199_v36  ;;  %v1743_v36 = vpop.f32.mrf.mxu2  ;;  %v1166_v21 = vpack.c.bf16 %v1079_v34, %v1079_v34 }
 0x334   :  { %2699 = vst [vmem:[#allocation1 + $0x5] ss:$9 sm:$0xff] %v2200_v37  ;;  %v3080_v37 = vpop.permute.xlu2 %3079 }
 0x335   :  { %2700 = vst [vmem:[#allocation1 + $0x6] ss:$9 sm:$0xff] %v2201_v40  ;;  %v3281_v48 = vperm.slane %v3080_v37, %v4313_v35  ;;  %v1234_v51 = vunpack.c.l.bf16 %v1166_v21  ;;  %v3086_v37 = vpop.permute.xlu1 %3085 }
 0x336   :  { %2701 = vst [vmem:[#allocation1 + $0x7] ss:$9 sm:$0xff] %v2202_v44 }
 0x337   :  { %v3628_v39 = vpop.eup %3627  ;;  %v1298_v61 = vadd.f32 %v3968_v50, %v1234_v51 }
 0x338   :  { %v2217_v40 = vrot.slane %v3628_v39, 1  ;;  %v2218_v43 = vrot.slane %v3628_v39, 2  ;;  %v2219_v46 = vrot.slane %v3628_v39, 3  ;;  %v2220_v49 = vrot.slane %v3628_v39, 4 }
 0x339   :  { %v2223_v60 = vrot.slane %v3628_v39, 7 }
 0x33a   :  { %v1081_v53 = vpop.f32.mrf.mxu3 }
 0x33d   :  { %v2702_v56 = vld [vmem:[#allocation1] sm:$0xff] }
 0x33e   :  { %2703 = vst [vmem:[#allocation1] ss:$9 sm:$0xff] %v3624_v47  ;;  %3112 = vperm.xlu1 %3569, %v2702_v56   ;;  %v1861_v47 = vadd.f32 %v4108_v38, %v1743_v36  ;;  %v1167_v56 = vpack.c.bf16 %v1081_v53, %v1081_v53 }
 0x33f   :  { %2704 = vst [vmem:[#allocation1 + $0x1] ss:$9 sm:$0xff] %v2203_v52  ;;  %v2221_v52 = vrot.slane %v3628_v39, 5 }
 0x340   :  { %2705 = vst [vmem:[#allocation1 + $0x2] ss:$9 sm:$0xff] %v2204_v54  ;;  %v2222_v54 = vrot.slane %v3628_v39, 6  ;;  %3629 = vtanh.f32 %v1861_v47  ;;  %v1235_v62 = vunpack.c.l.bf16 %v1167_v56 }
 0x341   :  { %2706 = vst [vmem:[#allocation1 + $0x3] ss:$9 sm:$0xff] %v2205_v57  ;;  %v3283_v57 = vsel %vm3282_vm15, %v3281_v48, %v3279_v30 }
 0x342   :  { %2707 = vst [vmem:[#allocation1 + $0x4] ss:$9 sm:$0xff] %v2206_v1  ;;  %v1299_v0 = vadd.f32 %v3968_v50, %v1235_v62  ;;  %v1487_v1 = vmax.f32 %v1298_v61, 0.0 }
 0x343   :  { %2708 = vst [vmem:[#allocation1 + $0x5] ss:$9 sm:$0xff] %v2207_v5 }
 0x344   :  { %2709 = vst [vmem:[#allocation1 + $0x6] ss:$9 sm:$0xff] %v2208_v7  ;;  %v1488_v2 = vmax.f32 %v1299_v0, 0.0  ;;  %v1746_v7 = vpop.f32.mrf.mxu2 }
 0x345   :  { %2710 = vst [vmem:[#allocation1 + $0x7] ss:$9 sm:$0xff] %v2209_v9 }
 0x346   :  { %v3630_v5 = vpop.eup %3629  ;;  %v1526_v6 = vpack.c.bf16 %v1488_v2, %v1487_v1 }
 0x347   :  { %v2224_v8 = vrot.slane %v3630_v5, 1  ;;  %v2225_v9 = vrot.slane %v3630_v5, 2  ;;  %v2226_v14 = vrot.slane %v3630_v5, 3  ;;  %v2230_v25 = vrot.slane %v3630_v5, 7 }
 0x348   :  { %3538 = vmatmul.msk.bf16.vlgmr.msra.gmra.mxu3 %vm853_vm1, %v1526_v6 }
 0x34c   :  { %v2711_v23 = vld [vmem:[#allocation1] sm:$0xff] }
 0x34d   :  { %2712 = vst [vmem:[#allocation1] ss:$9 sm:$0xff] %v3626_v16  ;;  %3115 = vperm.xlu2 %3570, %v2711_v23   ;;  %v1862_v16 = vadd.f32 %v4108_v38, %v1746_v7  ;;  %v2228_v23 = vrot.slane %v3630_v5, 5 }
 0x34e   :  { %2713 = vst [vmem:[#allocation1 + $0x1] ss:$9 sm:$0xff] %v2210_v18  ;;  %v2227_v18 = vrot.slane %v3630_v5, 4 }
 0x34f   :  { %2714 = vst [vmem:[#allocation1 + $0x2] ss:$9 sm:$0xff] %v2211_v20  ;;  %v3285_v20 = vperm.slane %v3083_v17, %v4322_v12  ;;  %3631 = vtanh.f32 %v1862_v16 }
 0x350   :  { %2715 = vst [vmem:[#allocation1 + $0x3] ss:$9 sm:$0xff] %v2212_v24  ;;  %v2229_v24 = vrot.slane %v3630_v5, 6 }
 0x351   :  { %2716 = vst [vmem:[#allocation1 + $0x4] ss:$9 sm:$0xff] %v2213_v15  ;;  %v4327_v11 = vsel %vm3286_vm0, %v3285_v20, %v3283_v57  ;;  %v1084_v15 = vpop.f32.mrf.mxu3 }
 0x352   :  { %2717 = vst [vmem:[#allocation1 + $0x5] ss:$9 sm:$0xff] %v2214_v28  ;;  %v1748_v28 = vpop.f32.mrf.mxu2 }
 0x353   :  { %2718 = vst [vmem:[#allocation1 + $0x6] ss:$9 sm:$0xff] %v2215_v29  ;;  %v1168_v29 = vpack.c.bf16 %v1084_v15, %v1084_v15  ;;  %v1863_v21 = vadd.f32 %v4108_v38, %v1748_v28 }
 0x354   :  { %2719 = vst [vmem:[#allocation1 + $0x7] ss:$9 sm:$0xff] %v2216_v31  ;;  %v3089_v31 = vpop.permute.xlu2 %3088 }
 0x355   :  { %v3632_v27 = vpop.eup %3631  ;;  %3633 = vtanh.f32 %v1863_v21 }
 0x356   :  { %v2231_v30 = vrot.slane %v3632_v27, 1  ;;  %v2232_v34 = vrot.slane %v3632_v27, 2  ;;  %v2233_v36 = vrot.slane %v3632_v27, 3  ;;  %v2235_v47 = vrot.slane %v3632_v27, 5 }
 0x357   :  { %v2237_v53 = vrot.slane %v3632_v27, 7 }
 0x359   :  { %v1086_v48 = vpop.f32.mrf.mxu3 }
 0x35a   :  { %v1751_v1 = vpop.f32.mrf.mxu2 }
 0x35b   :  { %v2720_v44 = vld [vmem:[#allocation1] sm:$0xff]  ;;  %v3634_v62 = vpop.eup %3633 }
 0x35c   :  { %2721 = vst [vmem:[#allocation1] ss:$9 sm:$0xff] %v3628_v39  ;;  %3118 = vperm.xlu0 %3568, %v2720_v44   ;;  %v1236_v44 = vunpack.c.l.bf16 %v1168_v29  ;;  %v2238_v2 = vrot.slane %v3634_v62, 1  ;;  %v2240_v7 = vrot.slane %v3634_v62, 3  ;;  %v2244_v16 = vrot.slane %v3634_v62, 7  ;;  %v3092_v29 = vpop.permute.xlu0 %3091 }
 0x35d   :  { %2722 = vst [vmem:[#allocation1 + $0x1] ss:$9 sm:$0xff] %v2217_v40  ;;  %v2234_v40 = vrot.slane %v3632_v27, 4 }
 0x35e   :  { %2723 = vst [vmem:[#allocation1 + $0x2] ss:$9 sm:$0xff] %v2218_v43  ;;  %v3289_v43 = vperm.slane %v3089_v31, %v4203_v3 }
 0x35f   :  { %2724 = vst [vmem:[#allocation1 + $0x3] ss:$9 sm:$0xff] %v2219_v46  ;;  %v3288_v46 = vperm.slane %v3086_v37, %v4200_v63 }
 0x360   :  { %2725 = vst [vmem:[#allocation1 + $0x4] ss:$9 sm:$0xff] %v2220_v49  ;;  %v2236_v49 = vrot.slane %v3632_v27, 6 }
 0x361   :  { %2726 = vst [vmem:[#allocation1 + $0x5] ss:$9 sm:$0xff] %v2221_v52  ;;  %v3290_v51 = vsel %vm3230_vm2, %v3289_v43, %v3288_v46  ;;  %v1169_v52 = vpack.c.bf16 %v1086_v48, %v1086_v48  ;;  %v1089_v17 = vpop.f32.mrf.mxu3 }
 0x362   :  { %2727 = vst [vmem:[#allocation1 + $0x6] ss:$9 sm:$0xff] %v2222_v54  ;;  %v1300_v54 = vadd.f32 %v3968_v50, %v1236_v44  ;;  %v1753_v20 = vpop.f32.mrf.mxu2 }
 0x363   :  { %2728 = vst [vmem:[#allocation1 + $0x7] ss:$9 sm:$0xff] %v2223_v60  ;;  %v1237_v56 = vunpack.c.l.bf16 %v1169_v52  ;;  %v1865_v28 = vadd.f32 %v4108_v38, %v1753_v20 }
 0x364   :  { %v1489_v60 = vmax.f32 %v1300_v54, 0.0 }
 0x365   :  { %v1301_v57 = vadd.f32 %v3968_v50, %v1237_v56 }
 0x367   :  { %v1490_v61 = vmax.f32 %v1301_v57, 0.0 }
 0x369   :  { %v1527_v0 = vpack.c.bf16 %v1490_v61, %v1489_v60 }
 0x36a   :  { %v2729_v13 = vld [vmem:[#allocation1] sm:$0xff]  ;;  %v1756_v54 = vpop.f32.mrf.mxu2 }
 0x36b   :  { %2730 = vst [vmem:[#allocation1] ss:$9 sm:$0xff] %v3630_v5  ;;  %3121 = vperm.xlu1 %3569, %v2729_v13   ;;  %3539 = vmatmul.msk.bf16.gmra.mxu3 %vm853_vm1, %v1527_v0  ;;  %v2239_v5 = vrot.slane %v3634_v62, 2  ;;  %v2242_v13 = vrot.slane %v3634_v62, 5  ;;  %v1866_v61 = vadd.f32 %v4108_v38, %v1756_v54 }
 0x36c   :  { %2731 = vst [vmem:[#allocation1 + $0x1] ss:$9 sm:$0xff] %v2224_v8  ;;  %v1864_v8 = vadd.f32 %v4108_v38, %v1751_v1 }
 0x36d   :  { %2732 = vst [vmem:[#allocation1 + $0x2] ss:$9 sm:$0xff] %v2225_v9  ;;  %v2241_v9 = vrot.slane %v3634_v62, 4 }
 0x36e   :  { %2733 = vst [vmem:[#allocation1 + $0x3] ss:$9 sm:$0xff] %v2226_v14  ;;  %v2243_v14 = vrot.slane %v3634_v62, 6  ;;  %3635 = vtanh.f32 %v1864_v8 }
 0x36f   :  { %2734 = vst [vmem:[#allocation1 + $0x4] ss:$9 sm:$0xff] %v2227_v18  ;;  %3637 = vtanh.f32 %v1865_v28 }
 0x370   :  { %2735 = vst [vmem:[#allocation1 + $0x5] ss:$9 sm:$0xff] %v2228_v23  ;;  %v1170_v23 = vpack.c.bf16 %v1089_v17, %v1089_v17  ;;  %3639 = vtanh.f32 %v1866_v61 }
 0x371   :  { %2736 = vst [vmem:[#allocation1 + $0x6] ss:$9 sm:$0xff] %v2229_v24 }
 0x372   :  { %2737 = vst [vmem:[#allocation1 + $0x7] ss:$9 sm:$0xff] %v2230_v25  ;;  %v1238_v31 = vunpack.c.l.bf16 %v1170_v23 }
 0x374   :  { %v3636_v18 = vpop.eup %3635  ;;  %v1302_v44 = vadd.f32 %v3968_v50, %v1238_v31 }
 0x375   :  { %v2245_v24 = vrot.slane %v3636_v18, 1  ;;  %v2246_v25 = vrot.slane %v3636_v18, 2  ;;  %v2250_v21 = vrot.slane %v3636_v18, 6  ;;  %v2251_v43 = vrot.slane %v3636_v18, 7  ;;  %v3638_v52 = vpop.eup %3637 }
 0x376   :  { %v1491_v48 = vmax.f32 %v1302_v44, 0.0  ;;  %v2252_v56 = vrot.slane %v3638_v52, 1  ;;  %v2254_v60 = vrot.slane %v3638_v52, 3  ;;  %v2255_v0 = vrot.slane %v3638_v52, 4 }
 0x379   :  { %v2738_v39 = vld [vmem:[#allocation1] sm:$0xff] }
 0x37a   :  { %2739 = vst [vmem:[#allocation1] ss:$9 sm:$0xff] %v3632_v27  ;;  %3124 = vperm.xlu2 %3570, %v2738_v39   ;;  %v2247_v27 = vrot.slane %v3636_v18, 3  ;;  %v2249_v39 = vrot.slane %v3636_v18, 5 }
 0x37b   :  { %2740 = vst [vmem:[#allocation1 + $0x1] ss:$9 sm:$0xff] %v2231_v30  ;;  %v2248_v30 = vrot.slane %v3636_v18, 4 }
 0x37c   :  { %2741 = vst [vmem:[#allocation1 + $0x2] ss:$9 sm:$0xff] %v2232_v34  ;;  %v3291_v34 = vperm.slane %v3092_v29, %v4211_v19 }
 0x37d   :  { %2742 = vst [vmem:[#allocation1 + $0x3] ss:$9 sm:$0xff] %v2233_v36  ;;  %v1091_v36 = vpop.f32.mrf.mxu3 }
 0x37e   :  { %2743 = vst [vmem:[#allocation1 + $0x4] ss:$9 sm:$0xff] %v2234_v40  ;;  %v3292_v37 = vsel %vm3234_vm3, %v3291_v34, %v3290_v51  ;;  %v1171_v40 = vpack.c.bf16 %v1091_v36, %v1091_v36  ;;  %v2253_v51 = vrot.slane %v3638_v52, 2 }
 0x37f   :  { %2744 = vst [vmem:[#allocation1 + $0x5] ss:$9 sm:$0xff] %v2235_v47 }
 0x380   :  { %2745 = vst [vmem:[#allocation1 + $0x6] ss:$9 sm:$0xff] %v2236_v49  ;;  %v1239_v46 = vunpack.c.l.bf16 %v1171_v40 }
 0x381   :  { %2746 = vst [vmem:[#allocation1 + $0x7] ss:$9 sm:$0xff] %v2237_v53 }
 0x382   :  { %v1303_v47 = vadd.f32 %v3968_v50, %v1239_v46 }
 0x384   :  { %v1492_v49 = vmax.f32 %v1303_v47, 0.0 }
 0x385   :  { %v1094_v8 = vpop.f32.mrf.mxu3 }
 0x386   :  { %v1528_v53 = vpack.c.bf16 %v1492_v49, %v1491_v48 }
 0x388   :  { %v2747_v6 = vld [vmem:[#allocation1] sm:$0xff]  ;;  %3540 = vmatmul.msk.bf16.gmra.mxu3 %vm853_vm1, %v1528_v53 }
 0x389   :  { %2748 = vst [vmem:[#allocation1] ss:$9 sm:$0xff] %v3634_v62  ;;  %3127 = vperm.xlu0 %3568, %v2747_v6   ;;  %v3095_v62 = vpop.permute.xlu1 %3094 }
 0x38a   :  { %2749 = vst [vmem:[#allocation1 + $0x1] ss:$9 sm:$0xff] %v2238_v2  ;;  %v3293_v1 = vperm.slane %v3095_v62, %v4224_v45  ;;  %v2256_v2 = vrot.slane %v3638_v52, 5 }
 0x38b   :  { %2750 = vst [vmem:[#allocation1 + $0x2] ss:$9 sm:$0xff] %v2239_v5  ;;  %v2257_v5 = vrot.slane %v3638_v52, 6 }
 0x38c   :  { %2751 = vst [vmem:[#allocation1 + $0x3] ss:$9 sm:$0xff] %v2240_v7  ;;  %v3294_v6 = vsel %vm3238_vm4, %v3293_v1, %v3292_v37  ;;  %v2258_v7 = vrot.slane %v3638_v52, 7 }
 0x38d   :  { %2752 = vst [vmem:[#allocation1 + $0x4] ss:$9 sm:$0xff] %v2241_v9  ;;  %v3640_v9 = vpop.eup %3639  ;;  %v1096_v29 = vpop.f32.mrf.mxu3 }
 0x38e   :  { %2753 = vst [vmem:[#allocation1 + $0x5] ss:$9 sm:$0xff] %v2242_v13  ;;  %v1758_v13 = vpop.f32.mrf.mxu2  ;;  %v2259_v17 = vrot.slane %v3640_v9, 1  ;;  %v2261_v23 = vrot.slane %v3640_v9, 3  ;;  %v2263_v28 = vrot.slane %v3640_v9, 5  ;;  %v1173_v31 = vpack.c.bf16 %v1096_v29, %v1096_v29 }
 0x38f   :  { %2754 = vst [vmem:[#allocation1 + $0x6] ss:$9 sm:$0xff] %v2243_v14  ;;  %v1172_v14 = vpack.c.bf16 %v1094_v8, %v1094_v8 }
 0x390   :  { %2755 = vst [vmem:[#allocation1 + $0x7] ss:$9 sm:$0xff] %v2244_v16  ;;  %v3098_v16 = vpop.permute.xlu2 %3097 }
 0x395   :  { %v1099_v1 = vpop.f32.mrf.mxu3 }
 0x396   :  { %v1761_v47 = vpop.f32.mrf.mxu2 }
 0x397   :  { %v2756_v15 = vld [vmem:[#allocation1] sm:$0xff]  ;;  %v1868_v54 = vadd.f32 %v4108_v38, %v1761_v47 }
 0x398   :  { %2757 = vst [vmem:[#allocation1] ss:$9 sm:$0xff] %v3636_v18  ;;  %3130 = vperm.xlu1 %3569, %v2756_v15   ;;  %v2260_v18 = vrot.slane %v3640_v9, 2  ;;  %v2262_v15 = vrot.slane %v3640_v9, 4 }
 0x399   :  { %2758 = vst [vmem:[#allocation1 + $0x1] ss:$9 sm:$0xff] %v2245_v24  ;;  %v1867_v24 = vadd.f32 %v4108_v38, %v1758_v13 }
 0x39a   :  { %2759 = vst [vmem:[#allocation1 + $0x2] ss:$9 sm:$0xff] %v2246_v25  ;;  %v3295_v25 = vperm.slane %v3098_v16, %v4221_v42  ;;  %v3104_v16 = vpop.permute.xlu1 %3103 }
 0x39b   :  { %2760 = vst [vmem:[#allocation1 + $0x3] ss:$9 sm:$0xff] %v2247_v27  ;;  %v1240_v27 = vunpack.c.l.bf16 %v1172_v14  ;;  %3641 = vtanh.f32 %v1867_v24 }
 0x39c   :  { %2761 = vst [vmem:[#allocation1 + $0x4] ss:$9 sm:$0xff] %v2248_v30  ;;  %v2264_v30 = vrot.slane %v3640_v9, 6  ;;  %v3296_v34 = vsel %vm3242_vm5, %v3295_v25, %v3294_v6  ;;  %3643 = vtanh.f32 %v1868_v54  ;;  %v1174_v6 = vpack.c.bf16 %v1099_v1, %v1099_v1 }
 0x39d   :  { %2762 = vst [vmem:[#allocation1 + $0x5] ss:$9 sm:$0xff] %v2249_v39  ;;  %v2265_v39 = vrot.slane %v3640_v9, 7  ;;  %v1304_v36 = vadd.f32 %v3968_v50, %v1240_v27  ;;  %v1101_v24 = vpop.f32.mrf.mxu3 }
 0x39e   :  { %2763 = vst [vmem:[#allocation1 + $0x6] ss:$9 sm:$0xff] %v2250_v21  ;;  %v1241_v21 = vunpack.c.l.bf16 %v1173_v31  ;;  %v1175_v27 = vpack.c.bf16 %v1101_v24, %v1101_v24 }
 0x39f   :  { %2764 = vst [vmem:[#allocation1 + $0x7] ss:$9 sm:$0xff] %v2251_v43  ;;  %v1493_v40 = vmax.f32 %v1304_v36, 0.0 }
 0x3a0   :  { %v1305_v37 = vadd.f32 %v3968_v50, %v1241_v21 }
 0x3a1   :  { %v3642_v44 = vpop.eup %3641 }
 0x3a2   :  { %v1494_v43 = vmax.f32 %v1305_v37, 0.0  ;;  %v2266_v48 = vrot.slane %v3642_v44, 1  ;;  %v2267_v49 = vrot.slane %v3642_v44, 2  ;;  %v2268_v53 = vrot.slane %v3642_v44, 3 }
 0x3a3   :  { %v2271_v61 = vrot.slane %v3642_v44, 6 }
 0x3a4   :  { %v1529_v46 = vpack.c.bf16 %v1494_v43, %v1493_v40  ;;  %v3107_v40 = vpop.permute.xlu2 %3106 }
 0x3a6   :  { %v2765_v57 = vld [vmem:[#allocation1] sm:$0xff]  ;;  %3541 = vmatmul.msk.bf16.gmra.mxu3 %vm853_vm1, %v1529_v46 }
 0x3a7   :  { %2766 = vst [vmem:[#allocation1] ss:$9 sm:$0xff] %v3638_v52  ;;  %3133 = vperm.xlu2 %3570, %v2765_v57  }
 0x3a8   :  { %2767 = vst [vmem:[#allocation1 + $0x1] ss:$9 sm:$0xff] %v2252_v56  ;;  %v3101_v56 = vpop.permute.xlu0 %3100 }
 0x3a9   :  { %2768 = vst [vmem:[#allocation1 + $0x2] ss:$9 sm:$0xff] %v2253_v51  ;;  %v2269_v51 = vrot.slane %v3642_v44, 4  ;;  %v3297_v57 = vperm.slane %v3101_v56, %v4237_v32 }
 0x3aa   :  { %2769 = vst [vmem:[#allocation1 + $0x3] ss:$9 sm:$0xff] %v2254_v60  ;;  %v2270_v60 = vrot.slane %v3642_v44, 5 }
 0x3ab   :  { %2770 = vst [vmem:[#allocation1 + $0x4] ss:$9 sm:$0xff] %v2255_v0  ;;  %v3298_v62 = vsel %vm3246_vm6, %v3297_v57, %v3296_v34  ;;  %v2272_v0 = vrot.slane %v3642_v44, 7  ;;  %v1104_v57 = vpop.f32.mrf.mxu3 }
 0x3ac   :  { %2771 = vst [vmem:[#allocation1 + $0x5] ss:$9 sm:$0xff] %v2256_v2  ;;  %v3644_v2 = vpop.eup %3643 }
 0x3ad   :  { %2772 = vst [vmem:[#allocation1 + $0x6] ss:$9 sm:$0xff] %v2257_v5  ;;  %v1763_v5 = vpop.f32.mrf.mxu2  ;;  %v2274_v8 = vrot.slane %v3644_v2, 2  ;;  %v2275_v13 = vrot.slane %v3644_v2, 3  ;;  %v2278_v25 = vrot.slane %v3644_v2, 6 }
 0x3ae   :  { %2773 = vst [vmem:[#allocation1 + $0x7] ss:$9 sm:$0xff] %v2258_v7  ;;  %v2273_v7 = vrot.slane %v3644_v2, 1  ;;  %v1869_v14 = vadd.f32 %v4108_v38, %v1763_v5 }
 0x3b0   :  { %3645 = vtanh.f32 %v1869_v14 }
 0x3b5   :  { %v2774_v20 = vld [vmem:[#allocation1] sm:$0xff]  ;;  %v1766_v37 = vpop.f32.mrf.mxu2 }
 0x3b6   :  { %2775 = vst [vmem:[#allocation1] ss:$9 sm:$0xff] %v3640_v9  ;;  %3136 = vperm.xlu0 %3568, %v2774_v20   ;;  %v3299_v20 = vperm.slane %v3104_v16, %v4248_v10  ;;  %v3646_v36 = vpop.eup %3645  ;;  %v1106_v16 = vpop.f32.mrf.mxu3 }
 0x3b7   :  { %2776 = vst [vmem:[#allocation1 + $0x1] ss:$9 sm:$0xff] %v2259_v17  ;;  %v2276_v17 = vrot.slane %v3644_v2, 4  ;;  %v2280_v43 = vrot.slane %v3646_v36, 1  ;;  %v2282_v47 = vrot.slane %v3646_v36, 3  ;;  %v2285_v54 = vrot.slane %v3646_v36, 6 }
 0x3b8   :  { %2777 = vst [vmem:[#allocation1 + $0x2] ss:$9 sm:$0xff] %v2260_v18  ;;  %v1242_v18 = vunpack.c.l.bf16 %v1174_v6 }
 0x3b9   :  { %2778 = vst [vmem:[#allocation1 + $0x3] ss:$9 sm:$0xff] %v2261_v23  ;;  %v2277_v23 = vrot.slane %v3644_v2, 5 }
 0x3ba   :  { %2779 = vst [vmem:[#allocation1 + $0x4] ss:$9 sm:$0xff] %v2262_v15  ;;  %v3300_v15 = vsel %vm3250_vm7, %v3299_v20, %v3298_v62  ;;  %v1306_v29 = vadd.f32 %v3968_v50, %v1242_v18  ;;  %v1176_v62 = vpack.c.bf16 %v1104_v57, %v1104_v57  ;;  %v1177_v20 = vpack.c.bf16 %v1106_v16, %v1106_v16 }
 0x3bb   :  { %2780 = vst [vmem:[#allocation1 + $0x5] ss:$9 sm:$0xff] %v2263_v28  ;;  %v2279_v28 = vrot.slane %v3644_v2, 7 }
 0x3bc   :  { %2781 = vst [vmem:[#allocation1 + $0x6] ss:$9 sm:$0xff] %v2264_v30  ;;  %v1243_v30 = vunpack.c.l.bf16 %v1175_v27  ;;  %v1495_v34 = vmax.f32 %v1306_v29, 0.0 }
 0x3bd   :  { %2782 = vst [vmem:[#allocation1 + $0x7] ss:$9 sm:$0xff] %v2265_v39 }
 0x3be   :  { %v1307_v31 = vadd.f32 %v3968_v50, %v1243_v30 }
 0x3c0   :  { %v1496_v39 = vmax.f32 %v1307_v31, 0.0 }
 0x3c2   :  { %v1530_v21 = vpack.c.bf16 %v1496_v39, %v1495_v34 }
 0x3c4   :  { %v2783_v52 = vld [vmem:[#allocation1] sm:$0xff]  ;;  %3542 = vmatmul.msk.bf16.gmra.mxu3 %vm853_vm1, %v1530_v21 }
 0x3c5   :  { %2784 = vst [vmem:[#allocation1] ss:$9 sm:$0xff] %v3642_v44  ;;  %3139 = vperm.xlu1 %3569, %v2783_v52   ;;  %v2281_v44 = vrot.slane %v3646_v36, 2  ;;  %v2283_v52 = vrot.slane %v3646_v36, 4 }
 0x3c6   :  { %2785 = vst [vmem:[#allocation1 + $0x1] ss:$9 sm:$0xff] %v2266_v48  ;;  %v1870_v48 = vadd.f32 %v4108_v38, %v1766_v37 }
 0x3c7   :  { %2786 = vst [vmem:[#allocation1 + $0x2] ss:$9 sm:$0xff] %v2267_v49  ;;  %v3301_v49 = vperm.slane %v3107_v40, %v4258_v41  ;;  %v3113_v40 = vpop.permute.xlu1 %3112 }
 0x3c8   :  { %2787 = vst [vmem:[#allocation1 + $0x3] ss:$9 sm:$0xff] %v2268_v53  ;;  %v2284_v53 = vrot.slane %v3646_v36, 5  ;;  %3647 = vtanh.f32 %v1870_v48 }
 0x3c9   :  { %2788 = vst [vmem:[#allocation1 + $0x4] ss:$9 sm:$0xff] %v2269_v51  ;;  %v3302_v56 = vsel %vm3254_vm8, %v3301_v49, %v3300_v15  ;;  %v2286_v51 = vrot.slane %v3646_v36, 7 }
 0x3ca   :  { %2789 = vst [vmem:[#allocation1 + $0x5] ss:$9 sm:$0xff] %v2270_v60 }
 0x3cb   :  { %2790 = vst [vmem:[#allocation1 + $0x6] ss:$9 sm:$0xff] %v2271_v61  ;;  %v1768_v61 = vpop.f32.mrf.mxu2 }
 0x3cc   :  { %2791 = vst [vmem:[#allocation1 + $0x7] ss:$9 sm:$0xff] %v2272_v0  ;;  %v1871_v6 = vadd.f32 %v4108_v38, %v1768_v61 }
 0x3ce   :  { %v3648_v60 = vpop.eup %3647  ;;  %3649 = vtanh.f32 %v1871_v6 }
 0x3cf   :  { %v2287_v0 = vrot.slane %v3648_v60, 1  ;;  %v2288_v1 = vrot.slane %v3648_v60, 2  ;;  %v2289_v5 = vrot.slane %v3648_v60, 3  ;;  %v2291_v14 = vrot.slane %v3648_v60, 5 }
 0x3d3   :  { %v2792_v9 = vld [vmem:[#allocation1] sm:$0xff]  ;;  %v1771_v31 = vpop.f32.mrf.mxu2 }
 0x3d4   :  { %2793 = vst [vmem:[#allocation1] ss:$9 sm:$0xff] %v3644_v2  ;;  %3142 = vperm.xlu2 %3570, %v2792_v9   ;;  %v1244_v9 = vunpack.c.l.bf16 %v1176_v62  ;;  %v3650_v29 = vpop.eup %3649  ;;  %v1872_v37 = vadd.f32 %v4108_v38, %v1771_v31 }
 0x3d5   :  { %2794 = vst [vmem:[#allocation1 + $0x1] ss:$9 sm:$0xff] %v2273_v7  ;;  %v3110_v7 = vpop.permute.xlu0 %3109  ;;  %v2294_v34 = vrot.slane %v3650_v29, 1  ;;  %v2295_v39 = vrot.slane %v3650_v29, 2  ;;  %v2296_v21 = vrot.slane %v3650_v29, 3  ;;  %v2300_v49 = vrot.slane %v3650_v29, 7 }
 0x3d6   :  { %2795 = vst [vmem:[#allocation1 + $0x2] ss:$9 sm:$0xff] %v2274_v8  ;;  %v2290_v8 = vrot.slane %v3648_v60, 4  ;;  %v1308_v24 = vadd.f32 %v3968_v50, %v1244_v9  ;;  %3651 = vtanh.f32 %v1872_v37 }
 0x3d7   :  { %2796 = vst [vmem:[#allocation1 + $0x3] ss:$9 sm:$0xff] %v2275_v13  ;;  %v3303_v13 = vperm.slane %v3110_v7, %v4266_v4 }
 0x3d8   :  { %2797 = vst [vmem:[#allocation1 + $0x4] ss:$9 sm:$0xff] %v2276_v17  ;;  %v2292_v17 = vrot.slane %v3648_v60, 6  ;;  %v1497_v27 = vmax.f32 %v1308_v24, 0.0 }
 0x3d9   :  { %2798 = vst [vmem:[#allocation1 + $0x5] ss:$9 sm:$0xff] %v2277_v23  ;;  %v3304_v18 = vsel %vm3258_vm9, %v3303_v13, %v3302_v56  ;;  %v2293_v23 = vrot.slane %v3648_v60, 7 }
 0x3da   :  { %2799 = vst [vmem:[#allocation1 + $0x6] ss:$9 sm:$0xff] %v2278_v25  ;;  %v1245_v25 = vunpack.c.l.bf16 %v1177_v20 }
 0x3db   :  { %2800 = vst [vmem:[#allocation1 + $0x7] ss:$9 sm:$0xff] %v2279_v28 }
 0x3dc   :  { %v1309_v15 = vadd.f32 %v3968_v50, %v1245_v25 }
 0x3de   :  { %v1498_v28 = vmax.f32 %v1309_v15, 0.0 }
 0x3e0   :  { %v1531_v30 = vpack.c.bf16 %v1498_v28, %v1497_v27 }
 0x3e2   :  { %v2801_v46 = vld [vmem:[#allocation1] sm:$0xff]  ;;  %3543 = vmatmul.msk.bf16.gmra.mxu3 %vm853_vm1, %v1531_v30 }
 0x3e3   :  { %2802 = vst [vmem:[#allocation1] ss:$9 sm:$0xff] %v3646_v36  ;;  %3145 = vperm.xlu0 %3568, %v2801_v46   ;;  %v2298_v46 = vrot.slane %v3650_v29, 5 }
 0x3e4   :  { %2803 = vst [vmem:[#allocation1 + $0x1] ss:$9 sm:$0xff] %v2280_v43  ;;  %v2297_v43 = vrot.slane %v3650_v29, 4 }
 0x3e5   :  { %2804 = vst [vmem:[#allocation1 + $0x2] ss:$9 sm:$0xff] %v2281_v44  ;;  %v3305_v44 = vperm.slane %v3113_v40, %v4275_v33 }
 0x3e6   :  { %2805 = vst [vmem:[#allocation1 + $0x3] ss:$9 sm:$0xff] %v2282_v47  ;;  %v2299_v47 = vrot.slane %v3650_v29, 6 }
 0x3e7   :  { %2806 = vst [vmem:[#allocation1 + $0x4] ss:$9 sm:$0xff] %v2283_v52  ;;  %v3306_v48 = vsel %vm3262_vm10, %v3305_v44, %v3304_v18  ;;  %v1109_v52 = vpop.f32.mrf.mxu3 }
 0x3e8   :  { %2807 = vst [vmem:[#allocation1 + $0x5] ss:$9 sm:$0xff] %v2284_v53  ;;  %v3652_v53 = vpop.eup %3651  ;;  %v1178_v56 = vpack.c.bf16 %v1109_v52, %v1109_v52 }
 0x3e9   :  { %2808 = vst [vmem:[#allocation1 + $0x6] ss:$9 sm:$0xff] %v2285_v54  ;;  %v1773_v54 = vpop.f32.mrf.mxu2  ;;  %v2301_v57 = vrot.slane %v3652_v53, 1  ;;  %v2303_v62 = vrot.slane %v3652_v53, 3  ;;  %v2305_v6 = vrot.slane %v3652_v53, 5 }
 0x3ea   :  { %2809 = vst [vmem:[#allocation1 + $0x7] ss:$9 sm:$0xff] %v2286_v51  ;;  %v3116_v51 = vpop.permute.xlu2 %3115 }
 0x3ef   :  { %v1111_v7 = vpop.f32.mrf.mxu3 }
 0x3f0   :  { %v1179_v9 = vpack.c.bf16 %v1111_v7, %v1111_v7 }
 0x3f1   :  { %v2810_v2 = vld [vmem:[#allocation1] sm:$0xff]  ;;  %v1776_v15 = vpop.f32.mrf.mxu2 }
 0x3f2   :  { %2811 = vst [vmem:[#allocation1] ss:$9 sm:$0xff] %v3648_v60  ;;  %3148 = vperm.xlu1 %3569, %v2810_v2   ;;  %v2302_v60 = vrot.slane %v3652_v53, 2  ;;  %v2304_v2 = vrot.slane %v3652_v53, 4  ;;  %v1874_v31 = vadd.f32 %v4108_v38, %v1776_v15 }
 0x3f3   :  { %2812 = vst [vmem:[#allocation1 + $0x1] ss:$9 sm:$0xff] %v2287_v0  ;;  %v1873_v0 = vadd.f32 %v4108_v38, %v1773_v54  ;;  %v3122_v54 = vpop.permute.xlu1 %3121 }
 0x3f4   :  { %2813 = vst [vmem:[#allocation1 + $0x2] ss:$9 sm:$0xff] %v2288_v1  ;;  %v3307_v1 = vperm.slane %v3116_v51, %v4281_v58 }
 0x3f5   :  { %2814 = vst [vmem:[#allocation1 + $0x3] ss:$9 sm:$0xff] %v2289_v5  ;;  %v1246_v5 = vunpack.c.l.bf16 %v1178_v56  ;;  %3653 = vtanh.f32 %v1873_v0 }
 0x3f6   :  { %2815 = vst [vmem:[#allocation1 + $0x4] ss:$9 sm:$0xff] %v2290_v8  ;;  %v2306_v8 = vrot.slane %v3652_v53, 6  ;;  %v3308_v13 = vsel %vm3266_vm11, %v3307_v1, %v3306_v48  ;;  %3655 = vtanh.f32 %v1874_v31 }
 0x3f7   :  { %2816 = vst [vmem:[#allocation1 + $0x5] ss:$9 sm:$0xff] %v2291_v14  ;;  %v2307_v14 = vrot.slane %v3652_v53, 7  ;;  %v1310_v16 = vadd.f32 %v3968_v50, %v1246_v5  ;;  %v1114_v56 = vpop.f32.mrf.mxu3 }
 0x3f8   :  { %2817 = vst [vmem:[#allocation1 + $0x6] ss:$9 sm:$0xff] %v2292_v17  ;;  %v1247_v17 = vunpack.c.l.bf16 %v1179_v9  ;;  %v1180_v0 = vpack.c.bf16 %v1114_v56, %v1114_v56 }
 0x3f9   :  { %2818 = vst [vmem:[#allocation1 + $0x7] ss:$9 sm:$0xff] %v2293_v23  ;;  %v1499_v20 = vmax.f32 %v1310_v16, 0.0 }
 0x3fa   :  { %v1311_v18 = vadd.f32 %v3968_v50, %v1247_v17 }
 0x3fb   :  { %v3654_v24 = vpop.eup %3653 }
 0x3fc   :  { %v1500_v23 = vmax.f32 %v1311_v18, 0.0  ;;  %v2308_v27 = vrot.slane %v3654_v24, 1  ;;  %v2309_v28 = vrot.slane %v3654_v24, 2  ;;  %v2310_v30 = vrot.slane %v3654_v24, 3  ;;  %v3656_v44 = vpop.eup %3655 }
 0x3fd   :  { %v2313_v37 = vrot.slane %v3654_v24, 6  ;;  %v2316_v48 = vrot.slane %v3656_v44, 2  ;;  %v2317_v52 = vrot.slane %v3656_v44, 3  ;;  %v2318_v51 = vrot.slane %v3656_v44, 4 }
 0x3fe   :  { %v1532_v25 = vpack.c.bf16 %v1500_v23, %v1499_v20  ;;  %v2321_v1 = vrot.slane %v3656_v44, 7 }
 0x400   :  { %v2819_v36 = vld [vmem:[#allocation1] sm:$0xff]  ;;  %3544 = vmatmul.msk.bf16.gmra.mxu3 %vm853_vm1, %v1532_v25 }
 0x401   :  { %2820 = vst [vmem:[#allocation1] ss:$9 sm:$0xff] %v3650_v29  ;;  %3151 = vperm.xlu2 %3570, %v2819_v36  }
 0x402   :  { %2821 = vst [vmem:[#allocation1 + $0x1] ss:$9 sm:$0xff] %v2294_v34  ;;  %v3119_v34 = vpop.permute.xlu0 %3118 }
 0x403   :  { %2822 = vst [vmem:[#allocation1 + $0x2] ss:$9 sm:$0xff] %v2295_v39  ;;  %v2311_v39 = vrot.slane %v3654_v24, 4  ;;  %v3309_v36 = vperm.slane %v3119_v34, %v4291_v26 }
 0x404   :  { %2823 = vst [vmem:[#allocation1 + $0x3] ss:$9 sm:$0xff] %v2296_v21  ;;  %v2312_v21 = vrot.slane %v3654_v24, 5 }
 0x405   :  { %2824 = vst [vmem:[#allocation1 + $0x4] ss:$9 sm:$0xff] %v2297_v43  ;;  %v3310_v40 = vsel %vm3270_vm12, %v3309_v36, %v3308_v13  ;;  %v2314_v43 = vrot.slane %v3654_v24, 7 }
 0x406   :  { %2825 = vst [vmem:[#allocation1 + $0x5] ss:$9 sm:$0xff] %v2298_v46  ;;  %v1778_v46 = vpop.f32.mrf.mxu2 }
 0x407   :  { %2826 = vst [vmem:[#allocation1 + $0x6] ss:$9 sm:$0xff] %v2299_v47  ;;  %v2315_v47 = vrot.slane %v3656_v44, 1 }
 0x408   :  { %2827 = vst [vmem:[#allocation1 + $0x7] ss:$9 sm:$0xff] %v2300_v49 }
 0x40e   :  { %v1781_v13 = vpop.f32.mrf.mxu2 }
 0x40f   :  { %v2828_v61 = vld [vmem:[#allocation1] sm:$0xff]  ;;  %v1876_v23 = vadd.f32 %v4108_v38, %v1781_v13 }
 0x410   :  { %2829 = vst [vmem:[#allocation1] ss:$9 sm:$0xff] %v3652_v53  ;;  %3154 = vperm.xlu0 %3568, %v2828_v61   ;;  %v1875_v53 = vadd.f32 %v4108_v38, %v1778_v46  ;;  %v2320_v61 = vrot.slane %v3656_v44, 6 }
 0x411   :  { %2830 = vst [vmem:[#allocation1 + $0x1] ss:$9 sm:$0xff] %v2301_v57  ;;  %v3311_v57 = vperm.slane %v3122_v54, %v4298_v55 }
 0x412   :  { %2831 = vst [vmem:[#allocation1 + $0x2] ss:$9 sm:$0xff] %v2302_v60  ;;  %v2319_v60 = vrot.slane %v3656_v44, 5  ;;  %3657 = vtanh.f32 %v1875_v53 }
 0x413   :  { %2832 = vst [vmem:[#allocation1 + $0x3] ss:$9 sm:$0xff] %v2303_v62  ;;  %v3312_v62 = vsel %vm3274_vm13, %v3311_v57, %v3310_v40  ;;  %3659 = vtanh.f32 %v1876_v23 }
 0x414   :  { %2833 = vst [vmem:[#allocation1 + $0x4] ss:$9 sm:$0xff] %v2304_v2  ;;  %v1248_v2 = vunpack.c.l.bf16 %v1180_v0 }
 0x415   :  { %2834 = vst [vmem:[#allocation1 + $0x5] ss:$9 sm:$0xff] %v2305_v6  ;;  %v1116_v6 = vpop.f32.mrf.mxu3 }
 0x416   :  { %2835 = vst [vmem:[#allocation1 + $0x6] ss:$9 sm:$0xff] %v2306_v8  ;;  %v1312_v5 = vadd.f32 %v3968_v50, %v1248_v2 }
 0x417   :  { %2836 = vst [vmem:[#allocation1 + $0x7] ss:$9 sm:$0xff] %v2307_v14  ;;  %v3125_v14 = vpop.permute.xlu2 %3124 }
 0x418   :  { %v1501_v7 = vmax.f32 %v1312_v5, 0.0  ;;  %v3658_v8 = vpop.eup %3657 }
 0x419   :  { %v2322_v16 = vrot.slane %v3658_v8, 1  ;;  %v2323_v17 = vrot.slane %v3658_v8, 2  ;;  %v2324_v20 = vrot.slane %v3658_v8, 3  ;;  %v2325_v25 = vrot.slane %v3658_v8, 4 }
 0x41a   :  { %v1533_v9 = vpack.c.bf16 %v1501_v7, %v1501_v7  ;;  %v2326_v50 = vrot.slane %v3658_v8, 5  ;;  %v2327_v15 = vrot.slane %v3658_v8, 6 }
 0x41c   :  { %3545 = vmatmul.msk.bf16.gmra.mxu3 %vm853_vm1, %v1533_v9  ;;  %vm3382_vm1 = vcmask 1040384  }
 0x41e   :  { %v2837_v29 = vld [vmem:[#allocation1] sm:$0xff] }
 0x41f   :  { %2838 = vst [vmem:[#allocation1] ss:$9 sm:$0xff] %v3654_v24  ;;  %3157 = vperm.xlu1 %3569, %v2837_v29   ;;  %v3313_v24 = vperm.slane %v3125_v14, %v4307_v22  ;;  %v3660_v29 = vpop.eup %3659 }
 0x420   :  { %2839 = vst [vmem:[#allocation1 + $0x1] ss:$9 sm:$0xff] %v2308_v27  ;;  %v2329_v31 = vrot.slane %v3660_v29, 1  ;;  %v2330_v34 = vrot.slane %v3660_v29, 2  ;;  %v2331_v36 = vrot.slane %v3660_v29, 3  ;;  %v2332_v40 = vrot.slane %v3660_v29, 4 }
 0x421   :  { %2840 = vst [vmem:[#allocation1 + $0x2] ss:$9 sm:$0xff] %v2309_v28  ;;  %v3314_v27 = vsel %vm3278_vm14, %v3313_v24, %v3312_v62  ;;  %v2328_v28 = vrot.slane %v3658_v8, 7  ;;  %v2334_v46 = vrot.slane %v3660_v29, 6 }
 0x422   :  { %2841 = vst [vmem:[#allocation1 + $0x3] ss:$9 sm:$0xff] %v2310_v30  ;;  %v1783_v30 = vpop.f32.mrf.mxu2 }
 0x423   :  { %2842 = vst [vmem:[#allocation1 + $0x4] ss:$9 sm:$0xff] %v2311_v39 }
 0x424   :  { %2843 = vst [vmem:[#allocation1 + $0x5] ss:$9 sm:$0xff] %v2312_v21  ;;  %v1877_v21 = vadd.f32 %v4108_v38, %v1783_v30 }
 0x425   :  { %2844 = vst [vmem:[#allocation1 + $0x6] ss:$9 sm:$0xff] %v2313_v37  ;;  %v3128_v37 = vpop.permute.xlu0 %3127 }
 0x426   :  { %2845 = vst [vmem:[#allocation1 + $0x7] ss:$9 sm:$0xff] %v2314_v43  ;;  %v3315_v43 = vperm.slane %v3128_v37, %v4313_v35  ;;  %3661 = vtanh.f32 %v1877_v21 }
 0x42d   :  { %v2846_v49 = vld [vmem:[#allocation1] sm:$0xff] }
 0x42e   :  { %2847 = vst [vmem:[#allocation1] ss:$9 sm:$0xff] %v3656_v44  ;;  %3160 = vperm.xlu2 %3570, %v2846_v49   ;;  %v2333_v44 = vrot.slane %v3660_v29, 5  ;;  %v3662_v49 = vpop.eup %3661 }
 0x42f   :  { %2848 = vst [vmem:[#allocation1 + $0x1] ss:$9 sm:$0xff] %v2315_v47  ;;  %v3316_v47 = vsel %vm3282_vm15, %v3315_v43, %v3314_v27  ;;  %v2336_v53 = vrot.slane %v3662_v49, 1  ;;  %v2337_v54 = vrot.slane %v3662_v49, 2  ;;  %v2340_v0 = vrot.slane %v3662_v49, 5 }
 0x430   :  { %2849 = vst [vmem:[#allocation1 + $0x2] ss:$9 sm:$0xff] %v2316_v48  ;;  %v2335_v48 = vrot.slane %v3660_v29, 7  ;;  %v2342_v5 = vrot.slane %v3662_v49, 7 }
 0x431   :  { %2850 = vst [vmem:[#allocation1 + $0x3] ss:$9 sm:$0xff] %v2317_v52  ;;  %v1786_v52 = vpop.f32.mrf.mxu2 }
 0x432   :  { %2851 = vst [vmem:[#allocation1 + $0x4] ss:$9 sm:$0xff] %v2318_v51  ;;  %v2338_v51 = vrot.slane %v3662_v49, 3  ;;  %v1878_v57 = vadd.f32 %v4108_v38, %v1786_v52 }
 0x433   :  { %2852 = vst [vmem:[#allocation1 + $0x5] ss:$9 sm:$0xff] %v2319_v60  ;;  %v3131_v60 = vpop.permute.xlu1 %3130 }
 0x434   :  { %2853 = vst [vmem:[#allocation1 + $0x6] ss:$9 sm:$0xff] %v2320_v61  ;;  %v2339_v61 = vrot.slane %v3662_v49, 4  ;;  %v3317_v62 = vperm.slane %v3131_v60, %v4322_v12  ;;  %3663 = vtanh.f32 %v1878_v57 }
 0x435   :  { %2854 = vst [vmem:[#allocation1 + $0x7] ss:$9 sm:$0xff] %v2321_v1  ;;  %v2341_v1 = vrot.slane %v3662_v49, 6 }
 0x436   :  { %v4396_v2 = vsel %vm3286_vm0, %v3317_v62, %v3316_v47 }
 0x439   :  { %v1788_v7 = vpop.f32.mrf.mxu2 }
 0x43a   :  { %v3664_v6 = vpop.eup %3663 }
 0x43b   :  { %v2344_v9 = vrot.slane %v3664_v6, 2  ;;  %v2345_v14 = vrot.slane %v3664_v6, 3  ;;  %v2349_v23 = vrot.slane %v3664_v6, 7 }
 0x43c   :  { %v2855_v18 = vld [vmem:[#allocation1] sm:$0xff] }
 0x43d   :  { %2856 = vst [vmem:[#allocation1] ss:$9 sm:$0xff] %v3658_v8  ;;  %3163 = vperm.xlu0 %3568, %v2855_v18   ;;  %v2343_v8 = vrot.slane %v3664_v6, 1  ;;  %v2347_v18 = vrot.slane %v3664_v6, 5 }
 0x43e   :  { %2857 = vst [vmem:[#allocation1 + $0x1] ss:$9 sm:$0xff] %v2322_v16  ;;  %v1879_v16 = vadd.f32 %v4108_v38, %v1788_v7 }
 0x43f   :  { %2858 = vst [vmem:[#allocation1 + $0x2] ss:$9 sm:$0xff] %v2323_v17  ;;  %v2346_v17 = vrot.slane %v3664_v6, 4 }
 0x440   :  { %2859 = vst [vmem:[#allocation1 + $0x3] ss:$9 sm:$0xff] %v2324_v20  ;;  %v2348_v20 = vrot.slane %v3664_v6, 6  ;;  %3665 = vtanh.f32 %v1879_v16 }
 0x441   :  { %2860 = vst [vmem:[#allocation1 + $0x4] ss:$9 sm:$0xff] %v2325_v25  ;;  %v1791_v25 = vpop.f32.mrf.mxu3 }
 0x442   :  { %2861 = vst [vmem:[#allocation1 + $0x5] ss:$9 sm:$0xff] %v2326_v50 }
 0x443   :  { %2862 = vst [vmem:[#allocation1 + $0x6] ss:$9 sm:$0xff] %v2327_v15 }
 0x444   :  { %2863 = vst [vmem:[#allocation1 + $0x7] ss:$9 sm:$0xff] %v2328_v28 }
 0x446   :  { %v3666_v24 = vpop.eup %3665 }
 0x447   :  { %v2350_v50 = vrot.slane %v3666_v24, 1  ;;  %v2351_v15 = vrot.slane %v3666_v24, 2  ;;  %v2352_v28 = vrot.slane %v3666_v24, 3  ;;  %v2353_v30 = vrot.slane %v3666_v24, 4 }
 0x449   :  { %v1793_v21 = vpop.f32.mrf.mxu3 }
 0x44b   :  { %v2864_v39 = vld [vmem:[#allocation1] sm:$0xff] }
 0x44c   :  { %2865 = vst [vmem:[#allocation1] ss:$9 sm:$0xff] %v3660_v29  ;;  %3166 = vperm.xlu1 %3569, %v2864_v39   ;;  %v1880_v29 = vadd.f32 %v4108_v38, %v1791_v25  ;;  %v2356_v39 = vrot.slane %v3666_v24, 7 }
 0x44d   :  { %2866 = vst [vmem:[#allocation1 + $0x1] ss:$9 sm:$0xff] %v2329_v31  ;;  %v2354_v31 = vrot.slane %v3666_v24, 5 }
 0x44e   :  { %2867 = vst [vmem:[#allocation1 + $0x2] ss:$9 sm:$0xff] %v2330_v34  ;;  %v2355_v34 = vrot.slane %v3666_v24, 6  ;;  %3667 = vtanh.f32 %v1880_v29 }
 0x44f   :  { %2868 = vst [vmem:[#allocation1 + $0x3] ss:$9 sm:$0xff] %v2331_v36 }
 0x450   :  { %2869 = vst [vmem:[#allocation1 + $0x4] ss:$9 sm:$0xff] %v2332_v40 }
 0x451   :  { %2870 = vst [vmem:[#allocation1 + $0x5] ss:$9 sm:$0xff] %v2333_v44 }
 0x452   :  { %2871 = vst [vmem:[#allocation1 + $0x6] ss:$9 sm:$0xff] %v2334_v46  ;;  %v1881_v46 = vadd.f32 %v4108_v38, %v1793_v21  ;;  %v3379_v21 = vrot.slane %v4396_v2, 7 }
 0x453   :  { %2872 = vst [vmem:[#allocation1 + $0x7] ss:$9 sm:$0xff] %v2335_v48 }
 0x454   :  { %v3668_v36 = vpop.eup %3667  ;;  %3669 = vtanh.f32 %v1881_v46 }
 0x455   :  { %v2357_v37 = vrot.slane %v3668_v36, 1  ;;  %v2358_v40 = vrot.slane %v3668_v36, 2  ;;  %v2359_v44 = vrot.slane %v3668_v36, 3  ;;  %v2360_v47 = vrot.slane %v3668_v36, 4 }
 0x456   :  { %v2361_v48 = vrot.slane %v3668_v36, 5  ;;  %v2363_v52 = vrot.slane %v3668_v36, 7 }
 0x45a   :  { %v2873_v56 = vld [vmem:[#allocation1] sm:$0xff] }
 0x45b   :  { %2874 = vst [vmem:[#allocation1] ss:$9 sm:$0xff] %v3662_v49  ;;  %3169 = vperm.xlu2 %3570, %v2873_v56   ;;  %v2362_v49 = vrot.slane %v3668_v36, 6 }
 0x45c   :  { %2875 = vst [vmem:[#allocation1 + $0x1] ss:$9 sm:$0xff] %v2336_v53  ;;  %v3670_v53 = vpop.eup %3669 }
 0x45d   :  { %2876 = vst [vmem:[#allocation1 + $0x2] ss:$9 sm:$0xff] %v2337_v54  ;;  %v1796_v54 = vpop.f32.mrf.mxu3  ;;  %v2364_v56 = vrot.slane %v3670_v53, 1  ;;  %v2366_v60 = vrot.slane %v3670_v53, 3  ;;  %v2367_v62 = vrot.slane %v3670_v53, 4 }
 0x45e   :  { %2877 = vst [vmem:[#allocation1 + $0x3] ss:$9 sm:$0xff] %v2338_v51  ;;  %v2365_v51 = vrot.slane %v3670_v53, 2 }
 0x45f   :  { %2878 = vst [vmem:[#allocation1 + $0x4] ss:$9 sm:$0xff] %v2339_v61  ;;  %v1882_v61 = vadd.f32 %v4108_v38, %v1796_v54 }
 0x460   :  { %2879 = vst [vmem:[#allocation1 + $0x5] ss:$9 sm:$0xff] %v2340_v0  ;;  %v2368_v0 = vrot.slane %v3670_v53, 5 }
 0x461   :  { %2880 = vst [vmem:[#allocation1 + $0x6] ss:$9 sm:$0xff] %v2341_v1  ;;  %v2369_v1 = vrot.slane %v3670_v53, 6  ;;  %3671 = vtanh.f32 %v1882_v61 }
 0x462   :  { %2881 = vst [vmem:[#allocation1 + $0x7] ss:$9 sm:$0xff] %v2342_v5  ;;  %v2370_v5 = vrot.slane %v3670_v53, 7 }
 0x465   :  { %v1798_v7 = vpop.f32.mrf.mxu3 }
 0x466   :  { %v1883_v16 = vadd.f32 %v4108_v38, %v1798_v7 }
 0x468   :  { %3673 = vtanh.f32 %v1883_v16 }
 0x469   :  { %v2882_v13 = vld [vmem:[#allocation1] sm:$0xff] }
 0x46a   :  { %2883 = vst [vmem:[#allocation1] ss:$9 sm:$0xff] %v3664_v6  ;;  %3172 = vperm.xlu0 %3568, %v2882_v13   ;;  %v3672_v6 = vpop.eup %3671 }
 0x46b   :  { %2884 = vst [vmem:[#allocation1 + $0x1] ss:$9 sm:$0xff] %v2343_v8  ;;  %v2371_v8 = vrot.slane %v3672_v6, 1 }
 0x46c   :  { %2885 = vst [vmem:[#allocation1 + $0x2] ss:$9 sm:$0xff] %v2344_v9  ;;  %v2372_v9 = vrot.slane %v3672_v6, 2 }
 0x46d   :  { %2886 = vst [vmem:[#allocation1 + $0x3] ss:$9 sm:$0xff] %v2345_v14  ;;  %v2373_v14 = vrot.slane %v3672_v6, 3  ;;  %v1801_v25 = vpop.f32.mrf.mxu3 }
 0x46e   :  { %2887 = vst [vmem:[#allocation1 + $0x4] ss:$9 sm:$0xff] %v2346_v17  ;;  %v2374_v17 = vrot.slane %v3672_v6, 4  ;;  %v1884_v29 = vadd.f32 %v4108_v38, %v1801_v25 }
 0x46f   :  { %2888 = vst [vmem:[#allocation1 + $0x5] ss:$9 sm:$0xff] %v2347_v18  ;;  %v2375_v18 = vrot.slane %v3672_v6, 5 }
 0x470   :  { %2889 = vst [vmem:[#allocation1 + $0x6] ss:$9 sm:$0xff] %v2348_v20  ;;  %v2376_v20 = vrot.slane %v3672_v6, 6  ;;  %3675 = vtanh.f32 %v1884_v29 }
 0x471   :  { %2890 = vst [vmem:[#allocation1 + $0x7] ss:$9 sm:$0xff] %v2349_v23  ;;  %v2377_v23 = vrot.slane %v3672_v6, 7 }
 0x478   :  { %v2891_v27 = vld [vmem:[#allocation1] sm:$0xff] }
 0x479   :  { %2892 = vst [vmem:[#allocation1] ss:$9 sm:$0xff] %v3666_v24  ;;  %3175 = vperm.xlu1 %3569, %v2891_v27   ;;  %v3674_v24 = vpop.eup %3673 }
 0x47a   :  { %2893 = vst [vmem:[#allocation1 + $0x1] ss:$9 sm:$0xff] %v2350_v50  ;;  %v2378_v50 = vrot.slane %v3674_v24, 1 }
 0x47b   :  { %2894 = vst [vmem:[#allocation1 + $0x2] ss:$9 sm:$0xff] %v2351_v15  ;;  %v2379_v15 = vrot.slane %v3674_v24, 2 }
 0x47c   :  { %2895 = vst [vmem:[#allocation1 + $0x3] ss:$9 sm:$0xff] %v2352_v28  ;;  %v2380_v28 = vrot.slane %v3674_v24, 3 }
 0x47d   :  { %2896 = vst [vmem:[#allocation1 + $0x4] ss:$9 sm:$0xff] %v2353_v30  ;;  %v2381_v30 = vrot.slane %v3674_v24, 4 }
 0x47e   :  { %2897 = vst [vmem:[#allocation1 + $0x5] ss:$9 sm:$0xff] %v2354_v31  ;;  %v2382_v31 = vrot.slane %v3674_v24, 5 }
 0x47f   :  { %2898 = vst [vmem:[#allocation1 + $0x6] ss:$9 sm:$0xff] %v2355_v34  ;;  %v2383_v34 = vrot.slane %v3674_v24, 6 }
 0x480   :  { %2899 = vst [vmem:[#allocation1 + $0x7] ss:$9 sm:$0xff] %v2356_v39  ;;  %v2384_v39 = vrot.slane %v3674_v24, 7 }
 0x487   :  { %v2900_v43 = vld [vmem:[#allocation1] sm:$0xff] }
 0x488   :  { %2901 = vst [vmem:[#allocation1] ss:$9 sm:$0xff] %v3668_v36  ;;  %3178 = vperm.xlu2 %3570, %v2900_v43   ;;  %v3676_v36 = vpop.eup %3675 }
 0x489   :  { %2902 = vst [vmem:[#allocation1 + $0x1] ss:$9 sm:$0xff] %v2357_v37  ;;  %v1803_v37 = vpop.f32.mrf.mxu3  ;;  %v2386_v43 = vrot.slane %v3676_v36, 2  ;;  %v2387_v46 = vrot.slane %v3676_v36, 3  ;;  %v2391_v54 = vrot.slane %v3676_v36, 7 }
 0x48a   :  { %2903 = vst [vmem:[#allocation1 + $0x2] ss:$9 sm:$0xff] %v2358_v40  ;;  %v2385_v40 = vrot.slane %v3676_v36, 1 }
 0x48b   :  { %2904 = vst [vmem:[#allocation1 + $0x3] ss:$9 sm:$0xff] %v2359_v44 }
 0x48c   :  { %2905 = vst [vmem:[#allocation1 + $0x4] ss:$9 sm:$0xff] %v2360_v47  ;;  %v1885_v47 = vadd.f32 %v4108_v38, %v1803_v37 }
 0x48d   :  { %2906 = vst [vmem:[#allocation1 + $0x5] ss:$9 sm:$0xff] %v2361_v48  ;;  %v4407_v48 = vsel %vm3382_vm1, %v4327_v11, %v3379_v21 }
 0x48e   :  { %2907 = vst [vmem:[#allocation1 + $0x6] ss:$9 sm:$0xff] %v2362_v49  ;;  %v2388_v49 = vrot.slane %v3676_v36, 4  ;;  %3677 = vtanh.f32 %v1885_v47 }
 0x48f   :  { %2908 = vst [vmem:[#allocation1 + $0x7] ss:$9 sm:$0xff] %v2363_v52  ;;  %v2389_v52 = vrot.slane %v3676_v36, 5 }
 0x494   :  { %v3678_v2 = vpop.eup %3677 }
 0x496   :  { %v2909_v57 = vld [vmem:[#allocation1] sm:$0xff] }
 0x497   :  { %2910 = vst [vmem:[#allocation1] ss:$9 sm:$0xff] %v3670_v53  ;;  %3181 = vperm.xlu0 %3568, %v2909_v57   ;;  %v2390_v53 = vrot.slane %v3676_v36, 6  ;;  %v2393_v57 = vrot.slane %v3678_v2, 2 }
 0x498   :  { %2911 = vst [vmem:[#allocation1 + $0x1] ss:$9 sm:$0xff] %v2364_v56  ;;  %v1806_v56 = vpop.f32.mrf.mxu3 }
 0x499   :  { %2912 = vst [vmem:[#allocation1 + $0x2] ss:$9 sm:$0xff] %v2365_v51  ;;  %v2392_v51 = vrot.slane %v3678_v2, 1  ;;  %v1886_v61 = vadd.f32 %v4108_v38, %v1806_v56 }
 0x49a   :  { %2913 = vst [vmem:[#allocation1 + $0x3] ss:$9 sm:$0xff] %v2366_v60  ;;  %v2394_v60 = vrot.slane %v3678_v2, 3 }
 0x49b   :  { %2914 = vst [vmem:[#allocation1 + $0x4] ss:$9 sm:$0xff] %v2367_v62  ;;  %v2395_v62 = vrot.slane %v3678_v2, 4  ;;  %3679 = vtanh.f32 %v1886_v61 }
 0x49c   :  { %2915 = vst [vmem:[#allocation1 + $0x5] ss:$9 sm:$0xff] %v2368_v0  ;;  %v2396_v0 = vrot.slane %v3678_v2, 5 }
 0x49d   :  { %2916 = vst [vmem:[#allocation1 + $0x6] ss:$9 sm:$0xff] %v2369_v1  ;;  %v2397_v1 = vrot.slane %v3678_v2, 6 }
 0x49e   :  { %2917 = vst [vmem:[#allocation1 + $0x7] ss:$9 sm:$0xff] %v2370_v5  ;;  %v2398_v5 = vrot.slane %v3678_v2, 7 }
 0x4a0   :  { %v1808_v7 = vpop.f32.mrf.mxu3 }
 0x4a5   :  { %v2918_v13 = vld [vmem:[#allocation1] sm:$0xff] }
 0x4a6   :  { %2919 = vst [vmem:[#allocation1] ss:$9 sm:$0xff] %v3672_v6  ;;  %3184 = vperm.xlu1 %3569, %v2918_v13   ;;  %v3680_v6 = vpop.eup %3679 }
 0x4a7   :  { %2920 = vst [vmem:[#allocation1 + $0x1] ss:$9 sm:$0xff] %v2371_v8  ;;  %v2399_v8 = vrot.slane %v3680_v6, 1  ;;  %v2401_v13 = vrot.slane %v3680_v6, 3 }
 0x4a8   :  { %2921 = vst [vmem:[#allocation1 + $0x2] ss:$9 sm:$0xff] %v2372_v9  ;;  %v2400_v9 = vrot.slane %v3680_v6, 2 }
 0x4a9   :  { %2922 = vst [vmem:[#allocation1 + $0x3] ss:$9 sm:$0xff] %v2373_v14  ;;  %v1887_v14 = vadd.f32 %v4108_v38, %v1808_v7 }
 0x4aa   :  { %2923 = vst [vmem:[#allocation1 + $0x4] ss:$9 sm:$0xff] %v2374_v17  ;;  %v2402_v17 = vrot.slane %v3680_v6, 4 }
 0x4ab   :  { %2924 = vst [vmem:[#allocation1 + $0x5] ss:$9 sm:$0xff] %v2375_v18  ;;  %v2403_v18 = vrot.slane %v3680_v6, 5  ;;  %3681 = vtanh.f32 %v1887_v14 }
 0x4ac   :  { %2925 = vst [vmem:[#allocation1 + $0x6] ss:$9 sm:$0xff] %v2376_v20  ;;  %v2404_v20 = vrot.slane %v3680_v6, 6 }
 0x4ad   :  { %2926 = vst [vmem:[#allocation1 + $0x7] ss:$9 sm:$0xff] %v2377_v23  ;;  %v2405_v23 = vrot.slane %v3680_v6, 7 }
 0x4b1   :  { %v3682_v25 = vpop.eup %3681 }
 0x4b4   :  { %v2927_v27 = vld [vmem:[#allocation1] sm:$0xff] }
 0x4b5   :  { %2928 = vst [vmem:[#allocation1] ss:$9 sm:$0xff] %v3674_v24  ;;  %3187 = vperm.xlu2 %3570, %v2927_v27   ;;  %v1811_v24 = vpop.f32.mrf.mxu3  ;;  %v2408_v27 = vrot.slane %v3682_v25, 3 }
 0x4b6   :  { %2929 = vst [vmem:[#allocation1 + $0x1] ss:$9 sm:$0xff] %v2378_v50  ;;  %v2406_v50 = vrot.slane %v3682_v25, 1 }
 0x4b7   :  { %2930 = vst [vmem:[#allocation1 + $0x2] ss:$9 sm:$0xff] %v2379_v15  ;;  %v2407_v15 = vrot.slane %v3682_v25, 2 }
 0x4b8   :  { %2931 = vst [vmem:[#allocation1 + $0x3] ss:$9 sm:$0xff] %v2380_v28  ;;  %v1888_v28 = vadd.f32 %v4108_v38, %v1811_v24 }
 0x4b9   :  { %2932 = vst [vmem:[#allocation1 + $0x4] ss:$9 sm:$0xff] %v2381_v30  ;;  %v2409_v30 = vrot.slane %v3682_v25, 4 }
 0x4ba   :  { %2933 = vst [vmem:[#allocation1 + $0x5] ss:$9 sm:$0xff] %v2382_v31  ;;  %3683 = vtanh.f32 %v1888_v28 }
 0x4bb   :  { %2934 = vst [vmem:[#allocation1 + $0x6] ss:$9 sm:$0xff] %v2383_v34  ;;  %v2410_v34 = vrot.slane %v3682_v25, 5 }
 0x4bc   :  { %2935 = vst [vmem:[#allocation1 + $0x7] ss:$9 sm:$0xff] %v2384_v39  ;;  %v2411_v39 = vrot.slane %v3682_v25, 6 }
 0x4bd   :  { %v1813_v31 = vpop.f32.mrf.mxu3 }
 0x4c0   :  { %v3684_v21 = vpop.eup %3683 }
 0x4c3   :  { %v2936_v44 = vld [vmem:[#allocation1] sm:$0xff] }
 0x4c4   :  { %2937 = vst [vmem:[#allocation1] ss:$9 sm:$0xff] %v3676_v36  ;;  %3190 = vperm.xlu0 %3568, %v2936_v44   ;;  %v2412_v36 = vrot.slane %v3682_v25, 7  ;;  %v2415_v44 = vrot.slane %v3684_v21, 3 }
 0x4c5   :  { %2938 = vst [vmem:[#allocation1 + $0x1] ss:$9 sm:$0xff] %v2385_v40  ;;  %v1816_v37 = vpop.f32.mrf.mxu3  ;;  %v2413_v40 = vrot.slane %v3684_v21, 1 }
 0x4c6   :  { %2939 = vst [vmem:[#allocation1 + $0x2] ss:$9 sm:$0xff] %v2386_v43  ;;  %v2414_v43 = vrot.slane %v3684_v21, 2 }
 0x4c7   :  { %2940 = vst [vmem:[#allocation1 + $0x3] ss:$9 sm:$0xff] %v2387_v46  ;;  %v1889_v46 = vadd.f32 %v4108_v38, %v1813_v31 }
 0x4c8   :  { %2941 = vst [vmem:[#allocation1 + $0x4] ss:$9 sm:$0xff] %v2388_v49  ;;  %v2416_v49 = vrot.slane %v3684_v21, 4 }
 0x4c9   :  { %2942 = vst [vmem:[#allocation1 + $0x5] ss:$9 sm:$0xff] %v2389_v52  ;;  %v2417_v52 = vrot.slane %v3684_v21, 5  ;;  %3685 = vtanh.f32 %v1889_v46 }
 0x4ca   :  { %2943 = vst [vmem:[#allocation1 + $0x6] ss:$9 sm:$0xff] %v2390_v53  ;;  %v2418_v53 = vrot.slane %v3684_v21, 6 }
 0x4cb   :  { %2944 = vst [vmem:[#allocation1 + $0x7] ss:$9 sm:$0xff] %v2391_v54  ;;  %v2419_v54 = vrot.slane %v3684_v21, 7 }
 0x4cf   :  { %v3686_v56 = vpop.eup %3685 }
 0x4d2   :  { %v2945_v11 = vld [vmem:[#allocation1] sm:$0xff] }
 0x4d3   :  { %2946 = vst [vmem:[#allocation1] ss:$9 sm:$0xff] %v3678_v2  ;;  %3193 = vperm.xlu1 %3569, %v2945_v11   ;;  %v1818_v2 = vpop.f32.mrf.mxu3  ;;  %v2422_v11 = vrot.slane %v3686_v56, 3 }
 0x4d4   :  { %2947 = vst [vmem:[#allocation1 + $0x1] ss:$9 sm:$0xff] %v2392_v51  ;;  %v2420_v51 = vrot.slane %v3686_v56, 1 }
 0x4d5   :  { %2948 = vst [vmem:[#allocation1 + $0x2] ss:$9 sm:$0xff] %v2393_v57  ;;  %v2421_v57 = vrot.slane %v3686_v56, 2 }
 0x4d6   :  { %2949 = vst [vmem:[#allocation1 + $0x3] ss:$9 sm:$0xff] %v2394_v60  ;;  %v1890_v60 = vadd.f32 %v4108_v38, %v1816_v37 }
 0x4d7   :  { %2950 = vst [vmem:[#allocation1 + $0x4] ss:$9 sm:$0xff] %v2395_v62  ;;  %v2423_v62 = vrot.slane %v3686_v56, 4 }
 0x4d8   :  { %2951 = vst [vmem:[#allocation1 + $0x5] ss:$9 sm:$0xff] %v2396_v0  ;;  %3687 = vtanh.f32 %v1890_v60 }
 0x4d9   :  { %2952 = vst [vmem:[#allocation1 + $0x6] ss:$9 sm:$0xff] %v2397_v1  ;;  %v2424_v1 = vrot.slane %v3686_v56, 5 }
 0x4da   :  { %2953 = vst [vmem:[#allocation1 + $0x7] ss:$9 sm:$0xff] %v2398_v5  ;;  %v2425_v5 = vrot.slane %v3686_v56, 6 }
 0x4db   :  { %v1821_v0 = vpop.f32.mrf.mxu3 }
 0x4de   :  { %v3688_v7 = vpop.eup %3687 }
 0x4df   :  { %v2429_v14 = vrot.slane %v3688_v7, 3  ;;  %v2433_v24 = vrot.slane %v3688_v7, 7 }
 0x4e1   :  { %v2954_v16 = vld [vmem:[#allocation1] sm:$0xff] }
 0x4e2   :  { %3196 = vperm.xlu2 %3570, %v2954_v16   ;;  %2955 = vst [vmem:[#allocation1] ss:$9 sm:$0xff] %v3680_v6  ;;  %v2426_v6 = vrot.slane %v3686_v56, 7  ;;  %v1891_v16 = vadd.f32 %v4108_v38, %v1818_v2 }
 0x4e3   :  { %2956 = vst [vmem:[#allocation1 + $0x1] ss:$9 sm:$0xff] %v2399_v8  ;;  %v1823_v8 = vpop.f32.mrf.mxu3 }
 0x4e4   :  { %2957 = vst [vmem:[#allocation1 + $0x2] ss:$9 sm:$0xff] %v2400_v9  ;;  %v2427_v9 = vrot.slane %v3688_v7, 1  ;;  %3689 = vtanh.f32 %v1891_v16  ;;  %v1893_v46 = vadd.f32 %v4108_v38, %v1823_v8 }
 0x4e5   :  { %2958 = vst [vmem:[#allocation1 + $0x3] ss:$9 sm:$0xff] %v2401_v13  ;;  %v2428_v13 = vrot.slane %v3688_v7, 2 }
 0x4e6   :  { %2959 = vst [vmem:[#allocation1 + $0x4] ss:$9 sm:$0xff] %v2402_v17 }
 0x4e7   :  { %2960 = vst [vmem:[#allocation1 + $0x5] ss:$9 sm:$0xff] %v2403_v18  ;;  %v2430_v18 = vrot.slane %v3688_v7, 4 }
 0x4e8   :  { %2961 = vst [vmem:[#allocation1 + $0x6] ss:$9 sm:$0xff] %v2404_v20  ;;  %v2431_v20 = vrot.slane %v3688_v7, 5 }
 0x4e9   :  { %2962 = vst [vmem:[#allocation1 + $0x7] ss:$9 sm:$0xff] %v2405_v23  ;;  %v2432_v23 = vrot.slane %v3688_v7, 6 }
 0x4f0   :  { %v2963_v29 = vld [vmem:[#allocation1] sm:$0xff] }
 0x4f1   :  { %3199 = vperm.xlu0 %3568, %v2963_v29   ;;  %2964 = vst [vmem:[#allocation1] ss:$9 sm:$0xff] %v3682_v25  ;;  %v1826_v25 = vpop.f32.mrf.mxu3 }
 0x4f2   :  { %2965 = vst [vmem:[#allocation1 + $0x1] ss:$9 sm:$0xff] %v2406_v50  ;;  %v3690_v50 = vpop.eup %3689 }
 0x4f3   :  { %2966 = vst [vmem:[#allocation1 + $0x2] ss:$9 sm:$0xff] %v2407_v15  ;;  %v2434_v15 = vrot.slane %v3690_v50, 1  ;;  %v2436_v29 = vrot.slane %v3690_v50, 3 }
 0x4f4   :  { %2967 = vst [vmem:[#allocation1 + $0x3] ss:$9 sm:$0xff] %v2408_v27  ;;  %v2435_v27 = vrot.slane %v3690_v50, 2 }
 0x4f5   :  { %2968 = vst [vmem:[#allocation1 + $0x4] ss:$9 sm:$0xff] %v2409_v30  ;;  %v1892_v30 = vadd.f32 %v4108_v38, %v1821_v0 }
 0x4f6   :  { %2969 = vst [vmem:[#allocation1 + $0x5] ss:$9 sm:$0xff] %v2410_v34  ;;  %v2437_v34 = vrot.slane %v3690_v50, 4 }
 0x4f7   :  { %2970 = vst [vmem:[#allocation1 + $0x6] ss:$9 sm:$0xff] %v2411_v39  ;;  %v2438_v39 = vrot.slane %v3690_v50, 5  ;;  %3691 = vtanh.f32 %v1892_v30 }
 0x4f8   :  { %2971 = vst [vmem:[#allocation1 + $0x7] ss:$9 sm:$0xff] %v2412_v36  ;;  %v2439_v36 = vrot.slane %v3690_v50, 6  ;;  %3693 = vtanh.f32 %v1893_v46 }
 0x4f9   :  { %v1828_v28 = vpop.f32.mrf.mxu3 }
 0x4fd   :  { %v3692_v37 = vpop.eup %3691 }
 0x4fe   :  { %v3694_v2 = vpop.eup %3693 }
 0x4ff   :  { %v2972_v47 = vld [vmem:[#allocation1] sm:$0xff]  ;;  %v2453_v0 = vrot.slane %v3694_v2, 6 }
 0x500   :  { %3202 = vperm.xlu1 %3569, %v2972_v47   ;;  %2973 = vst [vmem:[#allocation1] ss:$9 sm:$0xff] %v3684_v21  ;;  %v2440_v21 = vrot.slane %v3690_v50, 7 }
 0x501   :  { %2974 = vst [vmem:[#allocation1 + $0x1] ss:$9 sm:$0xff] %v2413_v40  ;;  %v2441_v40 = vrot.slane %v3692_v37, 1 }
 0x502   :  { %2975 = vst [vmem:[#allocation1 + $0x2] ss:$9 sm:$0xff] %v2414_v43  ;;  %v2442_v43 = vrot.slane %v3692_v37, 2 }
 0x503   :  { %2976 = vst [vmem:[#allocation1 + $0x3] ss:$9 sm:$0xff] %v2415_v44  ;;  %v2443_v44 = vrot.slane %v3692_v37, 3 }
 0x504   :  { %2977 = vst [vmem:[#allocation1 + $0x4] ss:$9 sm:$0xff] %v2416_v49  ;;  %v2444_v49 = vrot.slane %v3692_v37, 4 }
 0x505   :  { %2978 = vst [vmem:[#allocation1 + $0x5] ss:$9 sm:$0xff] %v2417_v52  ;;  %v2445_v52 = vrot.slane %v3692_v37, 5 }
 0x506   :  { %2979 = vst [vmem:[#allocation1 + $0x6] ss:$9 sm:$0xff] %v2418_v53  ;;  %v2446_v53 = vrot.slane %v3692_v37, 6 }
 0x507   :  { %2980 = vst [vmem:[#allocation1 + $0x7] ss:$9 sm:$0xff] %v2419_v54  ;;  %v2447_v54 = vrot.slane %v3692_v37, 7 }
 0x50e   :  { %v2981_v61 = vld [vmem:[#allocation1] sm:$0xff] }
 0x50f   :  { %3205 = vperm.xlu2 %3570, %v2981_v61   ;;  %2982 = vst [vmem:[#allocation1] ss:$9 sm:$0xff] %v3686_v56  ;;  %v2448_v56 = vrot.slane %v3694_v2, 1  ;;  %v2451_v61 = vrot.slane %v3694_v2, 4 }
 0x510   :  { %2983 = vst [vmem:[#allocation1 + $0x1] ss:$9 sm:$0xff] %v2420_v51  ;;  %v2449_v51 = vrot.slane %v3694_v2, 2 }
 0x511   :  { %2984 = vst [vmem:[#allocation1 + $0x2] ss:$9 sm:$0xff] %v2421_v57  ;;  %v2450_v57 = vrot.slane %v3694_v2, 3 }
 0x512   :  { %2985 = vst [vmem:[#allocation1 + $0x3] ss:$9 sm:$0xff] %v2422_v11  ;;  %v1894_v11 = vadd.f32 %v4108_v38, %v1826_v25 }
 0x513   :  { %2986 = vst [vmem:[#allocation1 + $0x4] ss:$9 sm:$0xff] %v2423_v62  ;;  %v2452_v62 = vrot.slane %v3694_v2, 5 }
 0x514   :  { %2987 = vst [vmem:[#allocation1 + $0x5] ss:$9 sm:$0xff] %v2424_v1  ;;  %v2454_v1 = vrot.slane %v3694_v2, 7  ;;  %3695 = vtanh.f32 %v1894_v11 }
 0x515   :  { %2988 = vst [vmem:[#allocation1 + $0x6] ss:$9 sm:$0xff] %v2425_v5 }
 0x516   :  { %2989 = vst [vmem:[#allocation1 + $0x7] ss:$9 sm:$0xff] %v2426_v6 }
 0x51a   :  { %v3696_v5 = vpop.eup %3695 }
 0x51b   :  { %v2455_v6 = vrot.slane %v3696_v5, 1  ;;  %v2457_v8 = vrot.slane %v3696_v5, 3  ;;  %v2461_v16 = vrot.slane %v3696_v5, 7 }
 0x51d   :  { %v2990_v17 = vld [vmem:[#allocation1] sm:$0xff] }
 0x51e   :  { %3208 = vperm.xlu0 %3568, %v2990_v17   ;;  %2991 = vst [vmem:[#allocation1] ss:$9 sm:$0xff] %v3688_v7  ;;  %v2456_v7 = vrot.slane %v3696_v5, 2 }
 0x51f   :  { %2992 = vst [vmem:[#allocation1 + $0x1] ss:$9 sm:$0xff] %v2427_v9  ;;  %v2458_v9 = vrot.slane %v3696_v5, 4 }
 0x520   :  { %2993 = vst [vmem:[#allocation1 + $0x2] ss:$9 sm:$0xff] %v2428_v13  ;;  %v2459_v13 = vrot.slane %v3696_v5, 5 }
 0x521   :  { %2994 = vst [vmem:[#allocation1 + $0x3] ss:$9 sm:$0xff] %v2429_v14  ;;  %v2460_v14 = vrot.slane %v3696_v5, 6 }
 0x522   :  { %2995 = vst [vmem:[#allocation1 + $0x4] ss:$9 sm:$0xff] %v2430_v18  ;;  %v3134_v18 = vpop.permute.xlu2 %3133 }
 0x523   :  { %2996 = vst [vmem:[#allocation1 + $0x5] ss:$9 sm:$0xff] %v2431_v20  ;;  %v3137_v20 = vpop.permute.xlu0 %3136 }
 0x524   :  { %2997 = vst [vmem:[#allocation1 + $0x6] ss:$9 sm:$0xff] %v2432_v23  ;;  %v3320_v46 = vperm.slane %v3137_v20, %v4203_v3 }
 0x525   :  { %2998 = vst [vmem:[#allocation1 + $0x7] ss:$9 sm:$0xff] %v2433_v24  ;;  %v3140_v24 = vpop.permute.xlu1 %3139 }
 0x52a   :  { %v3143_v23 = vpop.permute.xlu2 %3142 }
 0x52b   :  { %v3146_v25 = vpop.permute.xlu0 %3145  ;;  %v3324_v11 = vperm.slane %v3143_v23, %v4224_v45 }
 0x52c   :  { %v2999_v31 = vld [vmem:[#allocation1] sm:$0xff] }
 0x52d   :  { %3211 = vperm.xlu1 %3569, %v2999_v31   ;;  %3000 = vst [vmem:[#allocation1] ss:$9 sm:$0xff] %v3690_v50 }
 0x52e   :  { %3001 = vst [vmem:[#allocation1 + $0x1] ss:$9 sm:$0xff] %v2434_v15  ;;  %v3149_v15 = vpop.permute.xlu1 %3148 }
 0x52f   :  { %3002 = vst [vmem:[#allocation1 + $0x2] ss:$9 sm:$0xff] %v2435_v27 }
 0x530   :  { %3003 = vst [vmem:[#allocation1 + $0x3] ss:$9 sm:$0xff] %v2436_v29 }
 0x531   :  { %3004 = vst [vmem:[#allocation1 + $0x4] ss:$9 sm:$0xff] %v2437_v34 }
 0x532   :  { %3005 = vst [vmem:[#allocation1 + $0x5] ss:$9 sm:$0xff] %v2438_v39  ;;  %v3152_v50 = vpop.permute.xlu2 %3151 }
 0x533   :  { %3006 = vst [vmem:[#allocation1 + $0x6] ss:$9 sm:$0xff] %v2439_v36  ;;  %v3155_v27 = vpop.permute.xlu0 %3154 }
 0x534   :  { %3007 = vst [vmem:[#allocation1 + $0x7] ss:$9 sm:$0xff] %v2440_v21 }
 0x536   :  { %v3158_v29 = vpop.permute.xlu1 %3157 }
 0x53a   :  { %v3161_v28 = vpop.permute.xlu2 %3160 }
 0x53b   :  { %v3008_v47 = vld [vmem:[#allocation1] sm:$0xff]  ;;  %v3164_v30 = vpop.permute.xlu0 %3163 }
 0x53c   :  { %3214 = vperm.xlu2 %3570, %v3008_v47   ;;  %3009 = vst [vmem:[#allocation1] ss:$9 sm:$0xff] %v3692_v37  ;;  %v3322_v47 = vperm.slane %v3140_v24, %v4211_v19 }
 0x53d   :  { %3010 = vst [vmem:[#allocation1 + $0x1] ss:$9 sm:$0xff] %v2441_v40 }
 0x53e   :  { %3011 = vst [vmem:[#allocation1 + $0x2] ss:$9 sm:$0xff] %v2442_v43  ;;  %v3167_v34 = vpop.permute.xlu1 %3166 }
 0x53f   :  { %3012 = vst [vmem:[#allocation1 + $0x3] ss:$9 sm:$0xff] %v2443_v44 }
 0x540   :  { %3013 = vst [vmem:[#allocation1 + $0x4] ss:$9 sm:$0xff] %v2444_v49 }
 0x541   :  { %3014 = vst [vmem:[#allocation1 + $0x5] ss:$9 sm:$0xff] %v2445_v52 }
 0x542   :  { %3015 = vst [vmem:[#allocation1 + $0x6] ss:$9 sm:$0xff] %v2446_v53  ;;  %v4418_v31 = vpop.permute.xlu2 %3169  ;;  %v3319_v53 = vperm.slane %v3134_v18, %v4200_v63 }
 0x543   :  { %3016 = vst [vmem:[#allocation1 + $0x7] ss:$9 sm:$0xff] %v2447_v54  ;;  %v4420_v39 = vpop.permute.xlu0 %3172 }
 0x544   :  { %v3321_v54 = vsel %vm3230_vm2, %v3320_v46, %v3319_v53  ;;  %v3342_v46 = vperm.slane %v4418_v31, %v4298_v55 }
 0x546   :  { %v4424_v21 = vpop.permute.xlu1 %3175 }
 0x54a   :  { %v3017_v60 = vld [vmem:[#allocation1] sm:$0xff]  ;;  %v4422_v36 = vpop.permute.xlu2 %3178 }
 0x54b   :  { %3217 = vperm.xlu0 %3568, %v3017_v60   ;;  %3018 = vst [vmem:[#allocation1] ss:$9 sm:$0xff] %v3694_v2  ;;  %v3182_v37 = vpop.permute.xlu0 %3181  ;;  %v3323_v2 = vsel %vm3234_vm3, %v3322_v47, %v3321_v54  ;;  %v3328_v60 = vperm.slane %v3149_v15, %v4237_v32  ;;  %v3340_v15 = vperm.slane %v3167_v34, %v4291_v26 }
 0x54c   :  { %3019 = vst [vmem:[#allocation1 + $0x1] ss:$9 sm:$0xff] %v2448_v56  ;;  %v3326_v56 = vperm.slane %v3146_v25, %v4221_v42  ;;  %v3346_v47 = vperm.slane %v4424_v21, %v4313_v35  ;;  %v3348_v21 = vperm.slane %v4422_v36, %v4322_v12 }
 0x54d   :  { %3020 = vst [vmem:[#allocation1 + $0x2] ss:$9 sm:$0xff] %v2449_v51 }
 0x54e   :  { %3021 = vst [vmem:[#allocation1 + $0x3] ss:$9 sm:$0xff] %v2450_v57  ;;  %v3185_v43 = vpop.permute.xlu1 %3184 }
 0x54f   :  { %3022 = vst [vmem:[#allocation1 + $0x4] ss:$9 sm:$0xff] %v2451_v61  ;;  %v3351_v51 = vperm.slane %v3185_v43, %v4203_v3  ;;  %v3350_v61 = vperm.slane %v3182_v37, %v4200_v63  ;;  %v3332_v3 = vperm.slane %v3155_v27, %v4258_v41  ;;  %v3330_v63 = vperm.slane %v3152_v50, %v4248_v10 }
 0x550   :  { %3023 = vst [vmem:[#allocation1 + $0x5] ss:$9 sm:$0xff] %v2452_v62  ;;  %v3325_v62 = vsel %vm3238_vm4, %v3324_v11, %v3323_v2  ;;  %v3336_v50 = vperm.slane %v3161_v28, %v4275_v33  ;;  %v3344_v28 = vperm.slane %v4420_v39, %v4307_v22 }
 0x551   :  { %3024 = vst [vmem:[#allocation1 + $0x6] ss:$9 sm:$0xff] %v2453_v0  ;;  %v3327_v0 = vsel %vm3242_vm5, %v3326_v56, %v3325_v62 }
 0x552   :  { %3025 = vst [vmem:[#allocation1 + $0x7] ss:$9 sm:$0xff] %v2454_v1  ;;  %v3188_v40 = vpop.permute.xlu2 %3187  ;;  %v3352_v1 = vsel %vm3230_vm2, %v3351_v51, %v3350_v61  ;;  %vm3384_vm2 = vcmask 1042434  }
 0x553   :  { %v3191_v44 = vpop.permute.xlu0 %3190 }
 0x556   :  { %v3194_v52 = vpop.permute.xlu1 %3193 }
 0x559   :  { %v3026_v38 = vld [vmem:[#allocation1] sm:$0xff] }
 0x55a   :  { %3220 = vperm.xlu1 %3569, %v3026_v38   ;;  %3027 = vst [vmem:[#allocation1] ss:$9 sm:$0xff] %v3696_v5  ;;  %v3197_v49 = vpop.permute.xlu2 %3196  ;;  %v3355_v5 = vperm.slane %v3191_v44, %v4224_v45  ;;  %v3353_v38 = vperm.slane %v3188_v40, %v4211_v19 }
 0x55b   :  { %3028 = vst [vmem:[#allocation1 + $0x1] ss:$9 sm:$0xff] %v2455_v6  ;;  %v3359_v24 = vperm.slane %v3197_v49, %v4237_v32 }
 0x55c   :  { %3029 = vst [vmem:[#allocation1 + $0x2] ss:$9 sm:$0xff] %v2456_v7 }
 0x55d   :  { %3030 = vst [vmem:[#allocation1 + $0x3] ss:$9 sm:$0xff] %v2457_v8  ;;  %v3329_v8 = vsel %vm3246_vm6, %v3328_v60, %v3327_v0 }
 0x55e   :  { %3031 = vst [vmem:[#allocation1 + $0x4] ss:$9 sm:$0xff] %v2458_v9  ;;  %v3357_v9 = vperm.slane %v3194_v52, %v4221_v42  ;;  %v3338_v42 = vperm.slane %v3164_v30, %v4281_v58 }
 0x55f   :  { %3032 = vst [vmem:[#allocation1 + $0x5] ss:$9 sm:$0xff] %v2459_v13  ;;  %v3334_v13 = vperm.slane %v3158_v29, %v4266_v4 }
 0x560   :  { %3033 = vst [vmem:[#allocation1 + $0x6] ss:$9 sm:$0xff] %v2460_v14  ;;  %v3354_v14 = vsel %vm3234_vm3, %v3353_v38, %v3352_v1  ;;  %vm3386_vm3 = vcmask 1041408  }
 0x561   :  { %3034 = vst [vmem:[#allocation1 + $0x7] ss:$9 sm:$0xff] %v2461_v16  ;;  %v3331_v16 = vsel %vm3250_vm7, %v3330_v63, %v3329_v8  ;;  %v3356_v45 = vsel %vm3238_vm4, %v3355_v5, %v3354_v14  ;;  %vm3391_vm4 = vcmp.lt.s32.totalorder %v3225_v59, 504 }
 0x562   :  { %v3333_v18 = vsel %vm3254_vm8, %v3332_v3, %v3331_v16  ;;  %v3358_v20 = vsel %vm3242_vm5, %v3357_v9, %v3356_v45 }
 0x563   :  { %v3200_v57 = vpop.permute.xlu0 %3199  ;;  %v3335_v19 = vsel %vm3258_vm9, %v3334_v13, %v3333_v18  ;;  %v3360_v27 = vsel %vm3246_vm6, %v3359_v24, %v3358_v20 }
 0x564   :  { %v3361_v23 = vperm.slane %v3200_v57, %v4248_v10  ;;  %v3337_v40 = vsel %vm3262_vm10, %v3336_v50, %v3335_v19 }
 0x565   :  { %v3339_v43 = vsel %vm3266_vm11, %v3338_v42, %v3337_v40 }
 0x566   :  { %v3362_v10 = vsel %vm3250_vm7, %v3361_v23, %v3360_v27 }
 0x568   :  { %v3035_v17 = vld [vmem:[#allocation1] sm:$0xff] }
 0x569   :  { %3223 = vperm.xlu2 %3570, %v3035_v17   ;;  %v3206_v6 = vpop.permute.xlu2 %3205 }
 0x56a   :  { %v3365_v34 = vperm.slane %v3206_v6, %v4266_v4 }
 0x572   :  { %v3203_v7 = vpop.permute.xlu1 %3202 }
 0x573   :  { %v3363_v25 = vperm.slane %v3203_v7, %v4258_v41  ;;  %v3341_v41 = vsel %vm3270_vm12, %v3340_v15, %v3339_v43 }
 0x575   :  { %v3364_v30 = vsel %vm3254_vm8, %v3363_v25, %v3362_v10 }
 0x576   :  { %v3366_v52 = vsel %vm3258_vm9, %v3365_v34, %v3364_v30 }
 0x590   :  { %v3209_v17 = vpop.permute.xlu0 %3208 }
 0x591   :  { %v3367_v32 = vperm.slane %v3209_v17, %v4275_v33  ;;  %v3343_v33 = vsel %vm3274_vm13, %v3342_v46, %v3341_v41 }
 0x592   :  { %v3345_v54 = vsel %vm3278_vm14, %v3344_v28, %v3343_v33 }
 0x593   :  { %v3368_v53 = vsel %vm3262_vm10, %v3367_v32, %v3366_v52 }
 0x596   :  { %v3215_v29 = vpop.permute.xlu2 %3214 }
 0x597   :  { %v3371_v31 = vperm.slane %v3215_v29, %v4291_v26 }
 0x59f   :  { %v3212_v37 = vpop.permute.xlu1 %3211 }
 0x5a0   :  { %v3369_v44 = vperm.slane %v3212_v37, %v4281_v58  ;;  %v3347_v58 = vsel %vm3282_vm15, %v3346_v47, %v3345_v54 }
 0x5a1   :  { %v3349_v11 = vsel %vm3286_vm0, %v3348_v21, %v3347_v58 }
 0x5a2   :  { %v3370_v39 = vsel %vm3266_vm11, %v3369_v44, %v3368_v53  ;;  %v3380_v26 = vrot.slane %v3349_v11, 6 }
 0x5a3   :  { %v3372_v51 = vsel %vm3270_vm12, %v3371_v31, %v3370_v39 }
 0x5bd   :  { %v3218_v49 = vpop.permute.xlu0 %3217 }
 0x5be   :  { %v3373_v4 = vperm.slane %v3218_v49, %v4298_v55 }
 0x5c0   :  { %v3374_v61 = vsel %vm3274_vm13, %v3373_v4, %v3372_v51 }
 0x5c3   :  { %v3224_v2 = vpop.permute.xlu2 %3223 }
 0x5c4   :  { %v3377_v60 = vperm.slane %v3224_v2, %v4313_v35 }
 0x5cc   :  { %v3221_v56 = vpop.permute.xlu1 %3220 }
 0x5cd   :  { %v3375_v57 = vperm.slane %v3221_v56, %v4307_v22 }
 0x5cf   :  { %v3376_v55 = vsel %vm3278_vm14, %v3375_v57, %v3374_v61 }
 0x5d0   :  { %v3378_v62 = vsel %vm3282_vm15, %v3377_v60, %v3376_v55 }
 0x5d1   :  { %v3381_v12 = vrot.slane %v3378_v62, 5 }
 0x5d3   :  { %v3385_v22 = vsel %vm3384_vm2, %v3380_v26, %v3381_v12 }
 0x5d4   :  { %v3387_v35 = vsel %vm3386_vm3, %v4407_v48, %v3385_v22 }
 0x5d5   :  { %3393 = vst.msk [vmem:[#allocation3] sm:$0xf] %vm3391_vm4, %v3387_v35 }
 0x5d6   :  { %3404 = dma.vmem_to_hbm [thread:$0]  %s3400_s18, 64, %s3402_s20, [#allocation4]  }
 0x5d7   :  { %3721 = dma.done.wait [#allocation4], 64  }
 0x5d8   :  { %3722 = vsyncadd [#allocation4], 4294967232 }
 0x5d9   :  { %3409 = vsyncpa [#allocation4], 1 }

</bundles_post_ra>
